<compile_context>
chip_gen: v5e
topology: v5e:2x2
jax: 0.10.0
libtpu: 0.0.40
codegen_flags: <defaults>
</compile_context>

<pallas_src>
import jax
import jax.numpy as jnp
from jax.experimental import pallas as pl
from jax.experimental.pallas import tpu as pltpu


_MASKED_INIT = -1.0e30  # finite running-max init: an all-masked seq tile then
                        # yields exp(-inf - (-1e30)) = 0 instead of NaN.


def _softdot_kernel(target_ref, ctx_ref, bias_ref, wctx_ref, attn_ref,
                    scores_ref, m_ref, acc_ref):
    """One (batch-tile, seq-tile) step of masked soft-dot attention.

    wctx/attn output blocks and the VMEM scratch are resident across the seq
    grid axis; normalization and output stores happen on the last seq step.
    """
    j = pl.program_id(1)
    ts = bias_ref.shape[1]                      # seq tile size (multiple of 128)

    @pl.when(j == 0)
    def _():
        m_ref[...] = jnp.full_like(m_ref, _MASKED_INIT)
        acc_ref[...] = jnp.zeros_like(acc_ref)

    target = target_ref[...]                    # (bt, Dout_pad) f32
    ctx = ctx_ref[...]                          # (bt, ts, Dout_pad) native dtype
    bias = bias_ref[...]                        # (bt, ts) f32: 0 or -inf

    # scores[b, s] = <ctx[b, s, :], target[b, :]> + bias[b, s]
    # VPU multiply + lane reduce over Dout; promotion to f32 gives f32 accum.
    s = jnp.sum(ctx * target[:, None, :], axis=-1) + bias          # (bt, ts) f32

    # Stash raw masked scores so the exactly-normalized attention matrix can be
    # produced at the end (pure online softmax cannot return attn per tile).
    off = pl.multiple_of(j * ts, 128)
    scores_ref[:, pl.ds(off, ts)] = s

    # Online max + rescaled accumulation of the weighted context over seq tiles.
    m_old = m_ref[...]                                              # (bt, 1)
    m_new = jnp.maximum(m_old, jnp.max(s, axis=-1, keepdims=True))  # (bt, 1)
    p = jnp.exp(s - m_new)                                          # (bt, ts) f32
    corr = jnp.exp(m_old - m_new)                                   # (bt, 1)
    acc_ref[...] = acc_ref[...] * corr + jnp.sum(p[:, :, None] * ctx, axis=1)
    m_ref[...] = m_new

    @pl.when(j == pl.num_programs(1) - 1)
    def _():
        e = jnp.exp(scores_ref[...] - m_ref[...])                   # (bt, S_pad)
        l = jnp.sum(e, axis=-1, keepdims=True)                      # (bt, 1)
        inv = 1.0 / l          # exact normalization (fully-masked row -> NaN,
                               # same as PyTorch's masked_fill(-inf) softmax)
        attn_ref[...] = (e * inv).astype(attn_ref.dtype)
        wctx_ref[...] = (acc_ref[...] * inv).astype(wctx_ref.dtype)


def _round_up(x, m):
    return ((x + m - 1) // m) * m


def _vmem_capacity_bytes():
    try:
        return int(pltpu.get_tpu_info().vmem_capacity_bytes)
    except Exception:
        return 64 * 1024 * 1024     # v7x-safe fallback (smallest VMEM generation)


def _choose_tiles(B, S_pad, Dout_pad, ctx_item, out_item, budget_bytes):
    """Pick (batch_tile, seq_tile) from the real VMEM working-set footprint:
    ctx x2 (double buffer) + f32 contraction temporary + resident scores/acc
    scratch + target/bias/attn/wctx blocks (x2 buffers each)."""

    def bt_capacity(ts):
        per_bt = (
            ts * Dout_pad * (2 * ctx_item + 4)        # ctx x2 + f32 product temp
            + S_pad * (4 + 2 * out_item)              # scores scratch + attn out x2
            + ts * 2 * 4                              # bias block x2 (f32)
            + Dout_pad * (4 + 2 * 4 + 2 * out_item)   # acc + target x2 + wctx x2
            + 512
        )
        return budget_bytes // per_bt

    # Shrink the seq tile (multiples of 128) until an 8-row batch tile fits.
    ts = S_pad
    while ts > 128 and bt_capacity(ts) < 8:
        ts = max(128, _round_up(ts // 2, 128))

    bt = (int(bt_capacity(ts)) // 8) * 8
    # Floor at 8 (sublane alignment of the 2-D blocks).  Extremely large Dout
    # could still overshoot the budget; headroom is left in vmem_limit_bytes.
    # A Dout grid axis would be the next refinement for that regime.
    bt = max(8, bt)
    bt = min(bt, _round_up(B, 8))
    if B >= 16:
        # Keep >= 2 batch tiles so ("parallel", ...) can shard across the two
        # v7x TensorCores (a harmless extra grid step on 1-TC v5e/v6e).
        bt = min(bt, _round_up((B + 1) // 2, 8))
    return bt, ts


def soft_dot_attention(h, w, context, mask=None, *, batch_tile=None, seq_tile=None):
    """h: (B, Din), w: (Dout, Din) [nn.Linear layout], context: (B, S, Dout),
    mask: (B, S) with 0 == masked (or None). Returns (weighted_context, attn)."""
    B, _ = h.shape
    Dout = w.shape[0]
    S = context.shape[1]
    out_dtype = h.dtype
    ctx_item = jnp.dtype(context.dtype).itemsize
    out_item = jnp.dtype(out_dtype).itemsize

    # linear_in hoisted to XLA: keeps the (Din, Dout) weight out of VMEM (a
    # double-buffered 4k x 4k f32 weight would not even fit v7x) and removes
    # the per-call transpose materialization.  f32 target for accurate softmax.
    target = jnp.dot(h, jnp.asarray(w).T, preferred_element_type=jnp.float32)

    # Additive mask bias (0 / -inf) computed once in the wrapper; padded seq
    # positions below also receive -inf so they get exactly zero attention.
    if mask is None:
        bias = jnp.zeros((B, S), jnp.float32)
    else:
        bias = jnp.where(jnp.asarray(mask) == 0, -jnp.inf, 0.0).astype(jnp.float32)

    # Pad S and Dout to multiples of 128 -> lane-dense (unmasked) vst stores.
    Dout_pad = _round_up(Dout, 128)
    S_pad0 = _round_up(S, 128)

    capacity = _vmem_capacity_bytes()
    working_budget = capacity // 2                          # headroom for Mosaic
    vmem_limit = int(max(capacity - (16 << 20), (capacity * 3) // 4))

    bt, ts = _choose_tiles(B, S_pad0, Dout_pad, ctx_item, out_item, working_budget)
    if seq_tile is not None:
        ts = _round_up(int(seq_tile), 128)
    if batch_tile is not None:
        bt = _round_up(int(batch_tile), 8)

    S_pad = _round_up(S, ts)
    B_pad = _round_up(B, bt)
    n_b = B_pad // bt
    n_s = S_pad // ts

    target_p = jnp.pad(target, ((0, B_pad - B), (0, Dout_pad - Dout)))
    context_p = jnp.pad(context,
                        ((0, B_pad - B), (0, S_pad - S), (0, Dout_pad - Dout)))
    bias_p = jnp.pad(bias, ((0, 0), (0, S_pad - S)), constant_values=-jnp.inf)
    bias_p = jnp.pad(bias_p, ((0, B_pad - B), (0, 0)), constant_values=0.0)

    grid_spec = pltpu.PrefetchScalarGridSpec(
        num_scalar_prefetch=0,
        grid=(n_b, n_s),
        in_specs=[
            pl.BlockSpec((bt, Dout_pad), lambda i, j: (i, 0)),       # target (f32)
            pl.BlockSpec((bt, ts, Dout_pad), lambda i, j: (i, j, 0)),  # context
            pl.BlockSpec((bt, ts), lambda i, j: (i, j)),             # bias (f32)
        ],
        out_specs=[
            pl.BlockSpec((bt, Dout_pad), lambda i, j: (i, 0)),       # wctx (resident)
            pl.BlockSpec((bt, S_pad), lambda i, j: (i, 0)),          # attn (resident)
        ],
        scratch_shapes=[
            pltpu.VMEM((bt, S_pad), jnp.float32),    # raw masked scores
            pltpu.VMEM((bt, 1), jnp.float32),        # running max
            pltpu.VMEM((bt, Dout_pad), jnp.float32),  # weighted-context accumulator
        ],
    )

    cost = pl.CostEstimate(
        flops=4 * B_pad * S_pad * Dout_pad,          # score + weighted-ctx contractions
        transcendentals=2 * B_pad * S_pad,           # online exp + finalize exp
        bytes_accessed=(B_pad * S_pad * Dout_pad * ctx_item
                        + B_pad * Dout_pad * (4 + out_item)
                        + B_pad * S_pad * (4 + out_item)),
    )

    wctx, attn = pl.pallas_call(
        _softdot_kernel,
        out_shape=(jax.ShapeDtypeStruct((B_pad, Dout_pad), out_dtype),
                   jax.ShapeDtypeStruct((B_pad, S_pad), out_dtype)),
        grid_spec=grid_spec,
        compiler_params=pltpu.CompilerParams(
            dimension_semantics=("parallel", "arbitrary"),
            vmem_limit_bytes=vmem_limit),
        cost_estimate=cost,
    )(target_p, context_p, bias_p)

    return wctx[:B, :Dout], attn[:B, :S]


def _reference(h, w, context, mask=None):
    target = h @ w.T                                       # (B, Dout)
    scores = jnp.einsum('bsd,bd->bs', context, target)     # (B, S)
    if mask is not None:
        scores = jnp.where(mask == 0, -jnp.inf, scores)
    attn = jax.nn.softmax(scores, axis=1)
    wctx = jnp.einsum('bs,bsd->bd', attn, context)
    return wctx, attn


if __name__ == "__main__":
    key = jax.random.PRNGKey(0)

    # --- small demo shapes (consistent with the module) ---------------------
    B, S, Din, Dout = 2, 8, 32, 32
    k1, k2, k3 = jax.random.split(key, 3)
    h = jax.random.normal(k1, (B, Din), dtype=jnp.float32)
    context = jax.random.normal(k2, (B, S, Dout), dtype=jnp.float32)
    bound = 1.0 / (Din ** 0.5)                      # nn.Linear default init range
    w = jax.random.uniform(k3, (Dout, Din), dtype=jnp.float32,
                           minval=-bound, maxval=bound)
    mask = jnp.ones((B, S), dtype=jnp.int32).at[1, -2:].set(0)

    wctx, attn = soft_dot_attention(h, w, context, mask)
    jax.block_until_ready((wctx, attn))

    ref_wctx, ref_attn = _reference(h, w, context, mask)
    assert jnp.allclose(wctx, ref_wctx, atol=2e-3, rtol=2e-3)
    assert jnp.allclose(attn, ref_attn, atol=2e-3, rtol=2e-3)
    assert bool(jnp.all(attn[1, -2:] == 0.0))       # masked positions exactly zero

    # mask=None path
    wctx_nm, attn_nm = soft_dot_attention(h, w, context, None)
    ref_wctx_nm, ref_attn_nm = _reference(h, w, context, None)
    jax.block_until_ready((wctx_nm, attn_nm))
    assert jnp.allclose(wctx_nm, ref_wctx_nm, atol=2e-3, rtol=2e-3)
    assert jnp.allclose(attn_nm, ref_attn_nm, atol=2e-3, rtol=2e-3)

    # bf16 path: context feeds the kernel natively; softmax math stays f32.
    wctx_bf, attn_bf = soft_dot_attention(
        h.astype(jnp.bfloat16), w.astype(jnp.bfloat16),
        context.astype(jnp.bfloat16), mask)
    jax.block_until_ready((wctx_bf, attn_bf))
    assert jnp.allclose(wctx_bf.astype(jnp.float32), ref_wctx, atol=5e-2, rtol=5e-2)
    assert jnp.allclose(attn_bf.astype(jnp.float32), ref_attn, atol=5e-2, rtol=5e-2)

    # --- multi-tile path: 2 batch tiles x 2 seq tiles (online softmax) ------
    B2, S2, Din2, Dout2 = 16, 256, 64, 128
    k4, k5, k6 = jax.random.split(jax.random.PRNGKey(1), 3)
    h2 = jax.random.normal(k4, (B2, Din2), dtype=jnp.float32)
    ctx2 = jax.random.normal(k5, (B2, S2, Dout2), dtype=jnp.float32)
    w2 = jax.random.uniform(k6, (Dout2, Din2), dtype=jnp.float32,
                            minval=-1.0 / (Din2 ** 0.5), maxval=1.0 / (Din2 ** 0.5))
    mask2 = jnp.ones((B2, S2), dtype=jnp.int32).at[:B2 // 2, -50:].set(0)

    wctx2, attn2 = soft_dot_attention(h2, w2, ctx2, mask2,
                                      batch_tile=8, seq_tile=128)
    jax.block_until_ready((wctx2, attn2))
    ref_wctx2, ref_attn2 = _reference(h2, w2, ctx2, mask2)
    assert jnp.allclose(wctx2, ref_wctx2, atol=2e-3, rtol=2e-3)
    assert jnp.allclose(attn2, ref_attn2, atol=2e-3, rtol=2e-3)
    assert bool(jnp.all(attn2[:B2 // 2, -50:] == 0.0))

    print("KERNEL_OK")
</pallas_src>

<mosaic_0001>
module attributes {stable_mosaic.version = 11 : i64} {
  func.func @_softdot_kernel(%arg0: i32, %arg1: i32, %arg2: memref<8x128xf32, #tpu.memory_space<vmem>>, %arg3: memref<8x128x128xf32, #tpu.memory_space<vmem>>, %arg4: memref<8x128xf32, #tpu.memory_space<vmem>>, %arg5: memref<8x128xf32, #tpu.memory_space<vmem>>, %arg6: memref<8x128xf32, #tpu.memory_space<vmem>>, %arg7: memref<8x128xf32, #tpu.memory_space<vmem>>, %arg8: memref<8x1xf32, #tpu.memory_space<vmem>>, %arg9: memref<8x128xf32, #tpu.memory_space<vmem>>) attributes {dimension_semantics = [#tpu.dimension_semantics<parallel>, #tpu.dimension_semantics<arbitrary>], iteration_bounds = array<i64: 1, 1>, scalar_prefetch = 0 : i64, scratch_operands = 3 : i64, tpu.core_type = #tpu.core_type<tc>, window_params = [{transform_indices = @transform_0, window_bounds = array<i64: 8, 128>}, {transform_indices = @transform_1, window_bounds = array<i64: 8, 128, 128>}, {transform_indices = @transform_2, window_bounds = array<i64: 8, 128>}, {transform_indices = @transform_3, window_bounds = array<i64: 8, 128>}, {transform_indices = @transform_4, window_bounds = array<i64: 8, 128>}]} {
    %c0_i32 = arith.constant 0 : i32
    %0 = arith.cmpi eq, %arg1, %c0_i32 : i32
    %1 = arith.extui %0 : i1 to i32
    %c0_i32_0 = arith.constant 0 : i32
    %2 = arith.cmpi ne, %1, %c0_i32_0 : i32
    scf.if %2 {
      %cst_20 = arith.constant -1.000000e+30 : f32
      %37 = vector.broadcast %cst_20 : f32 to vector<8x1xf32>
      %c0_21 = arith.constant 0 : index
      %c0_22 = arith.constant 0 : index
      %38 = vector.load %arg8[%c0_21, %c0_22] : memref<8x1xf32, #tpu.memory_space<vmem>>, vector<8x1xf32>
      tpu.vector_store %arg8[%c0_21, %c0_22], %37 {strides = array<i32>} : memref<8x1xf32, #tpu.memory_space<vmem>>, vector<8x1xf32>,
      %cst_23 = arith.constant 0.000000e+00 : f32
      %39 = vector.broadcast %cst_23 : f32 to vector<8x128xf32>
      %c0_24 = arith.constant 0 : index
      %c0_25 = arith.constant 0 : index
      %40 = vector.load %arg9[%c0_24, %c0_25] : memref<8x128xf32, #tpu.memory_space<vmem>>, vector<8x128xf32>
      tpu.vector_store %arg9[%c0_24, %c0_25], %39 {strides = array<i32>} : memref<8x128xf32, #tpu.memory_space<vmem>>, vector<8x128xf32>,
    } else {
    }
    %c0 = arith.constant 0 : index
    %c0_1 = arith.constant 0 : index
    %3 = vector.load %arg2[%c0, %c0_1] : memref<8x128xf32, #tpu.memory_space<vmem>>, vector<8x128xf32>
    %c0_2 = arith.constant 0 : index
    %c0_3 = arith.constant 0 : index
    %c0_4 = arith.constant 0 : index
    %4 = vector.load %arg3[%c0_2, %c0_3, %c0_4] : memref<8x128x128xf32, #tpu.memory_space<vmem>>, vector<8x128x128xf32>
    %c0_5 = arith.constant 0 : index
    %c0_6 = arith.constant 0 : index
    %5 = vector.load %arg4[%c0_5, %c0_6] : memref<8x128xf32, #tpu.memory_space<vmem>>, vector<8x128xf32>
    %6 = vector.shape_cast %3 : vector<8x128xf32> to vector<8x1x128xf32>
    %7 = vector.broadcast %6 : vector<8x1x128xf32> to vector<8x128x128xf32>
    %8 = arith.mulf %4, %7 : vector<8x128x128xf32>
    %cst = arith.constant dense<0.000000e+00> : vector<8x128xf32>
    %9 = vector.multi_reduction <add>, %8, %cst [2] : vector<8x128x128xf32> to vector<8x128xf32>
    %10 = arith.addf %9, %5 : vector<8x128xf32>
    %c128_i32 = arith.constant 128 : i32
    %11 = arith.muli %arg1, %c128_i32 : i32
    %12 = tpu.assume_multiple %11, 128 : i32
    %c0_7 = arith.constant 0 : index
    %13 = arith.index_cast %12 : i32 to index
    %14 = vector.load %arg7[%c0_7, %13] : memref<8x128xf32, #tpu.memory_space<vmem>>, vector<8x128xf32>
    tpu.vector_store %arg7[%c0_7, %13], %10 {strides = array<i32>} : memref<8x128xf32, #tpu.memory_space<vmem>>, vector<8x128xf32>,
    %c0_8 = arith.constant 0 : index
    %c0_9 = arith.constant 0 : index
    %15 = vector.load %arg8[%c0_8, %c0_9] : memref<8x1xf32, #tpu.memory_space<vmem>>, vector<8x1xf32>
    %cst_10 = arith.constant dense<0xFF800000> : vector<8xf32>
    %16 = vector.multi_reduction <maximumf>, %10, %cst_10 [1] : vector<8x128xf32> to vector<8xf32>
    %17 = vector.shape_cast %16 : vector<8xf32> to vector<8x1xf32>
    %18 = arith.maximumf %15, %17 : vector<8x1xf32>
    %19 = vector.broadcast %18 : vector<8x1xf32> to vector<8x128xf32>
    %20 = arith.subf %10, %19 : vector<8x128xf32>
    %21 = math.exp %20 : vector<8x128xf32>
    %22 = arith.subf %15, %18 : vector<8x1xf32>
    %23 = math.exp %22 : vector<8x1xf32>
    %c0_11 = arith.constant 0 : index
    %c0_12 = arith.constant 0 : index
    %24 = vector.load %arg9[%c0_11, %c0_12] : memref<8x128xf32, #tpu.memory_space<vmem>>, vector<8x128xf32>
    %25 = vector.broadcast %23 : vector<8x1xf32> to vector<8x128xf32>
    %26 = arith.mulf %24, %25 : vector<8x128xf32>
    %27 = vector.shape_cast %21 : vector<8x128xf32> to vector<8x128x1xf32>
    %28 = vector.broadcast %27 : vector<8x128x1xf32> to vector<8x128x128xf32>
    %29 = arith.mulf %28, %4 : vector<8x128x128xf32>
    %cst_13 = arith.constant dense<0.000000e+00> : vector<8x128xf32>
    %30 = vector.multi_reduction <add>, %29, %cst_13 [1] : vector<8x128x128xf32> to vector<8x128xf32>
    %31 = arith.addf %26, %30 : vector<8x128xf32>
    %c0_14 = arith.constant 0 : index
    %c0_15 = arith.constant 0 : index
    %32 = vector.load %arg9[%c0_14, %c0_15] : memref<8x128xf32, #tpu.memory_space<vmem>>, vector<8x128xf32>
    tpu.vector_store %arg9[%c0_14, %c0_15], %31 {strides = array<i32>} : memref<8x128xf32, #tpu.memory_space<vmem>>, vector<8x128xf32>,
    %c0_16 = arith.constant 0 : index
    %c0_17 = arith.constant 0 : index
    %33 = vector.load %arg8[%c0_16, %c0_17] : memref<8x1xf32, #tpu.memory_space<vmem>>, vector<8x1xf32>
    tpu.vector_store %arg8[%c0_16, %c0_17], %18 {strides = array<i32>} : memref<8x1xf32, #tpu.memory_space<vmem>>, vector<8x1xf32>,
    %c0_i32_18 = arith.constant 0 : i32
    %34 = arith.cmpi eq, %arg1, %c0_i32_18 : i32
    %35 = arith.extui %34 : i1 to i32
    %c0_i32_19 = arith.constant 0 : i32
    %36 = arith.cmpi ne, %35, %c0_i32_19 : i32
    scf.if %36 {
      %c0_20 = arith.constant 0 : index
      %c0_21 = arith.constant 0 : index
      %37 = vector.load %arg7[%c0_20, %c0_21] : memref<8x128xf32, #tpu.memory_space<vmem>>, vector<8x128xf32>
      %c0_22 = arith.constant 0 : index
      %c0_23 = arith.constant 0 : index
      %38 = vector.load %arg8[%c0_22, %c0_23] : memref<8x1xf32, #tpu.memory_space<vmem>>, vector<8x1xf32>
      %39 = vector.broadcast %38 : vector<8x1xf32> to vector<8x128xf32>
      %40 = arith.subf %37, %39 : vector<8x128xf32>
      %41 = math.exp %40 : vector<8x128xf32>
      %cst_24 = arith.constant dense<0.000000e+00> : vector<8xf32>
      %42 = vector.multi_reduction <add>, %41, %cst_24 [1] : vector<8x128xf32> to vector<8xf32>
      %43 = vector.shape_cast %42 : vector<8xf32> to vector<8x1xf32>
      %cst_25 = arith.constant 1.000000e+00 : f32
      %44 = vector.broadcast %cst_25 : f32 to vector<8x1xf32>
      %45 = arith.divf %44, %43 : vector<8x1xf32>
      %46 = vector.broadcast %45 : vector<8x1xf32> to vector<8x128xf32>
      %47 = arith.mulf %41, %46 : vector<8x128xf32>
      %c0_26 = arith.constant 0 : index
      %c0_27 = arith.constant 0 : index
      %48 = vector.load %arg6[%c0_26, %c0_27] : memref<8x128xf32, #tpu.memory_space<vmem>>, vector<8x128xf32>
      tpu.vector_store %arg6[%c0_26, %c0_27], %47 {strides = array<i32>} : memref<8x128xf32, #tpu.memory_space<vmem>>, vector<8x128xf32>,
      %c0_28 = arith.constant 0 : index
      %c0_29 = arith.constant 0 : index
      %49 = vector.load %arg9[%c0_28, %c0_29] : memref<8x128xf32, #tpu.memory_space<vmem>>, vector<8x128xf32>
      %50 = vector.broadcast %45 : vector<8x1xf32> to vector<8x128xf32>
      %51 = arith.mulf %49, %50 : vector<8x128xf32>
      %c0_30 = arith.constant 0 : index
      %c0_31 = arith.constant 0 : index
      %52 = vector.load %arg5[%c0_30, %c0_31] : memref<8x128xf32, #tpu.memory_space<vmem>>, vector<8x128xf32>
      tpu.vector_store %arg5[%c0_30, %c0_31], %51 {strides = array<i32>} : memref<8x128xf32, #tpu.memory_space<vmem>>, vector<8x128xf32>,
    } else {
    }
    return
  }
  func.func @transform_0(%arg0: i32, %arg1: i32) -> (i32, i32) {
    %c0_i32 = arith.constant 0 : i32
    %c0_i32_0 = arith.constant 0 : i32
    return %arg0, %c0_i32 : i32, i32
  }
  func.func @transform_1(%arg0: i32, %arg1: i32) -> (i32, i32, i32) {
    %c0_i32 = arith.constant 0 : i32
    %c0_i32_0 = arith.constant 0 : i32
    return %arg0, %arg1, %c0_i32 : i32, i32, i32
  }
  func.func @transform_2(%arg0: i32, %arg1: i32) -> (i32, i32) {
    %c0_i32 = arith.constant 0 : i32
    return %arg0, %arg1 : i32, i32
  }
  func.func @transform_3(%arg0: i32, %arg1: i32) -> (i32, i32) {
    %c0_i32 = arith.constant 0 : i32
    %c0_i32_0 = arith.constant 0 : i32
    return %arg0, %c0_i32 : i32, i32
  }
  func.func @transform_4(%arg0: i32, %arg1: i32) -> (i32, i32) {
    %c0_i32 = arith.constant 0 : i32
    %c0_i32_0 = arith.constant 0 : i32
    return %arg0, %c0_i32 : i32, i32
  }
}

</mosaic_0001>

<bundles_post_ra>
// kernel: tpu_custom_call.1
= control target key start
LH: loop header
LB: loop body
LE: loop exit
PB: predicated region body
PF: predicated region fallthrough
CT: control target
= control target key end

     0   :  { %10 = vsyncpa [#allocation6], 0  ;;  %s7236_s0 = inlined_call_operand.hbm [shape: f32[8,128], index: 0, kind: input, shape index: {}]   ;;  %s7237_s1 = inlined_call_operand.hbm [shape: f32[8,128,128], index: 1, kind: input, shape index: {}]   ;;  %s7238_s2 = inlined_call_operand.hbm [shape: f32[8,128], index: 2, kind: input, shape index: {}]   ;;  %s7239_s3 = inlined_call_operand.hbm [shape: f32[8,128], index: 3, kind: output, shape index: {0}]   ;;  %s7240_s4 = inlined_call_operand.hbm [shape: f32[8,128], index: 4, kind: output, shape index: {1}]  }
   0x1   :  { %11 = vsyncpa [#allocation9], 0 }
   0x2   :  { %12 = vsyncpa [#allocation7], 0  ;;  %s29_s17 = sshll.u32 %s7237_s1, 4  ;;  %s30_s17 = int_to_ptr.hbm [resolvable:$true] %s29_s17 }
   0x3   :  { %13 = vsyncpa [#allocation13], 0  ;;  %s4544_s18 = smov [#allocation8]   ;;  %s19_s22 = sshll.u32 %s7236_s0, 4  ;;  %s20_s22 = int_to_ptr.hbm [resolvable:$true] %s19_s22 }
   0x4   :  { %s31_s19 = sshll.u32 %s4544_s18, 4  ;;  %s4545_s23 = smov 128   ;;  %s32_s19 = int_to_ptr.vmem [resolvable:$true] %s31_s19 }
   0x5   :  { %s4546_s24 = smov 8   ;;  %s4547_s25 = smov [#allocation5]  }
   0x6   :  { %37 = dma.hbm_to_vmem [thread:$0]  %s30_s17, 16384, %s32_s19, [#allocation9], %s4545_s23, %s4545_s23, %s4546_s24  }
   0x7   :  { %s21_s26 = sshll.u32 %s4547_s25, 4  ;;  %s43_s29 = sshll.u32 %s7238_s2, 4  ;;  %s22_s26 = int_to_ptr.vmem [resolvable:$true] %s21_s26  ;;  %s44_s29 = int_to_ptr.hbm [resolvable:$true] %s43_s29 }
   0x8   :  { %24 = dma.hbm_to_vmem [thread:$0]  %s20_s22, 128, %s22_s26, [#allocation6]  }
   0x9   :  { %s4548_s1 = smov [#allocation10]  }
   0xa   :  { %s45_s30 = sshll.u32 %s4548_s1, 4  ;;  %s46_s30 = int_to_ptr.vmem [resolvable:$true] %s45_s30 }
   0xb   :  { %48 = dma.hbm_to_vmem [thread:$0]  %s44_s29, 128, %s46_s30, [#allocation9]  }
   0xc   :  { %4536 = dma.done.wait [#allocation6], 128  }
   0xd   :  { %4537 = vsyncadd [#allocation6], 4294967168 }
   0xe   :  { %4538 = dma.done.wait [#allocation9], 16512  }
   0xf   :  { %4539 = vsyncadd [#allocation9], 4294950784  ;;  %v4587_v0 = vld [vmem:[#allocation5] sm:$0xff]  ;;  %v73_v1 = vld [vmem:[#allocation8 + $0x20] sm:$0xff]  ;;  %vm2157_vm0 = vcmask 130112   ;;  %vm2161_vm1 = vcmask 195712  }
  0x10   :  { %v71_v2 = vld [vmem:[#allocation8 + $0x10] sm:$0xff]  ;;  %v206_v3 = vperm.slane %v4587_v0, 0  ;;  %v69_v4 = vld [vmem:[#allocation8] sm:$0xff]  ;;  %v74_v8 = vld [vmem:[#allocation8 + $0x28] sm:$0xff]  ;;  %v199_v31 = vrot.slane %v4587_v0, 1  ;;  %v200_v63 = vrot.slane %v4587_v0, 2 }
  0x11   :  { %v72_v9 = vld [vmem:[#allocation8 + $0x18] sm:$0xff]  ;;  %v70_v10 = vld [vmem:[#allocation8 + $0x8] sm:$0xff]  ;;  %v77_v14 = vld [vmem:[#allocation8 + $0x40] sm:$0xff]  ;;  %vm2165_vm2 = vcmask 261312   ;;  %vm2169_vm3 = vcmask 326912   ;;  %vm2173_vm4 = vcmask 392512  }
  0x12   :  { %v226_v5 = vmul.f32 %v206_v3, %v73_v1  ;;  %v224_v6 = vmul.f32 %v206_v3, %v71_v2  ;;  %v222_v7 = vmul.f32 %v206_v3, %v69_v4  ;;  %v227_v11 = vmul.f32 %v206_v3, %v74_v8  ;;  %v76_v15 = vld [vmem:[#allocation8 + $0x38] sm:$0xff]  ;;  %v75_v16 = vld [vmem:[#allocation8 + $0x30] sm:$0xff]  ;;  %v78_v22 = vld [vmem:[#allocation8 + $0x48] sm:$0xff]  ;;  %s4551_s0 = smov [#allocation11]   ;;  %s3867_s7 = sshll.u32 %s7239_s3, 4  ;;  %s3868_s7 = int_to_ptr.hbm [resolvable:$true] %s3867_s7 }
  0x13   :  { %v225_v12 = vmul.f32 %v206_v3, %v72_v9  ;;  %v223_v13 = vmul.f32 %v206_v3, %v70_v10  ;;  %v230_v17 = vmul.f32 %v206_v3, %v77_v14  ;;  %v229_v18 = vmul.f32 %v206_v3, %v76_v15  ;;  %v80_v20 = vld [vmem:[#allocation8 + $0x58] sm:$0xff]  ;;  %v79_v21 = vld [vmem:[#allocation8 + $0x50] sm:$0xff]  ;;  %v82_v27 = vld [vmem:[#allocation8 + $0x68] sm:$0xff]  ;;  %s3865_s2 = sshll.u32 %s4551_s0, 4  ;;  %s4552_s8 = smov [#allocation12]   ;;  %s3866_s2 = int_to_ptr.vmem [resolvable:$true] %s3865_s2 }
  0x14   :  { %358 = vadd.xlane.f32.xlu2 %v226_v5  ;;  %354 = vadd.xlane.f32.xlu1 %v224_v6  ;;  %v228_v19 = vmul.f32 %v206_v3, %v75_v16  ;;  %v233_v23 = vmul.f32 %v206_v3, %v80_v20  ;;  %v232_v24 = vmul.f32 %v206_v3, %v79_v21  ;;  %v83_v26 = vld [vmem:[#allocation8 + $0x70] sm:$0xff]  ;;  %v81_v28 = vld [vmem:[#allocation8 + $0x60] sm:$0xff]  ;;  %v207_v33 = vperm.slane %v199_v31, 0  ;;  %v86_v34 = vld [vmem:[#allocation8 + $0x88] sm:$0xff]  ;;  %s3876_s9 = sshll.u32 %s4552_s8, 4  ;;  %s3878_s12 = sshll.u32 %s7240_s4, 4  ;;  %s3877_s9 = int_to_ptr.vmem [resolvable:$true] %s3876_s9  ;;  %s3879_s12 = int_to_ptr.hbm [resolvable:$true] %s3878_s12 }
  0x15   :  { %350 = vadd.xlane.f32.xlu0 %v222_v7  ;;  %v231_v25 = vmul.f32 %v206_v3, %v78_v22  ;;  %v236_v29 = vmul.f32 %v206_v3, %v83_v26  ;;  %v235_v30 = vmul.f32 %v206_v3, %v82_v27  ;;  %v234_v32 = vmul.f32 %v206_v3, %v81_v28  ;;  %v85_v35 = vld [vmem:[#allocation8 + $0x80] sm:$0xff]  ;;  %v84_v36 = vld [vmem:[#allocation8 + $0x78] sm:$0xff]  ;;  %v87_v42 = vld [vmem:[#allocation8 + $0x90] sm:$0xff] }
  0x16   :  { %v239_v37 = vmul.f32 %v207_v33, %v86_v34  ;;  %v238_v38 = vmul.f32 %v207_v33, %v85_v35  ;;  %v237_v39 = vmul.f32 %v206_v3, %v84_v36  ;;  %v89_v40 = vld [vmem:[#allocation8 + $0xa0] sm:$0xff]  ;;  %v88_v41 = vld [vmem:[#allocation8 + $0x98] sm:$0xff]  ;;  %v240_v45 = vmul.f32 %v207_v33, %v87_v42  ;;  %v91_v47 = vld [vmem:[#allocation8 + $0xb0] sm:$0xff] }
  0x17   :  { %v242_v43 = vmul.f32 %v207_v33, %v89_v40  ;;  %v241_v44 = vmul.f32 %v207_v33, %v88_v41  ;;  %v92_v46 = vld [vmem:[#allocation8 + $0xb8] sm:$0xff]  ;;  %v90_v48 = vld [vmem:[#allocation8 + $0xa8] sm:$0xff]  ;;  %v244_v50 = vmul.f32 %v207_v33, %v91_v47  ;;  %v95_v52 = vld [vmem:[#allocation8 + $0xd0] sm:$0xff]  ;;  %v208_v2 = vperm.slane %v200_v63, 0 }
  0x18   :  { %v245_v49 = vmul.f32 %v207_v33, %v92_v46  ;;  %v243_v51 = vmul.f32 %v207_v33, %v90_v48  ;;  %v94_v53 = vld [vmem:[#allocation8 + $0xc8] sm:$0xff]  ;;  %v93_v54 = vld [vmem:[#allocation8 + $0xc0] sm:$0xff]  ;;  %v248_v55 = vmul.f32 %v207_v33, %v95_v52  ;;  %v96_v60 = vld [vmem:[#allocation8 + $0xd8] sm:$0xff]  ;;  %vm2177_vm5 = vcmask 458112  }
  0x19   :  { %v247_v56 = vmul.f32 %v207_v33, %v94_v53  ;;  %v246_v57 = vmul.f32 %v207_v33, %v93_v54  ;;  %v98_v58 = vld [vmem:[#allocation8 + $0xe8] sm:$0xff]  ;;  %v97_v59 = vld [vmem:[#allocation8 + $0xe0] sm:$0xff]  ;;  %v249_v1 = vmul.f32 %v207_v33, %v96_v60  ;;  %v100_v4 = vld [vmem:[#allocation8 + $0xf8] sm:$0xff]  ;;  %vm2181_vm6 = vcmask 523712  }
  0x1a   :  { %v251_v61 = vmul.f32 %v207_v33, %v98_v58  ;;  %v250_v62 = vmul.f32 %v207_v33, %v97_v59  ;;  %v101_v3 = vld [vmem:[#allocation8 + $0x100] sm:$0xff]  ;;  %v99_v5 = vld [vmem:[#allocation8 + $0xf0] sm:$0xff]  ;;  %v253_v7 = vmul.f32 %v207_v33, %v100_v4  ;;  %v104_v9 = vld [vmem:[#allocation8 + $0x118] sm:$0xff]  ;;  %vm2185_vm7 = vcmask 589312  }
  0x1b   :  { %v254_v6 = vmul.f32 %v208_v2, %v101_v3  ;;  %v252_v8 = vmul.f32 %v207_v33, %v99_v5  ;;  %v103_v10 = vld [vmem:[#allocation8 + $0x110] sm:$0xff]  ;;  %v106_v16 = vld [vmem:[#allocation8 + $0x128] sm:$0xff]  ;;  %v109_v22 = vld [vmem:[#allocation8 + $0x140] sm:$0xff]  ;;  %vm2189_vm8 = vcmask 654912   ;;  %vm2193_vm9 = vcmask 720512  }
  0x1c   :  { %360 = vadd.xlane.f32.xlu2 %v227_v11  ;;  %356 = vadd.xlane.f32.xlu1 %v225_v12  ;;  %v102_v11 = vld [vmem:[#allocation8 + $0x108] sm:$0xff]  ;;  %v257_v12 = vmul.f32 %v208_v2, %v104_v9  ;;  %v107_v15 = vld [vmem:[#allocation8 + $0x130] sm:$0xff]  ;;  %v113_v27 = vld [vmem:[#allocation8 + $0x160] sm:$0xff]  ;;  %vm2197_vm10 = vcmask 786112   ;;  %vm2201_vm11 = vcmask 851712   ;;  %vm2205_vm12 = vcmask 917312  }
  0x1d   :  { %352 = vadd.xlane.f32.xlu0 %v223_v13  ;;  %v256_v13 = vmul.f32 %v208_v2, %v103_v10  ;;  %v255_v14 = vmul.f32 %v208_v2, %v102_v11  ;;  %v110_v21 = vld [vmem:[#allocation8 + $0x148] sm:$0xff]  ;;  %v112_v28 = vld [vmem:[#allocation8 + $0x158] sm:$0xff]  ;;  %v115_v34 = vld [vmem:[#allocation8 + $0x170] sm:$0xff]  ;;  %vm2209_vm13 = vcmask 982912   ;;  %vm2213_vm14 = vcmask 1048512  }
  0x1e   :  { %v265_v31 = vmul.f32 %v208_v2, %v112_v28  ;;  %v116_v33 = vld [vmem:[#allocation8 + $0x178] sm:$0xff]  ;;  %v114_v35 = vld [vmem:[#allocation8 + $0x168] sm:$0xff]  ;;  %v119_v41 = vld [vmem:[#allocation8 + $0x190] sm:$0xff]  ;;  %vm65_vm15 = vcmask 7168  }
  0x1f   :  { %v269_v36 = vmul.f32 %v208_v2, %v116_v33  ;;  %v118_v42 = vld [vmem:[#allocation8 + $0x188] sm:$0xff]  ;;  %v121_v48 = vld [vmem:[#allocation8 + $0x1a0] sm:$0xff]  ;;  %v124_v54 = vld [vmem:[#allocation8 + $0x1b8] sm:$0xff] }
  0x20   :  { %v122_v47 = vld [vmem:[#allocation8 + $0x1a8] sm:$0xff]  ;;  %v125_v53 = vld [vmem:[#allocation8 + $0x1c0] sm:$0xff]  ;;  %v128_v59 = vld [vmem:[#allocation8 + $0x1d8] sm:$0xff] }
  0x21   :  { %v127_v60 = vld [vmem:[#allocation8 + $0x1d0] sm:$0xff]  ;;  %v130_v4 = vld [vmem:[#allocation8 + $0x1e8] sm:$0xff]  ;;  %v129_v5 = vld [vmem:[#allocation8 + $0x1e0] sm:$0xff] }
  0x22   :  { %v131_v3 = vld [vmem:[#allocation8 + $0x1f0] sm:$0xff]  ;;  %v142_v33 = vld [vmem:[#allocation8 + $0x248] sm:$0xff] }
  0x24   :  { %366 = vadd.xlane.f32.xlu2 %v230_v17  ;;  %364 = vadd.xlane.f32.xlu1 %v229_v18  ;;  %v105_v17 = vld [vmem:[#allocation8 + $0x120] sm:$0xff]  ;;  %v260_v18 = vmul.f32 %v208_v2, %v107_v15 }
  0x25   :  { %362 = vadd.xlane.f32.xlu0 %v228_v19  ;;  %v259_v19 = vmul.f32 %v208_v2, %v106_v16  ;;  %v258_v20 = vmul.f32 %v208_v2, %v105_v17 }
  0x2c   :  { %372 = vadd.xlane.f32.xlu2 %v233_v23  ;;  %370 = vadd.xlane.f32.xlu1 %v232_v24  ;;  %v108_v23 = vld [vmem:[#allocation8 + $0x138] sm:$0xff]  ;;  %v263_v24 = vmul.f32 %v208_v2, %v110_v21 }
  0x2d   :  { %368 = vadd.xlane.f32.xlu0 %v231_v25  ;;  %v262_v25 = vmul.f32 %v208_v2, %v109_v22  ;;  %v261_v26 = vmul.f32 %v208_v2, %v108_v23 }
  0x34   :  { %378 = vadd.xlane.f32.xlu2 %v236_v29  ;;  %376 = vadd.xlane.f32.xlu1 %v235_v30  ;;  %v111_v29 = vld [vmem:[#allocation8 + $0x150] sm:$0xff]  ;;  %v266_v30 = vmul.f32 %v208_v2, %v113_v27  ;;  %v138_v27 = vld [vmem:[#allocation8 + $0x228] sm:$0xff] }
  0x35   :  { %374 = vadd.xlane.f32.xlu0 %v234_v32  ;;  %v264_v32 = vmul.f32 %v208_v2, %v111_v29 }
  0x3c   :  { %384 = vadd.xlane.f32.xlu2 %v239_v37  ;;  %382 = vadd.xlane.f32.xlu1 %v238_v38  ;;  %v268_v37 = vmul.f32 %v208_v2, %v115_v34  ;;  %v201_v38 = vrot.slane %v4587_v0, 3  ;;  %v141_v34 = vld [vmem:[#allocation8 + $0x240] sm:$0xff] }
  0x3d   :  { %380 = vadd.xlane.f32.xlu0 %v237_v39  ;;  %v267_v39 = vmul.f32 %v208_v2, %v114_v35 }
  0x3e   :  { %v209_v40 = vperm.slane %v201_v38, 0 }
  0x40   :  { %v280_v63 = vmul.f32 %v209_v40, %v127_v60  ;;  %v282_v9 = vmul.f32 %v209_v40, %v129_v5 }
  0x44   :  { %390 = vadd.xlane.f32.xlu2 %v242_v43  ;;  %388 = vadd.xlane.f32.xlu1 %v241_v44  ;;  %v117_v43 = vld [vmem:[#allocation8 + $0x180] sm:$0xff]  ;;  %v272_v44 = vmul.f32 %v209_v40, %v119_v41  ;;  %v144_v41 = vld [vmem:[#allocation8 + $0x258] sm:$0xff] }
  0x45   :  { %386 = vadd.xlane.f32.xlu0 %v240_v45  ;;  %v271_v45 = vmul.f32 %v209_v40, %v118_v42  ;;  %v270_v46 = vmul.f32 %v209_v40, %v117_v43 }
  0x4c   :  { %396 = vadd.xlane.f32.xlu2 %v245_v49  ;;  %394 = vadd.xlane.f32.xlu1 %v244_v50  ;;  %v120_v49 = vld [vmem:[#allocation8 + $0x198] sm:$0xff]  ;;  %v275_v50 = vmul.f32 %v209_v40, %v122_v47 }
  0x4d   :  { %392 = vadd.xlane.f32.xlu0 %v243_v51  ;;  %v274_v51 = vmul.f32 %v209_v40, %v121_v48  ;;  %v273_v52 = vmul.f32 %v209_v40, %v120_v49  ;;  %v149_v48 = vld [vmem:[#allocation8 + $0x280] sm:$0xff]  ;;  %v148_v49 = vld [vmem:[#allocation8 + $0x278] sm:$0xff] }
  0x54   :  { %402 = vadd.xlane.f32.xlu2 %v248_v55  ;;  %400 = vadd.xlane.f32.xlu1 %v247_v56  ;;  %v123_v55 = vld [vmem:[#allocation8 + $0x1b0] sm:$0xff]  ;;  %v278_v56 = vmul.f32 %v209_v40, %v125_v53 }
  0x55   :  { %398 = vadd.xlane.f32.xlu0 %v246_v57  ;;  %v277_v57 = vmul.f32 %v209_v40, %v124_v54  ;;  %v276_v58 = vmul.f32 %v209_v40, %v123_v55  ;;  %v152_v55 = vld [vmem:[#allocation8 + $0x298] sm:$0xff] }
  0x5c   :  { %408 = vadd.xlane.f32.xlu2 %v251_v61  ;;  %406 = vadd.xlane.f32.xlu1 %v250_v62  ;;  %v126_v61 = vld [vmem:[#allocation8 + $0x1c8] sm:$0xff]  ;;  %v281_v62 = vmul.f32 %v209_v40, %v128_v59 }
  0x5d   :  { %404 = vadd.xlane.f32.xlu0 %v249_v1  ;;  %v279_v1 = vmul.f32 %v209_v40, %v126_v61 }
  0x64   :  { %414 = vadd.xlane.f32.xlu2 %v254_v6  ;;  %412 = vadd.xlane.f32.xlu1 %v253_v7  ;;  %v284_v6 = vmul.f32 %v209_v40, %v131_v3  ;;  %v283_v7 = vmul.f32 %v209_v40, %v130_v4  ;;  %v153_v3 = vld [vmem:[#allocation8 + $0x2a0] sm:$0xff] }
  0x65   :  { %410 = vadd.xlane.f32.xlu0 %v252_v8  ;;  %v202_v8 = vrot.slane %v4587_v0, 4 }
  0x67   :  { %v210_v10 = vperm.slane %v202_v8, 0 }
  0x69   :  { %v301_v53 = vmul.f32 %v210_v10, %v148_v49 }
  0x6c   :  { %420 = vadd.xlane.f32.xlu2 %v257_v12  ;;  %418 = vadd.xlane.f32.xlu1 %v256_v13  ;;  %v134_v12 = vld [vmem:[#allocation8 + $0x208] sm:$0xff]  ;;  %v133_v13 = vld [vmem:[#allocation8 + $0x200] sm:$0xff] }
  0x6d   :  { %416 = vadd.xlane.f32.xlu0 %v255_v14  ;;  %v132_v14 = vld [vmem:[#allocation8 + $0x1f8] sm:$0xff]  ;;  %v287_v15 = vmul.f32 %v210_v10, %v134_v12  ;;  %v286_v16 = vmul.f32 %v210_v10, %v133_v13  ;;  %v157_v12 = vld [vmem:[#allocation8 + $0x2c0] sm:$0xff] }
  0x6e   :  { %v285_v17 = vmul.f32 %v209_v40, %v132_v14  ;;  %v145_v40 = vld [vmem:[#allocation8 + $0x260] sm:$0xff]  ;;  %v156_v13 = vld [vmem:[#allocation8 + $0x2b8] sm:$0xff] }
  0x6f   :  { %v298_v43 = vmul.f32 %v210_v10, %v145_v40  ;;  %v167_v40 = vld [vmem:[#allocation8 + $0x310] sm:$0xff] }
  0x74   :  { %426 = vadd.xlane.f32.xlu2 %v260_v18  ;;  %424 = vadd.xlane.f32.xlu1 %v259_v19  ;;  %v137_v18 = vld [vmem:[#allocation8 + $0x220] sm:$0xff]  ;;  %v136_v19 = vld [vmem:[#allocation8 + $0x218] sm:$0xff] }
  0x75   :  { %422 = vadd.xlane.f32.xlu0 %v258_v20  ;;  %v135_v20 = vld [vmem:[#allocation8 + $0x210] sm:$0xff]  ;;  %v290_v22 = vmul.f32 %v210_v10, %v137_v18  ;;  %v289_v23 = vmul.f32 %v210_v10, %v136_v19 }
  0x7c   :  { %432 = vadd.xlane.f32.xlu2 %v263_v24  ;;  %430 = vadd.xlane.f32.xlu1 %v262_v25  ;;  %v288_v24 = vmul.f32 %v210_v10, %v135_v20  ;;  %v140_v25 = vld [vmem:[#allocation8 + $0x238] sm:$0xff]  ;;  %v161_v20 = vld [vmem:[#allocation8 + $0x2e0] sm:$0xff] }
  0x7d   :  { %428 = vadd.xlane.f32.xlu0 %v261_v26  ;;  %v139_v26 = vld [vmem:[#allocation8 + $0x230] sm:$0xff]  ;;  %v293_v28 = vmul.f32 %v210_v10, %v140_v25 }
  0x7e   :  { %v292_v29 = vmul.f32 %v210_v10, %v139_v26 }
  0x84   :  { %438 = vadd.xlane.f32.xlu2 %v266_v30  ;;  %436 = vadd.xlane.f32.xlu1 %v265_v31  ;;  %v291_v31 = vmul.f32 %v210_v10, %v138_v27 }
  0x85   :  { %434 = vadd.xlane.f32.xlu0 %v264_v32  ;;  %v143_v32 = vld [vmem:[#allocation8 + $0x250] sm:$0xff] }
  0x86   :  { %v296_v35 = vmul.f32 %v210_v10, %v143_v32 }
  0x88   :  { %v4593_v2 = vpop.xlane.xlu0 %350 }
  0x8c   :  { %444 = vadd.xlane.f32.xlu2 %v269_v36  ;;  %442 = vadd.xlane.f32.xlu1 %v268_v37  ;;  %v295_v36 = vmul.f32 %v210_v10, %v142_v33  ;;  %v294_v37 = vmul.f32 %v210_v10, %v141_v34  ;;  %v162_v33 = vld [vmem:[#allocation8 + $0x2e8] sm:$0xff] }
  0x8d   :  { %440 = vadd.xlane.f32.xlu0 %v267_v39  ;;  %v146_v39 = vld [vmem:[#allocation8 + $0x268] sm:$0xff] }
  0x8e   :  { %v299_v42 = vmul.f32 %v210_v10, %v146_v39 }
  0x90   :  { %v4596_v11 = vpop.xlane.xlu0 %352 }
  0x91   :  { %7385 = vst [vmem:[#allocation18_spill] sm:$0xff] %v4596_v11 }
  0x94   :  { %450 = vadd.xlane.f32.xlu2 %v272_v44  ;;  %448 = vadd.xlane.f32.xlu1 %v271_v45  ;;  %v203_v44 = vrot.slane %v4587_v0, 5  ;;  %v297_v45 = vmul.f32 %v210_v10, %v144_v41  ;;  %v166_v41 = vld [vmem:[#allocation8 + $0x308] sm:$0xff] }
  0x95   :  { %446 = vadd.xlane.f32.xlu0 %v270_v46 }
  0x96   :  { %v4605_v46 = vperm.slane %v203_v44, 0 }
  0x98   :  { %v4598_v21 = vpop.xlane.xlu0 %362  ;;  %v305_v60 = vmul.f32 %v4605_v46, %v152_v55  ;;  %v306_v8 = vmul.f32 %v4605_v46, %v153_v3 }
  0x99   :  { %7386 = vst [vmem:[#allocation19_spill] sm:$0xff] %v4598_v21 }
  0x9c   :  { %456 = vadd.xlane.f32.xlu2 %v275_v50  ;;  %454 = vadd.xlane.f32.xlu1 %v274_v51  ;;  %v4609_v50 = vpop.xlane.xlu2 %358  ;;  %v147_v51 = vld [vmem:[#allocation8 + $0x270] sm:$0xff] }
  0x9d   :  { %452 = vadd.xlane.f32.xlu0 %v273_v52  ;;  %7390 = vst [vmem:[#allocation23_spill] sm:$0xff] %v4609_v50  ;;  %v302_v52 = vmul.f32 %v4605_v46, %v149_v48  ;;  %v300_v54 = vmul.f32 %v210_v10, %v147_v51  ;;  %v158_v10 = vld [vmem:[#allocation8 + $0x2c8] sm:$0xff] }
  0x9e   :  { %v311_v14 = vmul.f32 %v4605_v46, %v158_v10  ;;  %v170_v51 = vld [vmem:[#allocation8 + $0x328] sm:$0xff] }
  0xa0   :  { %v4600_v30 = vpop.xlane.xlu0 %368 }
  0xa1   :  { %7387 = vst [vmem:[#allocation20_spill] sm:$0xff] %v4600_v30 }
  0xa4   :  { %462 = vadd.xlane.f32.xlu2 %v278_v56  ;;  %460 = vadd.xlane.f32.xlu1 %v277_v57  ;;  %v151_v56 = vld [vmem:[#allocation8 + $0x290] sm:$0xff]  ;;  %v150_v57 = vld [vmem:[#allocation8 + $0x288] sm:$0xff]  ;;  %v4614_v59 = vpop.xlane.xlu2 %360 }
  0xa5   :  { %458 = vadd.xlane.f32.xlu0 %v276_v58  ;;  %v304_v61 = vmul.f32 %v4605_v46, %v151_v56 }
  0xa8   :  { %v4602_v38 = vpop.xlane.xlu0 %374 }
  0xa9   :  { %7388 = vst [vmem:[#allocation21_spill] sm:$0xff] %v4602_v38 }
  0xac   :  { %468 = vadd.xlane.f32.xlu2 %v281_v62  ;;  %466 = vadd.xlane.f32.xlu1 %v280_v63  ;;  %v303_v62 = vmul.f32 %v4605_v46, %v150_v57  ;;  %v155_v63 = vld [vmem:[#allocation8 + $0x2b0] sm:$0xff] }
  0xad   :  { %464 = vadd.xlane.f32.xlu0 %v279_v1  ;;  %v154_v1 = vld [vmem:[#allocation8 + $0x2a8] sm:$0xff]  ;;  %v308_v4 = vmul.f32 %v4605_v46, %v155_v63  ;;  %v172_v63 = vld [vmem:[#allocation8 + $0x338] sm:$0xff] }
  0xae   :  { %v307_v5 = vmul.f32 %v4605_v46, %v154_v1  ;;  %v171_v1 = vld [vmem:[#allocation8 + $0x330] sm:$0xff] }
  0xb0   :  { %v4607_v47 = vpop.xlane.xlu0 %380 }
  0xb1   :  { %7389 = vst [vmem:[#allocation22_spill] sm:$0xff] %v4607_v47 }
  0xb4   :  { %474 = vadd.xlane.f32.xlu2 %v284_v6  ;;  %472 = vadd.xlane.f32.xlu1 %v283_v7  ;;  %v4621_v6 = vpop.xlane.xlu1 %354 }
  0xb5   :  { %470 = vadd.xlane.f32.xlu0 %v282_v9  ;;  %7392 = vst [vmem:[#allocation25_spill] sm:$0xff] %v4621_v6  ;;  %v4626_v9 = vpop.xlane.xlu2 %366 }
  0xb8   :  { %v4612_v58 = vpop.xlane.xlu0 %386 }
  0xb9   :  { %7391 = vst [vmem:[#allocation24_spill] sm:$0xff] %v4612_v58 }
  0xbc   :  { %480 = vadd.xlane.f32.xlu2 %v287_v15  ;;  %478 = vadd.xlane.f32.xlu1 %v286_v16  ;;  %v310_v15 = vmul.f32 %v4605_v46, %v157_v12  ;;  %v309_v16 = vmul.f32 %v4605_v46, %v156_v13  ;;  %v176_v13 = vld [vmem:[#allocation8 + $0x358] sm:$0xff] }
  0xbd   :  { %476 = vadd.xlane.f32.xlu0 %v285_v17  ;;  %v4631_v17 = vpop.xlane.xlu1 %356  ;;  %v4635_v19 = vpop.xlane.xlu2 %372 }
  0xbe   :  { %7394 = vst [vmem:[#allocation27_spill] sm:$0xff] %v4631_v17 }
  0xc0   :  { %v4623_v7 = vpop.xlane.xlu0 %392 }
  0xc1   :  { %7393 = vst [vmem:[#allocation26_spill] sm:$0xff] %v4623_v7 }
  0xc4   :  { %486 = vadd.xlane.f32.xlu2 %v290_v22  ;;  %484 = vadd.xlane.f32.xlu1 %v289_v23  ;;  %v160_v22 = vld [vmem:[#allocation8 + $0x2d8] sm:$0xff]  ;;  %v159_v23 = vld [vmem:[#allocation8 + $0x2d0] sm:$0xff] }
  0xc5   :  { %482 = vadd.xlane.f32.xlu0 %v288_v24  ;;  %v314_v24 = vmul.f32 %v4605_v46, %v161_v20  ;;  %v313_v25 = vmul.f32 %v4605_v46, %v160_v22  ;;  %v312_v26 = vmul.f32 %v4605_v46, %v159_v23  ;;  %v4640_v27 = vpop.xlane.xlu1 %364  ;;  %v4644_v32 = vpop.xlane.xlu2 %378 }
  0xc6   :  { %7396 = vst [vmem:[#allocation29_spill] sm:$0xff] %v4640_v27 }
  0xc8   :  { %v4633_v18 = vpop.xlane.xlu0 %398 }
  0xc9   :  { %7395 = vst [vmem:[#allocation28_spill] sm:$0xff] %v4633_v18 }
  0xcc   :  { %492 = vadd.xlane.f32.xlu2 %v293_v28  ;;  %490 = vadd.xlane.f32.xlu1 %v292_v29  ;;  %v164_v29 = vld [vmem:[#allocation8 + $0x2f8] sm:$0xff] }
  0xcd   :  { %488 = vadd.xlane.f32.xlu0 %v291_v31  ;;  %v163_v31 = vld [vmem:[#allocation8 + $0x2f0] sm:$0xff]  ;;  %v317_v34 = vmul.f32 %v4605_v46, %v164_v29 }
  0xd0   :  { %v4642_v28 = vpop.xlane.xlu0 %404 }
  0xd1   :  { %7397 = vst [vmem:[#allocation30_spill] sm:$0xff] %v4642_v28 }
  0xd4   :  { %498 = vadd.xlane.f32.xlu2 %v296_v35  ;;  %496 = vadd.xlane.f32.xlu1 %v295_v36  ;;  %v316_v35 = vmul.f32 %v4605_v46, %v163_v31  ;;  %v204_v36 = vrot.slane %v4587_v0, 6  ;;  %v177_v31 = vld [vmem:[#allocation8 + $0x360] sm:$0xff] }
  0xd5   :  { %494 = vadd.xlane.f32.xlu0 %v294_v37  ;;  %v315_v37 = vmul.f32 %v4605_v46, %v162_v33 }
  0xd6   :  { %v4650_v39 = vperm.slane %v204_v36, 0 }
  0xd8   :  { %v4654_v44 = vpop.xlane.xlu0 %410  ;;  %v320_v48 = vmul.f32 %v4650_v39, %v167_v40  ;;  %v319_v49 = vmul.f32 %v4650_v39, %v166_v41  ;;  %v330_v36 = vmul.f32 %v4650_v39, %v177_v31  ;;  %v182_v40 = vld [vmem:[#allocation8 + $0x388] sm:$0xff]  ;;  %v181_v41 = vld [vmem:[#allocation8 + $0x380] sm:$0xff] }
  0xd9   :  { %7399 = vst [vmem:[#allocation32_spill] sm:$0xff] %v4654_v44 }
  0xdc   :  { %504 = vadd.xlane.f32.xlu2 %v299_v42  ;;  %502 = vadd.xlane.f32.xlu1 %v298_v43  ;;  %v165_v42 = vld [vmem:[#allocation8 + $0x300] sm:$0xff]  ;;  %v4652_v43 = vpop.xlane.xlu1 %370 }
  0xdd   :  { %500 = vadd.xlane.f32.xlu0 %v297_v45  ;;  %7398 = vst [vmem:[#allocation31_spill] sm:$0xff] %v4652_v43  ;;  %v4656_v45 = vpop.xlane.xlu2 %384  ;;  %v318_v46 = vmul.f32 %v4650_v39, %v165_v42  ;;  %v180_v42 = vld [vmem:[#allocation8 + $0x378] sm:$0xff] }
  0xe0   :  { %v4665_v57 = vpop.xlane.xlu0 %416 }
  0xe1   :  { %7401 = vst [vmem:[#allocation34_spill] sm:$0xff] %v4665_v57 }
  0xe4   :  { %510 = vadd.xlane.f32.xlu2 %v302_v52  ;;  %508 = vadd.xlane.f32.xlu1 %v301_v53  ;;  %v169_v52 = vld [vmem:[#allocation8 + $0x320] sm:$0xff]  ;;  %v168_v53 = vld [vmem:[#allocation8 + $0x318] sm:$0xff]  ;;  %v4663_v56 = vpop.xlane.xlu1 %376 }
  0xe5   :  { %506 = vadd.xlane.f32.xlu0 %v300_v54  ;;  %v323_v54 = vmul.f32 %v4650_v39, %v170_v51  ;;  %v322_v55 = vmul.f32 %v4650_v39, %v169_v52  ;;  %7400 = vst [vmem:[#allocation33_spill] sm:$0xff] %v4663_v56  ;;  %v333_v52 = vmul.f32 %v4650_v39, %v180_v42 }
  0xe8   :  { %v4675_v10 = vpop.xlane.xlu0 %422 }
  0xe9   :  { %7403 = vst [vmem:[#allocation36_spill] sm:$0xff] %v4675_v10 }
  0xec   :  { %516 = vadd.xlane.f32.xlu2 %v305_v60  ;;  %514 = vadd.xlane.f32.xlu1 %v304_v61  ;;  %v321_v60 = vmul.f32 %v4650_v39, %v168_v53  ;;  %v4668_v61 = vpop.xlane.xlu2 %390  ;;  %v185_v53 = vld [vmem:[#allocation8 + $0x3a0] sm:$0xff] }
  0xed   :  { %512 = vadd.xlane.f32.xlu0 %v303_v62  ;;  %v173_v62 = vld [vmem:[#allocation8 + $0x340] sm:$0xff] }
  0xee   :  { %v326_v3 = vmul.f32 %v4650_v39, %v173_v62 }
  0xf4   :  { %522 = vadd.xlane.f32.xlu2 %v308_v4  ;;  %520 = vadd.xlane.f32.xlu1 %v307_v5  ;;  %v325_v4 = vmul.f32 %v4650_v39, %v172_v63  ;;  %v324_v5 = vmul.f32 %v4650_v39, %v171_v1  ;;  %v4677_v12 = vpop.xlane.xlu2 %396 }
  0xf5   :  { %518 = vadd.xlane.f32.xlu0 %v306_v8  ;;  %v4673_v8 = vpop.xlane.xlu1 %382 }
  0xf6   :  { %7402 = vst [vmem:[#allocation35_spill] sm:$0xff] %v4673_v8 }
  0xfc   :  { %528 = vadd.xlane.f32.xlu2 %v311_v14  ;;  %526 = vadd.xlane.f32.xlu1 %v310_v15  ;;  %v175_v14 = vld [vmem:[#allocation8 + $0x350] sm:$0xff]  ;;  %v174_v15 = vld [vmem:[#allocation8 + $0x348] sm:$0xff]  ;;  %v4686_v29 = vpop.xlane.xlu2 %402 }
  0xfd   :  { %524 = vadd.xlane.f32.xlu0 %v309_v16  ;;  %v329_v16 = vmul.f32 %v4650_v39, %v176_v13  ;;  %v328_v20 = vmul.f32 %v4650_v39, %v175_v14  ;;  %v327_v22 = vmul.f32 %v4650_v39, %v174_v15  ;;  %v4682_v23 = vpop.xlane.xlu1 %388  ;;  %v186_v13 = vld [vmem:[#allocation8 + $0x3a8] sm:$0xff]  ;;  %v7241_v14 = vlaneseq }
  0xfe   :  { %7404 = vst [vmem:[#allocation37_spill] sm:$0xff] %v4682_v23 }
 0x104   :  { %534 = vadd.xlane.f32.xlu2 %v314_v24  ;;  %532 = vadd.xlane.f32.xlu1 %v313_v25  ;;  %v4684_v24 = vpop.xlane.xlu0 %428  ;;  %v179_v25 = vld [vmem:[#allocation8 + $0x370] sm:$0xff] }
 0x105   :  { %530 = vadd.xlane.f32.xlu0 %v312_v26  ;;  %7405 = vst [vmem:[#allocation38_spill] sm:$0xff] %v4684_v24  ;;  %v178_v26 = vld [vmem:[#allocation8 + $0x368] sm:$0xff]  ;;  %v332_v33 = vmul.f32 %v4650_v39, %v179_v25 }
 0x10c   :  { %540 = vadd.xlane.f32.xlu2 %v317_v34  ;;  %538 = vadd.xlane.f32.xlu1 %v316_v35  ;;  %v331_v34 = vmul.f32 %v4650_v39, %v178_v26  ;;  %v205_v35 = vrot.slane %v4587_v0, 7  ;;  %v188_v39 = vld [vmem:[#allocation8 + $0x3b8] sm:$0xff] }
 0x10d   :  { %536 = vadd.xlane.f32.xlu0 %v315_v37 }
 0x10e   :  { %v4692_v37 = vperm.slane %v205_v35, 0  ;;  %v189_v35 = vld [vmem:[#allocation8 + $0x3c0] sm:$0xff] }
 0x110   :  { %v335_v51 = vmul.f32 %v4692_v37, %v182_v40  ;;  %v334_v0 = vmul.f32 %v4692_v37, %v181_v41  ;;  %v341_v15 = vmul.f32 %v4692_v37, %v188_v39  ;;  %v342_v41 = vmul.f32 %v4692_v37, %v189_v35  ;;  %v196_v39 = vld [vmem:[#allocation8 + $0x3f8] sm:$0xff] }
 0x114   :  { %546 = vadd.xlane.f32.xlu2 %v320_v48  ;;  %544 = vadd.xlane.f32.xlu1 %v319_v49  ;;  %v4694_v48 = vpop.xlane.xlu1 %394  ;;  %v4696_v49 = vpop.xlane.xlu0 %434 }
 0x115   :  { %542 = vadd.xlane.f32.xlu0 %v318_v46  ;;  %7406 = vst [vmem:[#allocation39_spill] sm:$0xff] %v4694_v48  ;;  %v4698_v46 = vpop.xlane.xlu2 %408 }
 0x116   :  { %7407 = vst [vmem:[#allocation40_spill] sm:$0xff] %v4696_v49 }
 0x11c   :  { %552 = vadd.xlane.f32.xlu2 %v323_v54  ;;  %550 = vadd.xlane.f32.xlu1 %v322_v55  ;;  %v184_v54 = vld [vmem:[#allocation8 + $0x398] sm:$0xff]  ;;  %v183_v55 = vld [vmem:[#allocation8 + $0x390] sm:$0xff]  ;;  %v4705_v63 = vpop.xlane.xlu1 %400  ;;  %v4707_v1 = vpop.xlane.xlu0 %440 }
 0x11d   :  { %548 = vadd.xlane.f32.xlu0 %v321_v60  ;;  %v338_v60 = vmul.f32 %v4692_v37, %v185_v53  ;;  %v337_v62 = vmul.f32 %v4692_v37, %v184_v54  ;;  %7408 = vst [vmem:[#allocation41_spill] sm:$0xff] %v4705_v63  ;;  %v193_v53 = vld [vmem:[#allocation8 + $0x3e0] sm:$0xff] }
 0x11e   :  { %7409 = vst [vmem:[#allocation42_spill] sm:$0xff] %v4707_v1 }
 0x124   :  { %558 = vadd.xlane.f32.xlu2 %v326_v3  ;;  %556 = vadd.xlane.f32.xlu1 %v325_v4  ;;  %v336_v3 = vmul.f32 %v4692_v37, %v183_v55  ;;  %v4710_v4 = vpop.xlane.xlu2 %414  ;;  %v4718_v25 = vpop.xlane.xlu1 %406  ;;  %v192_v55 = vld [vmem:[#allocation8 + $0x3d8] sm:$0xff] }
 0x125   :  { %554 = vadd.xlane.f32.xlu0 %v324_v5  ;;  %v187_v5 = vld [vmem:[#allocation8 + $0x3b0] sm:$0xff]  ;;  %7410 = vst [vmem:[#allocation43_spill] sm:$0xff] %v4718_v25  ;;  %v4720_v26 = vpop.xlane.xlu0 %446 }
 0x126   :  { %7411 = vst [vmem:[#allocation44_spill] sm:$0xff] %v4720_v26 }
 0x12c   :  { %564 = vadd.xlane.f32.xlu2 %v329_v16  ;;  %562 = vadd.xlane.f32.xlu1 %v328_v20  ;;  %v340_v16 = vmul.f32 %v4692_v37, %v187_v5  ;;  %v339_v20 = vmul.f32 %v4692_v37, %v186_v13  ;;  %v4724_v31 = vpop.xlane.xlu2 %420  ;;  %v195_v5 = vld [vmem:[#allocation8 + $0x3f0] sm:$0xff] }
 0x12d   :  { %560 = vadd.xlane.f32.xlu0 %v327_v22  ;;  %v4716_v22 = vshrl.u32 %v7241_v14, 7 }
 0x12f   :  { %3904 = vset.pattern.permute.xlu2 %v4716_v22  ;;  %3943 = vset.pattern.permute.xlu0 %v4716_v22  ;;  %v4730_v42 = vadd.s32 16, %v4716_v22  ;;  %v4817_v26 = vadd.s32 48, %v4716_v22 }
 0x131   :  { %3905 = vset.pattern.permute.xlu1 %v4730_v42 }
 0x134   :  { %570 = vadd.xlane.f32.xlu2 %v332_v33  ;;  %568 = vadd.xlane.f32.xlu1 %v331_v34  ;;  %v191_v33 = vld [vmem:[#allocation8 + $0x3d0] sm:$0xff]  ;;  %v190_v34 = vld [vmem:[#allocation8 + $0x3c8] sm:$0xff]  ;;  %v4736_v54 = vpop.xlane.xlu2 %426 }
 0x135   :  { %566 = vadd.xlane.f32.xlu0 %v330_v36  ;;  %v344_v36 = vmul.f32 %v4692_v37, %v191_v33  ;;  %v343_v40 = vmul.f32 %v4692_v37, %v190_v34  ;;  %v348_v33 = vmul.f32 %v4692_v37, %v195_v5 }
 0x13c   :  { %576 = vadd.xlane.f32.xlu2 %v335_v51  ;;  %574 = vadd.xlane.f32.xlu1 %v334_v0  ;;  %v4732_v51 = vpop.xlane.xlu1 %412  ;;  %v4734_v0 = vpop.xlane.xlu0 %452 }
 0x13d   :  { %572 = vadd.xlane.f32.xlu0 %v333_v52  ;;  %7412 = vst [vmem:[#allocation45_spill] sm:$0xff] %v4732_v51  ;;  %v194_v52 = vld [vmem:[#allocation8 + $0x3e8] sm:$0xff] }
 0x13e   :  { %7413 = vst [vmem:[#allocation46_spill] sm:$0xff] %v4734_v0 }
 0x144   :  { %582 = vadd.xlane.f32.xlu2 %v338_v60  ;;  %580 = vadd.xlane.f32.xlu1 %v337_v62  ;;  %v347_v60 = vmul.f32 %v4692_v37, %v194_v52  ;;  %v346_v62 = vmul.f32 %v4692_v37, %v193_v53  ;;  %v4742_v13 = vpop.xlane.xlu1 %418 }
 0x145   :  { %578 = vadd.xlane.f32.xlu0 %v336_v3  ;;  %v345_v3 = vmul.f32 %v4692_v37, %v192_v55  ;;  %7414 = vst [vmem:[#allocation47_spill] sm:$0xff] %v4742_v13 }
 0x14c   :  { %588 = vadd.xlane.f32.xlu2 %v341_v15  ;;  %586 = vadd.xlane.f32.xlu1 %v340_v16  ;;  %v4744_v15 = vpop.xlane.xlu0 %458  ;;  %v4746_v16 = vpop.xlane.xlu2 %432 }
 0x14d   :  { %584 = vadd.xlane.f32.xlu0 %v339_v20  ;;  %7415 = vst [vmem:[#allocation48_spill] sm:$0xff] %v4744_v15  ;;  %v349_v20 = vmul.f32 %v4692_v37, %v196_v39  ;;  %v4750_v34 = vpop.xlane.xlu1 %424  ;;  %v4782_v39 = vadd.s32 40, %v4716_v22 }
 0x14e   :  { %7416 = vst [vmem:[#allocation49_spill] sm:$0xff] %v4750_v34  ;;  %v4862_v34 = vadd.s32 88, %v4716_v22 }
 0x154   :  { %594 = vadd.xlane.f32.xlu2 %v344_v36  ;;  %592 = vadd.xlane.f32.xlu1 %v343_v40  ;;  %v4752_v35 = vpop.xlane.xlu0 %464  ;;  %v4754_v36 = vpop.xlane.xlu2 %438  ;;  %v4756_v40 = vld [vmem:[#allocation10] sm:$0xff] }
 0x155   :  { %590 = vadd.xlane.f32.xlu0 %v342_v41  ;;  %7417 = vst [vmem:[#allocation50_spill] sm:$0xff] %v4752_v35  ;;  %v4759_v41 = vperm.slane %v4756_v40, 0  ;;  %v4761_v52 = vpop.xlane.xlu1 %430  ;;  %v4769_v37 = vperm.slane %v4756_v40, 3  ;;  %v4859_v10 = vperm.slane %v4756_v40, 4 }
 0x156   :  { %7418 = vst [vmem:[#allocation51_spill] sm:$0xff] %v4761_v52 }
 0x15c   :  { %600 = vadd.xlane.f32.xlu2 %v347_v60  ;;  %598 = vadd.xlane.f32.xlu1 %v346_v62  ;;  %v4763_v53 = vpop.xlane.xlu0 %470  ;;  %v4765_v55 = vpop.xlane.xlu2 %444  ;;  %v4772_v60 = vadd.s32 24, %v4716_v22 }
 0x15d   :  { %596 = vadd.xlane.f32.xlu0 %v345_v3  ;;  %7419 = vst [vmem:[#allocation52_spill] sm:$0xff] %v4763_v53  ;;  %v4776_v62 = vpop.xlane.xlu1 %436  ;;  %v4802_v53 = vadd.s32 80, %v4716_v22 }
 0x15e   :  { %7420 = vst [vmem:[#allocation53_spill] sm:$0xff] %v4776_v62 }
 0x164   :  { %604 = vadd.xlane.f32.xlu1 %v349_v20  ;;  %v4778_v3 = vpop.xlane.xlu0 %476  ;;  %v4784_v5 = vpop.xlane.xlu2 %450 }
 0x165   :  { %602 = vadd.xlane.f32.xlu0 %v348_v33  ;;  %7421 = vst [vmem:[#allocation54_spill] sm:$0xff] %v4778_v3  ;;  %v4789_v20 = vpop.xlane.xlu1 %442  ;;  %v4796_v3 = vadd.s32 32, %v4716_v22 }
 0x166   :  { %7422 = vst [vmem:[#allocation55_spill] sm:$0xff] %v4789_v20  ;;  %v4829_v20 = vadd.s32 120, %v4716_v22 }
 0x16c   :  { %v4791_v33 = vpop.xlane.xlu0 %482  ;;  %v4793_v14 = vpop.xlane.xlu2 %456 }
 0x16d   :  { %7423 = vst [vmem:[#allocation56_spill] sm:$0xff] %v4791_v33  ;;  %v4804_v35 = vpop.xlane.xlu1 %448  ;;  %v4810_v33 = vadd.s32 56, %v4716_v22 }
 0x16e   :  { %7424 = vst [vmem:[#allocation57_spill] sm:$0xff] %v4804_v35 }
 0x174   :  { %612 = vperm.xlu2 %3904, %v4759_v41   ;;  %v4806_v15 = vpop.xlane.xlu0 %488  ;;  %v4812_v0 = vpop.xlane.xlu2 %462 }
 0x175   :  { %7425 = vst [vmem:[#allocation58_spill] sm:$0xff] %v4806_v15  ;;  %v4820_v1 = vpop.xlane.xlu1 %454 }
 0x176   :  { %7426 = vst [vmem:[#allocation59_spill] sm:$0xff] %v4820_v1  ;;  %v4841_v1 = vadd.s32 72, %v4716_v22 }
 0x179   :  { %903 = vperm.xlu0 %3943, %v4769_v37  }
 0x17c   :  { %3906 = vset.pattern.permute.xlu2 %v4772_v60  ;;  %v4822_v35 = vpop.xlane.xlu0 %494  ;;  %v4824_v15 = vpop.xlane.xlu2 %468 }
 0x17d   :  { %624 = vperm.xlu1 %3905, %v4759_v41   ;;  %7427 = vst [vmem:[#allocation60_spill] sm:$0xff] %v4822_v35  ;;  %v4833_v49 = vpop.xlane.xlu1 %460 }
 0x17e   :  { %7428 = vst [vmem:[#allocation61_spill] sm:$0xff] %v4833_v49 }
 0x181   :  { %3948 = vset.pattern.permute.xlu0 %v4782_v39 }
 0x184   :  { %630 = vperm.xlu2 %3906, %v4759_v41   ;;  %v4835_v62 = vpop.xlane.xlu0 %500  ;;  %v4838_v35 = vpop.xlane.xlu2 %474 }
 0x185   :  { %3908 = vset.pattern.permute.xlu1 %v4782_v39  ;;  %7429 = vst [vmem:[#allocation62_spill] sm:$0xff] %v4835_v62  ;;  %v4846_v24 = vpop.xlane.xlu1 %466  ;;  %v4854_v62 = vadd.s32 96, %v4716_v22 }
 0x186   :  { %7430 = vst [vmem:[#allocation63_spill] sm:$0xff] %v4846_v24 }
 0x189   :  { %933 = vperm.xlu0 %3948, %v4769_v37  }
 0x18c   :  { %3907 = vset.pattern.permute.xlu2 %v4796_v3  ;;  %v4848_v52 = vpop.xlane.xlu0 %506  ;;  %v4850_v49 = vpop.xlane.xlu2 %480 }
 0x18d   :  { %642 = vperm.xlu1 %3908, %v4759_v41   ;;  %7431 = vst [vmem:[#allocation64_spill] sm:$0xff] %v4848_v52  ;;  %v4864_v24 = vpop.xlane.xlu1 %472 }
 0x18e   :  { %7432 = vst [vmem:[#allocation65_spill] sm:$0xff] %v4864_v24 }
 0x191   :  { %3953 = vset.pattern.permute.xlu0 %v4802_v53 }
 0x194   :  { %636 = vperm.xlu2 %3907, %v4759_v41   ;;  %v4866_v52 = vpop.xlane.xlu0 %512  ;;  %v4869_v57 = vpop.xlane.xlu2 %486 }
 0x195   :  { %3910 = vset.pattern.permute.xlu1 %v4810_v33  ;;  %7433 = vst [vmem:[#allocation66_spill] sm:$0xff] %v4866_v52  ;;  %v4874_v13 = vpop.xlane.xlu1 %478  ;;  %v4883_v52 = vadd.s32 112, %v4716_v22 }
 0x196   :  { %7434 = vst [vmem:[#allocation67_spill] sm:$0xff] %v4874_v13  ;;  %v4896_v13 = vadd.s32 8, %v4716_v22 }
 0x199   :  { %963 = vperm.xlu0 %3953, %v4769_v37  }
 0x19c   :  { %3909 = vset.pattern.permute.xlu2 %v4817_v26  ;;  %v4876_v44 = vpop.xlane.xlu0 %518  ;;  %v4878_v51 = vpop.xlane.xlu2 %492 }
 0x19d   :  { %654 = vperm.xlu1 %3910, %v4759_v41   ;;  %7435 = vst [vmem:[#allocation68_spill] sm:$0xff] %v4876_v44  ;;  %v4887_v24 = vpop.xlane.xlu1 %484 }
 0x19e   :  { %7436 = vst [vmem:[#allocation69_spill] sm:$0xff] %v4887_v24 }
 0x1a1   :  { %3958 = vset.pattern.permute.xlu0 %v4829_v20 }
 0x1a4   :  { %648 = vperm.xlu2 %3909, %v4759_v41   ;;  %v4889_v28 = vpop.xlane.xlu0 %524  ;;  %v4892_v44 = vpop.xlane.xlu2 %498 }
 0x1a5   :  { %3912 = vset.pattern.permute.xlu1 %v4802_v53  ;;  %7437 = vst [vmem:[#allocation70_spill] sm:$0xff] %v4889_v28  ;;  %v4900_v25 = vpop.xlane.xlu1 %490  ;;  %v4908_v28 = vperm.slane %v4756_v40, 1 }
 0x1a6   :  { %7438 = vst [vmem:[#allocation71_spill] sm:$0xff] %v4900_v25 }
 0x1a9   :  { %993 = vperm.xlu0 %3958, %v4769_v37  }
 0x1ac   :  { %3911 = vset.pattern.permute.xlu2 %v4841_v1  ;;  %v4902_v18 = vpop.xlane.xlu0 %530  ;;  %v4904_v24 = vpop.xlane.xlu2 %504 }
 0x1ad   :  { %672 = vperm.xlu1 %3912, %v4759_v41   ;;  %7439 = vst [vmem:[#allocation72_spill] sm:$0xff] %v4902_v18  ;;  %v4912_v63 = vpop.xlane.xlu1 %496  ;;  %v4922_v18 = vperm.slane %v4756_v40, 5 }
 0x1ae   :  { %7440 = vst [vmem:[#allocation73_spill] sm:$0xff] %v4912_v63 }
 0x1b1   :  { %3963 = vset.pattern.permute.xlu0 %v4796_v3 }
 0x1b4   :  { %666 = vperm.xlu2 %3911, %v4759_v41   ;;  %v4914_v7 = vpop.xlane.xlu0 %536  ;;  %v4917_v25 = vpop.xlane.xlu2 %510 }
 0x1b5   :  { %3914 = vset.pattern.permute.xlu1 %v4854_v62  ;;  %7441 = vst [vmem:[#allocation74_spill] sm:$0xff] %v4914_v7  ;;  %v4925_v48 = vpop.xlane.xlu1 %502  ;;  %v4934_v7 = vadd.s32 64, %v4716_v22 }
 0x1b6   :  { %7442 = vst [vmem:[#allocation75_spill] sm:$0xff] %v4925_v48 }
 0x1b9   :  { %1024 = vperm.xlu0 %3963, %v4859_v10  }
 0x1bc   :  { %3913 = vset.pattern.permute.xlu2 %v4862_v34  ;;  %v4927_v58 = vpop.xlane.xlu0 %542  ;;  %v4929_v63 = vpop.xlane.xlu2 %516 }
 0x1bd   :  { %684 = vperm.xlu1 %3914, %v4759_v41   ;;  %7443 = vst [vmem:[#allocation76_spill] sm:$0xff] %v4927_v58  ;;  %v4938_v23 = vpop.xlane.xlu1 %508 }
 0x1be   :  { %7444 = vst [vmem:[#allocation77_spill] sm:$0xff] %v4938_v23 }
 0x1c1   :  { %3968 = vset.pattern.permute.xlu0 %v4841_v1 }
 0x1c4   :  { %678 = vperm.xlu2 %3913, %v4759_v41   ;;  %v4940_v47 = vpop.xlane.xlu0 %548  ;;  %v4943_v58 = vpop.xlane.xlu2 %522 }
 0x1c5   :  { %3916 = vset.pattern.permute.xlu1 %v4829_v20  ;;  %7445 = vst [vmem:[#allocation78_spill] sm:$0xff] %v4940_v47  ;;  %v4948_v48 = vpop.xlane.xlu1 %514  ;;  %v4958_v47 = vadd.s32 104, %v4716_v22 }
 0x1c6   :  { %7446 = vst [vmem:[#allocation79_spill] sm:$0xff] %v4948_v48 }
 0x1c9   :  { %1054 = vperm.xlu0 %3968, %v4859_v10  }
 0x1cc   :  { %3915 = vset.pattern.permute.xlu2 %v4883_v52  ;;  %v4950_v8 = vpop.xlane.xlu0 %554  ;;  %v4952_v38 = vpop.xlane.xlu2 %528 }
 0x1cd   :  { %702 = vperm.xlu1 %3916, %v4759_v41   ;;  %7447 = vst [vmem:[#allocation80_spill] sm:$0xff] %v4950_v8  ;;  %v4960_v23 = vpop.xlane.xlu1 %520 }
 0x1ce   :  { %7448 = vst [vmem:[#allocation81_spill] sm:$0xff] %v4960_v23 }
 0x1d1   :  { %3973 = vset.pattern.permute.xlu0 %v4883_v52 }
 0x1d4   :  { %696 = vperm.xlu2 %3915, %v4759_v41   ;;  %v4962_v56 = vpop.xlane.xlu0 %560  ;;  %v4965_v48 = vpop.xlane.xlu2 %534 }
 0x1d5   :  { %3918 = vset.pattern.permute.xlu1 %v4896_v13  ;;  %7449 = vst [vmem:[#allocation82_spill] sm:$0xff] %v4962_v56  ;;  %v4970_v8 = vpop.xlane.xlu1 %526 }
 0x1d6   :  { %7450 = vst [vmem:[#allocation83_spill] sm:$0xff] %v4965_v48 }
 0x1d7   :  { %7451 = vst [vmem:[#allocation84_spill] sm:$0xff] %v4970_v8 }
 0x1d9   :  { %1084 = vperm.xlu0 %3973, %v4859_v10  }
 0x1dc   :  { %3917 = vset.pattern.permute.xlu2 %v4716_v22  ;;  %v4972_v30 = vpop.xlane.xlu0 %566  ;;  %v4974_v43 = vpop.xlane.xlu2 %540 }
 0x1dd   :  { %715 = vperm.xlu1 %3918, %v4908_v28   ;;  %7452 = vst [vmem:[#allocation85_spill] sm:$0xff] %v4972_v30  ;;  %v4980_v56 = vpop.xlane.xlu1 %532 }
 0x1de   :  { %7453 = vst [vmem:[#allocation86_spill] sm:$0xff] %v4974_v43 }
 0x1df   :  { %7454 = vst [vmem:[#allocation87_spill] sm:$0xff] %v4980_v56 }
 0x1e1   :  { %3978 = vset.pattern.permute.xlu0 %v4772_v60 }
 0x1e4   :  { %709 = vperm.xlu2 %3917, %v4908_v28   ;;  %v4982_v23 = vpop.xlane.xlu0 %572  ;;  %v4985_v21 = vpop.xlane.xlu2 %546 }
 0x1e5   :  { %3920 = vset.pattern.permute.xlu1 %v4796_v3  ;;  %7455 = vst [vmem:[#allocation88_spill] sm:$0xff] %v4982_v23  ;;  %v4990_v30 = vpop.xlane.xlu1 %538  ;;  %v5000_v23 = vperm.slane %v4756_v40, 6 }
 0x1e6   :  { %7456 = vst [vmem:[#allocation89_spill] sm:$0xff] %v4985_v21 }
 0x1e7   :  { %7457 = vst [vmem:[#allocation90_spill] sm:$0xff] %v4990_v30 }
 0x1e9   :  { %1115 = vperm.xlu0 %3978, %v4922_v18  }
 0x1ec   :  { %3919 = vset.pattern.permute.xlu2 %v4772_v60  ;;  %v4992_v8 = vpop.xlane.xlu0 %578  ;;  %v4994_v27 = vpop.xlane.xlu2 %552 }
 0x1ed   :  { %733 = vperm.xlu1 %3920, %v4908_v28   ;;  %7458 = vst [vmem:[#allocation91_spill] sm:$0xff] %v4992_v8  ;;  %v5002_v56 = vpop.xlane.xlu1 %544  ;;  %v5013_v8 = vperm.slane %v4756_v40, 2 }
 0x1ee   :  { %7459 = vst [vmem:[#allocation92_spill] sm:$0xff] %v4994_v27 }
 0x1ef   :  { %7460 = vst [vmem:[#allocation93_spill] sm:$0xff] %v5002_v56 }
 0x1f1   :  { %3979 = vset.pattern.permute.xlu0 %v4934_v7 }
 0x1f4   :  { %727 = vperm.xlu2 %3919, %v4908_v28   ;;  %v5004_v17 = vpop.xlane.xlu0 %584  ;;  %v5007_v30 = vpop.xlane.xlu2 %558 }
 0x1f5   :  { %3922 = vset.pattern.permute.xlu1 %v4817_v26  ;;  %7461 = vst [vmem:[#allocation94_spill] sm:$0xff] %v5004_v17  ;;  %v5015_v50 = vpop.xlane.xlu1 %550 }
 0x1f6   :  { %7462 = vst [vmem:[#allocation95_spill] sm:$0xff] %v5007_v30 }
 0x1f7   :  { %7463 = vst [vmem:[#allocation96_spill] sm:$0xff] %v5015_v50 }
 0x1f9   :  { %660 = vperm.xlu0 %3979, %v4759_v41  }
 0x1fc   :  { %3921 = vset.pattern.permute.xlu2 %v4782_v39  ;;  %v5017_v11 = vpop.xlane.xlu0 %590  ;;  %v5019_v56 = vpop.xlane.xlu2 %564 }
 0x1fd   :  { %745 = vperm.xlu1 %3922, %v4908_v28   ;;  %7464 = vst [vmem:[#allocation97_spill] sm:$0xff] %v5017_v11  ;;  %v5025_v17 = vpop.xlane.xlu1 %556 }
 0x1fe   :  { %7465 = vst [vmem:[#allocation98_spill] sm:$0xff] %v5019_v56 }
 0x1ff   :  { %7466 = vst [vmem:[#allocation99_spill] sm:$0xff] %v5025_v17 }
 0x201   :  { %1145 = vperm.xlu0 %3979, %v4922_v18  }
 0x204   :  { %739 = vperm.xlu2 %3921, %v4908_v28   ;;  %v5027_v6 = vpop.xlane.xlu0 %596  ;;  %v5030_v30 = vpop.xlane.xlu2 %570 }
 0x205   :  { %3924 = vset.pattern.permute.xlu1 %v4841_v1  ;;  %7467 = vst [vmem:[#allocation100_spill] sm:$0xff] %v5027_v6  ;;  %v5035_v11 = vpop.xlane.xlu1 %562 }
 0x206   :  { %7468 = vst [vmem:[#allocation101_spill] sm:$0xff] %v5030_v30 }
 0x207   :  { %7469 = vst [vmem:[#allocation102_spill] sm:$0xff] %v5035_v11 }
 0x209   :  { %3984 = vset.pattern.permute.xlu0 %v4958_v47 }
 0x20c   :  { %3923 = vset.pattern.permute.xlu2 %v4934_v7  ;;  %v5037_v50 = vpop.xlane.xlu0 %602  ;;  %v5039_v56 = vpop.xlane.xlu2 %576 }
 0x20d   :  { %763 = vperm.xlu1 %3924, %v4908_v28   ;;  %7470 = vst [vmem:[#allocation103_spill] sm:$0xff] %v5037_v50  ;;  %v5044_v6 = vpop.xlane.xlu1 %568 }
 0x20e   :  { %7471 = vst [vmem:[#allocation104_spill] sm:$0xff] %v5039_v56 }
 0x20f   :  { %7472 = vst [vmem:[#allocation105_spill] sm:$0xff] %v5044_v6 }
 0x211   :  { %690 = vperm.xlu0 %3984, %v4759_v41  }
 0x214   :  { %757 = vperm.xlu2 %3923, %v4908_v28   ;;  %v5046_v17 = vpop.permute.xlu0 %903  ;;  %v5049_v30 = vpop.xlane.xlu2 %582 }
 0x215   :  { %3926 = vset.pattern.permute.xlu1 %v4862_v34  ;;  %7473 = vst [vmem:[#allocation106_spill] sm:$0xff] %v5046_v17  ;;  %v5054_v50 = vpop.xlane.xlu1 %574 }
 0x216   :  { %7474 = vst [vmem:[#allocation107_spill] sm:$0xff] %v5049_v30 }
 0x217   :  { %7475 = vst [vmem:[#allocation108_spill] sm:$0xff] %v5054_v50 }
 0x219   :  { %1175 = vperm.xlu0 %3984, %v4922_v18  }
 0x21c   :  { %3925 = vset.pattern.permute.xlu2 %v4802_v53  ;;  %v5056_v11 = vpop.permute.xlu0 %933  ;;  %v5058_v56 = vpop.xlane.xlu2 %588 }
 0x21d   :  { %775 = vperm.xlu1 %3926, %v4908_v28   ;;  %7476 = vst [vmem:[#allocation109_spill] sm:$0xff] %v5058_v56  ;;  %v5066_v6 = vpop.xlane.xlu1 %580 }
 0x21e   :  { %7478 = vst [vmem:[#allocation111_spill] sm:$0xff] %v5066_v6 }
 0x221   :  { %3989 = vset.pattern.permute.xlu0 %v4730_v42 }
 0x224   :  { %769 = vperm.xlu2 %3925, %v4908_v28   ;;  %v5069_v17 = vpop.xlane.xlu2 %594 }
 0x225   :  { %3928 = vset.pattern.permute.xlu1 %v4883_v52  ;;  %7479 = vst [vmem:[#allocation112_spill] sm:$0xff] %v5069_v17  ;;  %v5076_v56 = vpop.xlane.xlu1 %586 }
 0x226   :  { %7481 = vst [vmem:[#allocation114_spill] sm:$0xff] %v5076_v56 }
 0x229   :  { %721 = vperm.xlu0 %3989, %v4908_v28  }
 0x22c   :  { %3927 = vset.pattern.permute.xlu2 %v4958_v47  ;;  %v5078_v30 = vpop.xlane.xlu2 %600 }
 0x22d   :  { %793 = vperm.xlu1 %3928, %v4908_v28   ;;  %7482 = vst [vmem:[#allocation115_spill] sm:$0xff] %v5078_v30 }
 0x231   :  { %1206 = vperm.xlu0 %3989, %v5000_v23  }
 0x234   :  { %787 = vperm.xlu2 %3927, %v4908_v28  }
 0x235   :  { %3930 = vset.pattern.permute.xlu1 %v4716_v22 }
 0x239   :  { %3994 = vset.pattern.permute.xlu0 %v4810_v33 }
 0x23c   :  { %3929 = vset.pattern.permute.xlu2 %v4829_v20 }
 0x23d   :  { %806 = vperm.xlu1 %3930, %v5013_v8  }
 0x241   :  { %751 = vperm.xlu0 %3994, %v4908_v28  }
 0x244   :  { %799 = vperm.xlu2 %3929, %v4908_v28  }
 0x245   :  { %3932 = vset.pattern.permute.xlu1 %v4772_v60 }
 0x249   :  { %1236 = vperm.xlu0 %3994, %v5000_v23  }
 0x24c   :  { %3931 = vset.pattern.permute.xlu2 %v4730_v42 }
 0x24d   :  { %824 = vperm.xlu1 %3932, %v5013_v8  }
 0x251   :  { %3999 = vset.pattern.permute.xlu0 %v4854_v62 }
 0x254   :  { %818 = vperm.xlu2 %3931, %v5013_v8  }
 0x255   :  { %3934 = vset.pattern.permute.xlu1 %v4782_v39 }
 0x259   :  { %781 = vperm.xlu0 %3999, %v4908_v28   ;;  %v5063_v28 = vpop.permute.xlu0 %963 }
 0x25a   :  { %7477 = vst [vmem:[#allocation110_spill] sm:$0xff] %v5063_v28  ;;  %v613_v28 = vpop.permute.xlu2 %612 }
 0x25c   :  { %3933 = vset.pattern.permute.xlu2 %v4796_v3 }
 0x25d   :  { %836 = vperm.xlu1 %3934, %v5013_v8  }
 0x261   :  { %1266 = vperm.xlu0 %3999, %v5000_v23   ;;  %v5072_v50 = vpop.permute.xlu0 %993 }
 0x262   :  { %7480 = vst [vmem:[#allocation113_spill] sm:$0xff] %v5072_v50  ;;  %v5088_v50 = vpop.xlane.xlu1 %592  ;;  %v5098_v17 = vpop.permute.xlu2 %630 }
 0x263   :  { %7484 = vst [vmem:[#allocation117_spill] sm:$0xff] %v5088_v50 }
 0x264   :  { %830 = vperm.xlu2 %3933, %v5013_v8   ;;  %7487 = vst [vmem:[#allocation120_spill] sm:$0xff] %v5098_v17 }
 0x265   :  { %3936 = vset.pattern.permute.xlu1 %v4934_v7 }
 0x269   :  { %4004 = vset.pattern.permute.xlu0 %v4896_v13  ;;  %v5082_v6 = vpop.permute.xlu0 %1024 }
 0x26a   :  { %v5096_v30 = vpop.xlane.xlu1 %598  ;;  %v5105_v50 = vpop.permute.xlu2 %636 }
 0x26b   :  { %7486 = vst [vmem:[#allocation119_spill] sm:$0xff] %v5096_v30 }
 0x26c   :  { %3935 = vset.pattern.permute.xlu2 %v4810_v33  ;;  %7489 = vst [vmem:[#allocation122_spill] sm:$0xff] %v5105_v50 }
 0x26d   :  { %854 = vperm.xlu1 %3936, %v5013_v8  }
 0x271   :  { %618 = vperm.xlu0 %4004, %v4759_v41   ;;  %v5086_v41 = vperm.slane %v4756_v40, 7  ;;  %v5092_v56 = vpop.permute.xlu0 %1054 }
 0x272   :  { %7485 = vst [vmem:[#allocation118_spill] sm:$0xff] %v5092_v56  ;;  %v5108_v56 = vpop.xlane.xlu1 %604  ;;  %v5114_v30 = vpop.permute.xlu2 %648 }
 0x273   :  { %7483 = vst [vmem:[#allocation116_spill] sm:$0xff] %v5086_v41 }
 0x274   :  { %848 = vperm.xlu2 %3935, %v5013_v8   ;;  %7490 = vst [vmem:[#allocation123_spill] sm:$0xff] %v5108_v56 }
 0x275   :  { %3938 = vset.pattern.permute.xlu1 %v4802_v53  ;;  %7491 = vst [vmem:[#allocation124_spill] sm:$0xff] %v5114_v30 }
 0x279   :  { %812 = vperm.xlu0 %4004, %v5013_v8   ;;  %v5101_v40 = vpop.permute.xlu0 %1084 }
 0x27a   :  { %7488 = vst [vmem:[#allocation121_spill] sm:$0xff] %v5101_v40  ;;  %v5117_v40 = vpop.permute.xlu1 %624  ;;  %v5123_v50 = vpop.permute.xlu2 %666 }
 0x27b   :  { %7492 = vst [vmem:[#allocation125_spill] sm:$0xff] %v5117_v40 }
 0x27c   :  { %3937 = vset.pattern.permute.xlu2 %v4841_v1  ;;  %7493 = vst [vmem:[#allocation126_spill] sm:$0xff] %v5123_v50 }
 0x27d   :  { %866 = vperm.xlu1 %3938, %v5013_v8  }
 0x281   :  { %1297 = vperm.xlu0 %4004, %v5086_v41   ;;  %v5111_v27 = vpop.permute.xlu0 %1115 }
 0x282   :  { %v643_v56 = vpop.permute.xlu1 %642  ;;  %v679_v40 = vpop.permute.xlu2 %678 }
 0x284   :  { %860 = vperm.xlu2 %3937, %v5013_v8  }
 0x285   :  { %3940 = vset.pattern.permute.xlu1 %v4958_v47 }
 0x289   :  { %4009 = vset.pattern.permute.xlu0 %v4817_v26  ;;  %v661_v17 = vpop.permute.xlu0 %660 }
 0x28a   :  { %v5129_v30 = vpop.permute.xlu1 %654 }
 0x28b   :  { %7495 = vst [vmem:[#allocation128_spill] sm:$0xff] %v5129_v30  ;;  %v7244_v30 = vmov 0  }
 0x28c   :  { %3939 = vset.pattern.permute.xlu2 %v4854_v62 }
 0x28d   :  { %884 = vperm.xlu1 %3940, %v5013_v8  }
 0x291   :  { %842 = vperm.xlu0 %4009, %v5013_v8   ;;  %v5125_v21 = vpop.permute.xlu0 %1145 }
 0x292   :  { %7494 = vst [vmem:[#allocation127_spill] sm:$0xff] %v5125_v21  ;;  %v5136_v48 = vpop.permute.xlu1 %672  ;;  %v5140_v21 = vadd.f32 %v613_v28, %v4593_v2 }
 0x293   :  { %7497 = vst [vmem:[#allocation130_spill] sm:$0xff] %v5136_v48  ;;  %v5151_v48 = vadd.f32 %v643_v56, %v4614_v59 }
 0x294   :  { %878 = vperm.xlu2 %3939, %v5013_v8   ;;  %7498 = vst [vmem:[#allocation131_spill] sm:$0xff] %v5140_v21 }
 0x295   :  { %3942 = vset.pattern.permute.xlu1 %v4829_v20  ;;  %7500 = vst [vmem:[#allocation133_spill] sm:$0xff] %v5151_v48 }
 0x299   :  { %1327 = vperm.xlu0 %4009, %v5086_v41   ;;  %v5132_v43 = vpop.permute.xlu0 %690 }
 0x29a   :  { %7496 = vst [vmem:[#allocation129_spill] sm:$0xff] %v5132_v43  ;;  %v5147_v43 = vpop.permute.xlu1 %684 }
 0x29c   :  { %3941 = vset.pattern.permute.xlu2 %v4883_v52 }
 0x29d   :  { %896 = vperm.xlu1 %3942, %v5013_v8  }
 0x2a1   :  { %4014 = vset.pattern.permute.xlu0 %v4862_v34  ;;  %v5142_v50 = vpop.permute.xlu0 %1175 }
 0x2a2   :  { %7499 = vst [vmem:[#allocation132_spill] sm:$0xff] %v5142_v50  ;;  %v5159_v28 = vpop.permute.xlu1 %702 }
 0x2a4   :  { %890 = vperm.xlu2 %3941, %v5013_v8  }
 0x2a5   :  { %3945 = vset.pattern.permute.xlu1 %v4730_v42 }
 0x2a9   :  { %872 = vperm.xlu0 %4014, %v5013_v8   ;;  %v697_v8 = vpop.permute.xlu2 %696  ;;  %v5156_v2 = vpop.permute.xlu0 %721 }
 0x2aa   :  { %7501 = vst [vmem:[#allocation134_spill] sm:$0xff] %v5156_v2  ;;  %v716_v59 = vpop.permute.xlu1 %715 }
 0x2ac   :  { %3944 = vset.pattern.permute.xlu2 %v4896_v13 }
 0x2ad   :  { %915 = vperm.xlu1 %3945, %v4769_v37  }
 0x2b1   :  { %1357 = vperm.xlu0 %4014, %v5086_v41   ;;  %v5153_v41 = vpop.permute.xlu2 %709  ;;  %v5169_v56 = vpop.permute.xlu0 %1206 }
 0x2b4   :  { %909 = vperm.xlu2 %3944, %v4769_v37  }
 0x2b5   :  { %3947 = vset.pattern.permute.xlu1 %v4796_v3 }
 0x2b9   :  { %4023 = vset.pattern.permute.xlu0 %v7244_v30  ;;  %v5162_v30 = vpop.permute.xlu2 %727 }
 0x2ba   :  { %1769 = vperm.xlu0 %4023, %v5140_v21   ;;  %v5165_v21 = vadd.f32 %v661_v17, %v4626_v9  ;;  %v734_v9 = vpop.permute.xlu1 %733  ;;  %v752_v17 = vpop.permute.xlu0 %751 }
 0x2bc   :  { %3946 = vset.pattern.permute.xlu2 %v4772_v60  ;;  %7502 = vst [vmem:[#allocation135_spill] sm:$0xff] %v5165_v21 }
 0x2bd   :  { %927 = vperm.xlu1 %3947, %v4769_v37  }
 0x2c1   :  { %v5175_v50 = vpop.permute.xlu2 %739 }
 0x2c2   :  { %1784 = vperm.xlu0 %4023, %v5151_v48   ;;  %v5173_v48 = vadd.f32 %v679_v40, %v4635_v19  ;;  %7504 = vst [vmem:[#allocation137_spill] sm:$0xff] %v5175_v50  ;;  %v5187_v19 = vpop.permute.xlu1 %745  ;;  %v5190_v40 = vpop.permute.xlu0 %1236 }
 0x2c3   :  { %7506 = vst [vmem:[#allocation139_spill] sm:$0xff] %v5190_v40 }
 0x2c4   :  { %921 = vperm.xlu2 %3946, %v4769_v37   ;;  %7503 = vst [vmem:[#allocation136_spill] sm:$0xff] %v5173_v48 }
 0x2c5   :  { %3950 = vset.pattern.permute.xlu1 %v4810_v33 }
 0x2c9   :  { %v5183_v2 = vpop.permute.xlu2 %757 }
 0x2ca   :  { %1793 = vperm.xlu0 %4023, %v5165_v21   ;;  %v5181_v21 = vadd.f32 %v697_v8, %v4644_v32  ;;  %v5197_v32 = vpop.permute.xlu1 %763 }
 0x2cb   :  { %v5200_v8 = vpop.permute.xlu0 %781 }
 0x2cc   :  { %3949 = vset.pattern.permute.xlu2 %v4817_v26  ;;  %7505 = vst [vmem:[#allocation138_spill] sm:$0xff] %v5181_v21 }
 0x2cd   :  { %945 = vperm.xlu1 %3950, %v4769_v37   ;;  %7508 = vst [vmem:[#allocation141_spill] sm:$0xff] %v5200_v8 }
 0x2d1   :  { %v770_v50 = vpop.permute.xlu2 %769 }
 0x2d2   :  { %1802 = vperm.xlu0 %4023, %v5173_v48   ;;  %v5193_v48 = vadd.f32 %v716_v59, %v4656_v45  ;;  %v5207_v45 = vpop.permute.xlu1 %775 }
 0x2d3   :  { %v5210_v59 = vpop.permute.xlu0 %1266 }
 0x2d4   :  { %939 = vperm.xlu2 %3949, %v4769_v37   ;;  %7507 = vst [vmem:[#allocation140_spill] sm:$0xff] %v5193_v48 }
 0x2d5   :  { %3952 = vset.pattern.permute.xlu1 %v4841_v1  ;;  %7510 = vst [vmem:[#allocation143_spill] sm:$0xff] %v5210_v59 }
 0x2d9   :  { %v788_v40 = vpop.permute.xlu2 %787 }
 0x2da   :  { %1811 = vperm.xlu0 %4023, %v5181_v21   ;;  %v5203_v21 = vadd.f32 %v734_v9, %v4668_v61  ;;  %v5219_v61 = vpop.permute.xlu1 %793  ;;  %v5223_v9 = vadd.f32 %v770_v50, %v4686_v29 }
 0x2dc   :  { %3951 = vset.pattern.permute.xlu2 %v4934_v7  ;;  %7509 = vst [vmem:[#allocation142_spill] sm:$0xff] %v5203_v21 }
 0x2dd   :  { %957 = vperm.xlu1 %3952, %v4769_v37   ;;  %7512 = vst [vmem:[#allocation145_spill] sm:$0xff] %v5223_v9 }
 0x2e1   :  { %v5216_v8 = vpop.permute.xlu2 %799 }
 0x2e2   :  { %1820 = vperm.xlu0 %4023, %v5193_v48   ;;  %v5213_v48 = vadd.f32 %v752_v17, %v4677_v12  ;;  %v807_v12 = vpop.permute.xlu1 %806  ;;  %v5233_v17 = vadd.f32 %v788_v40, %v4698_v46 }
 0x2e4   :  { %951 = vperm.xlu2 %3951, %v4769_v37   ;;  %7511 = vst [vmem:[#allocation144_spill] sm:$0xff] %v5213_v48 }
 0x2e5   :  { %3955 = vset.pattern.permute.xlu1 %v4854_v62  ;;  %7514 = vst [vmem:[#allocation147_spill] sm:$0xff] %v5233_v17 }
 0x2e9   :  { %v5228_v59 = vpop.permute.xlu2 %818 }
 0x2ea   :  { %1829 = vperm.xlu0 %4023, %v5203_v21   ;;  %v5225_v21 = vpop.permute.xlu0 %618  ;;  %7513 = vst [vmem:[#allocation146_spill] sm:$0xff] %v5228_v59  ;;  %v825_v29 = vpop.permute.xlu1 %824 }
 0x2ec   :  { %3954 = vset.pattern.permute.xlu2 %v4862_v34 }
 0x2ed   :  { %975 = vperm.xlu1 %3955, %v4769_v37  }
 0x2f1   :  { %v5238_v50 = vpop.permute.xlu2 %830 }
 0x2f2   :  { %1838 = vperm.xlu0 %4023, %v5213_v48   ;;  %v5236_v48 = vpop.permute.xlu0 %812  ;;  %v5249_v46 = vpop.permute.xlu1 %836 }
 0x2f4   :  { %969 = vperm.xlu2 %3954, %v4769_v37  }
 0x2f5   :  { %3957 = vset.pattern.permute.xlu1 %v4883_v52 }
 0x2f9   :  { %v5246_v59 = vpop.permute.xlu2 %848 }
 0x2fa   :  { %1847 = vperm.xlu0 %4023, %v5223_v9   ;;  %v5243_v9 = vadd.f32 %v807_v12, %v4710_v4  ;;  %7516 = vst [vmem:[#allocation149_spill] sm:$0xff] %v5246_v59  ;;  %v5251_v40 = vpop.permute.xlu0 %1297  ;;  %v5259_v4 = vpop.permute.xlu1 %854 }
 0x2fc   :  { %3956 = vset.pattern.permute.xlu2 %v4958_v47  ;;  %7515 = vst [vmem:[#allocation148_spill] sm:$0xff] %v5243_v9 }
 0x2fd   :  { %987 = vperm.xlu1 %3957, %v4769_v37  }
 0x302   :  { %1856 = vperm.xlu0 %4023, %v5233_v17   ;;  %v861_v17 = vpop.permute.xlu2 %860 }
 0x303   :  { %v843_v12 = vpop.permute.xlu0 %842 }
 0x304   :  { %981 = vperm.xlu2 %3956, %v4769_v37   ;;  %v5255_v37 = vadd.f32 %v825_v29, %v4724_v31  ;;  %v5267_v31 = vpop.permute.xlu1 %866  ;;  %v5271_v29 = vadd.f32 %v861_v17, %v4746_v16 }
 0x305   :  { %3960 = vset.pattern.permute.xlu1 %v4896_v13 }
 0x306   :  { %7517 = vst [vmem:[#allocation150_spill] sm:$0xff] %v5255_v37 }
 0x307   :  { %7519 = vst [vmem:[#allocation152_spill] sm:$0xff] %v5271_v29 }
 0x30a   :  { %1865 = vperm.xlu0 %4023, %v5243_v9   ;;  %v5263_v9 = vadd.f32 %v843_v12, %v4736_v54  ;;  %v879_v59 = vpop.permute.xlu2 %878 }
 0x30b   :  { %v5281_v12 = vadd.f32 %v879_v59, %v4754_v36 }
 0x30c   :  { %3959 = vset.pattern.permute.xlu2 %v4716_v22  ;;  %7518 = vst [vmem:[#allocation151_spill] sm:$0xff] %v5263_v9  ;;  %v5277_v54 = vpop.permute.xlu1 %884 }
 0x30d   :  { %1006 = vperm.xlu1 %3960, %v4859_v10   ;;  %7520 = vst [vmem:[#allocation153_spill] sm:$0xff] %v5281_v12 }
 0x312   :  { %1874 = vperm.xlu0 %4023, %v5255_v37   ;;  %v5275_v37 = vpop.permute.xlu2 %890 }
 0x314   :  { %1000 = vperm.xlu2 %3959, %v4859_v10   ;;  %v897_v16 = vpop.permute.xlu1 %896 }
 0x315   :  { %3962 = vset.pattern.permute.xlu1 %v4772_v60  ;;  %v5289_v17 = vadd.f32 %v897_v16, %v4765_v55  ;;  %v5306_v55 = vadd.f32 %v5056_v11, %v4793_v14 }
 0x317   :  { %7521 = vst [vmem:[#allocation154_spill] sm:$0xff] %v5289_v17 }
 0x318   :  { %7523 = vst [vmem:[#allocation156_spill] sm:$0xff] %v5306_v55 }
 0x31a   :  { %1883 = vperm.xlu0 %4023, %v5263_v9   ;;  %v5285_v9 = vpop.permute.xlu2 %909 }
 0x31c   :  { %3961 = vset.pattern.permute.xlu2 %v4730_v42 }
 0x31d   :  { %1018 = vperm.xlu1 %3962, %v4859_v10  }
 0x31f   :  { %v916_v36 = vpop.permute.xlu1 %915 }
 0x320   :  { %v5297_v59 = vadd.f32 %v916_v36, %v4784_v5 }
 0x322   :  { %1892 = vperm.xlu0 %4023, %v5271_v29   ;;  %v5293_v29 = vpop.permute.xlu2 %921  ;;  %7522 = vst [vmem:[#allocation155_spill] sm:$0xff] %v5297_v59 }
 0x324   :  { %1012 = vperm.xlu2 %3961, %v4859_v10  }
 0x325   :  { %3965 = vset.pattern.permute.xlu1 %v4817_v26 }
 0x32a   :  { %1901 = vperm.xlu0 %4023, %v5281_v12  }
 0x32c   :  { %3964 = vset.pattern.permute.xlu2 %v4782_v39 }
 0x32d   :  { %1036 = vperm.xlu1 %3965, %v4859_v10  }
 0x32e   :  { %v5301_v12 = vpop.permute.xlu2 %939 }
 0x332   :  { %1910 = vperm.xlu0 %4023, %v5289_v17  }
 0x334   :  { %1030 = vperm.xlu2 %3964, %v4859_v10  }
 0x335   :  { %3967 = vset.pattern.permute.xlu1 %v4934_v7 }
 0x33a   :  { %1919 = vperm.xlu0 %4023, %v5297_v59   ;;  %v5317_v59 = vpop.permute.xlu1 %927 }
 0x33c   :  { %3966 = vset.pattern.permute.xlu2 %v4810_v33 }
 0x33d   :  { %1048 = vperm.xlu1 %3967, %v4859_v10  }
 0x33e   :  { %v952_v16 = vpop.permute.xlu2 %951 }
 0x33f   :  { %v5312_v5 = vadd.f32 %v952_v16, %v4812_v0 }
 0x341   :  { %7524 = vst [vmem:[#allocation157_spill] sm:$0xff] %v5312_v5 }
 0x342   :  { %1928 = vperm.xlu0 %4023, %v5306_v55   ;;  %v5325_v14 = vpop.permute.xlu1 %945 }
 0x344   :  { %1042 = vperm.xlu2 %3966, %v4859_v10  }
 0x345   :  { %3970 = vset.pattern.permute.xlu1 %v4862_v34 }
 0x34a   :  { %1937 = vperm.xlu0 %4023, %v5312_v5  }
 0x34c   :  { %3969 = vset.pattern.permute.xlu2 %v4802_v53 }
 0x34d   :  { %1066 = vperm.xlu1 %3970, %v4859_v10  }
 0x34e   :  { %v970_v36 = vpop.permute.xlu2 %969 }
 0x34f   :  { %v5320_v11 = vadd.f32 %v970_v36, %v4824_v15  ;;  %v5329_v0 = vpop.permute.xlu1 %957 }
 0x351   :  { %7525 = vst [vmem:[#allocation158_spill] sm:$0xff] %v5320_v11 }
 0x352   :  { %1946 = vperm.xlu0 %4023, %v5320_v11  }
 0x354   :  { %1060 = vperm.xlu2 %3969, %v4859_v10  }
 0x355   :  { %3972 = vset.pattern.permute.xlu1 %v4958_v47 }
 0x35c   :  { %3971 = vset.pattern.permute.xlu2 %v4854_v62 }
 0x35d   :  { %1078 = vperm.xlu1 %3972, %v4859_v10  }
 0x35e   :  { %v5345_v11 = vpop.permute.xlu2 %981 }
 0x35f   :  { %v5333_v15 = vpop.permute.xlu1 %975 }
 0x364   :  { %1072 = vperm.xlu2 %3971, %v4859_v10  }
 0x365   :  { %3975 = vset.pattern.permute.xlu1 %v4716_v22 }
 0x36c   :  { %3974 = vset.pattern.permute.xlu2 %v4829_v20 }
 0x36d   :  { %1097 = vperm.xlu1 %3975, %v4922_v18  }
 0x36f   :  { %v988_v16 = vpop.permute.xlu1 %987 }
 0x370   :  { %v5338_v36 = vadd.f32 %v988_v16, %v4838_v35  ;;  %v5353_v35 = vpop.permute.xlu2 %1000 }
 0x372   :  { %7526 = vst [vmem:[#allocation159_spill] sm:$0xff] %v5338_v36  ;;  %1955 = vperm.xlu0 %4023, %v5338_v36  }
 0x374   :  { %1090 = vperm.xlu2 %3974, %v4859_v10   ;;  %v5357_v10 = vadd.f32 %v5082_v6, %v4869_v57 }
 0x375   :  { %3977 = vset.pattern.permute.xlu1 %v4730_v42 }
 0x376   :  { %7528 = vst [vmem:[#allocation161_spill] sm:$0xff] %v5357_v10 }
 0x37c   :  { %3976 = vset.pattern.permute.xlu2 %v4896_v13 }
 0x37d   :  { %1109 = vperm.xlu1 %3977, %v4922_v18  }
 0x37f   :  { %v1007_v5 = vpop.permute.xlu1 %1006 }
 0x380   :  { %v5348_v55 = vadd.f32 %v1007_v5, %v4850_v49  ;;  %v5362_v49 = vpop.permute.xlu2 %1012 }
 0x382   :  { %7527 = vst [vmem:[#allocation160_spill] sm:$0xff] %v5348_v55  ;;  %1964 = vperm.xlu0 %4023, %v5348_v55  }
 0x384   :  { %1103 = vperm.xlu2 %3976, %v4922_v18  }
 0x385   :  { %3981 = vset.pattern.permute.xlu1 %v4782_v39 }
 0x38a   :  { %1973 = vperm.xlu0 %4023, %v5357_v10  }
 0x38c   :  { %3980 = vset.pattern.permute.xlu2 %v4796_v3 }
 0x38d   :  { %1127 = vperm.xlu1 %3981, %v4922_v18  }
 0x38e   :  { %v5366_v5 = vpop.permute.xlu2 %1030 }
 0x38f   :  { %v5378_v10 = vpop.permute.xlu1 %1018 }
 0x394   :  { %1121 = vperm.xlu2 %3980, %v4922_v18  }
 0x395   :  { %3983 = vset.pattern.permute.xlu1 %v4810_v33 }
 0x39c   :  { %3982 = vset.pattern.permute.xlu2 %v4817_v26 }
 0x39d   :  { %1139 = vperm.xlu1 %3983, %v4922_v18  }
 0x39e   :  { %v1043_v6 = vpop.permute.xlu2 %1042 }
 0x39f   :  { %v5371_v57 = vadd.f32 %v1043_v6, %v4878_v51  ;;  %v5386_v51 = vpop.permute.xlu1 %1036 }
 0x3a1   :  { %7529 = vst [vmem:[#allocation162_spill] sm:$0xff] %v5371_v57  ;;  %1982 = vperm.xlu0 %4023, %v5371_v57  }
 0x3a4   :  { %1133 = vperm.xlu2 %3982, %v4922_v18  }
 0x3a5   :  { %3986 = vset.pattern.permute.xlu1 %v4802_v53 }
 0x3ac   :  { %3985 = vset.pattern.permute.xlu2 %v4841_v1 }
 0x3ad   :  { %1157 = vperm.xlu1 %3986, %v4922_v18  }
 0x3ae   :  { %v1061_v16 = vpop.permute.xlu2 %1060 }
 0x3af   :  { %v5381_v55 = vadd.f32 %v1061_v16, %v4892_v44  ;;  %v5390_v6 = vpop.permute.xlu1 %1048 }
 0x3b1   :  { %7530 = vst [vmem:[#allocation163_spill] sm:$0xff] %v5381_v55  ;;  %1991 = vperm.xlu0 %4023, %v5381_v55  }
 0x3b4   :  { %1151 = vperm.xlu2 %3985, %v4922_v18  }
 0x3b5   :  { %3988 = vset.pattern.permute.xlu1 %v4854_v62 }
 0x3bc   :  { %3987 = vset.pattern.permute.xlu2 %v4862_v34 }
 0x3bd   :  { %1169 = vperm.xlu1 %3988, %v4922_v18  }
 0x3be   :  { %v5406_v57 = vpop.permute.xlu2 %1072 }
 0x3bf   :  { %v5394_v44 = vpop.permute.xlu1 %1066 }
 0x3c4   :  { %1163 = vperm.xlu2 %3987, %v4922_v18  }
 0x3c5   :  { %3991 = vset.pattern.permute.xlu1 %v4829_v20 }
 0x3cc   :  { %3990 = vset.pattern.permute.xlu2 %v4883_v52 }
 0x3cd   :  { %1187 = vperm.xlu1 %3991, %v4922_v18  }
 0x3cf   :  { %v1079_v16 = vpop.permute.xlu1 %1078 }
 0x3d0   :  { %v5399_v55 = vadd.f32 %v1079_v16, %v4904_v24  ;;  %v5414_v24 = vpop.permute.xlu2 %1090 }
 0x3d2   :  { %7531 = vst [vmem:[#allocation164_spill] sm:$0xff] %v5399_v55  ;;  %2000 = vperm.xlu0 %4023, %v5399_v55   ;;  %v7540_v55 = vld [vmem:[#allocation86_spill] sm:$0xff] }
 0x3d4   :  { %1181 = vperm.xlu2 %3990, %v4922_v18   ;;  %v5418_v18 = vadd.f32 %v5111_v27, %v4929_v63 }
 0x3d5   :  { %3993 = vset.pattern.permute.xlu1 %v4896_v13 }
 0x3d6   :  { %7533 = vst [vmem:[#allocation166_spill] sm:$0xff] %v5418_v18 }
 0x3dc   :  { %3992 = vset.pattern.permute.xlu2 %v4716_v22 }
 0x3dd   :  { %1200 = vperm.xlu1 %3993, %v5000_v23  }
 0x3df   :  { %v1098_v36 = vpop.permute.xlu1 %1097 }
 0x3e0   :  { %v5409_v17 = vadd.f32 %v1098_v36, %v4917_v25  ;;  %v5423_v25 = vpop.permute.xlu2 %1103 }
 0x3e2   :  { %7532 = vst [vmem:[#allocation165_spill] sm:$0xff] %v5409_v17  ;;  %2009 = vperm.xlu0 %4023, %v5409_v17  }
 0x3e4   :  { %1194 = vperm.xlu2 %3992, %v5000_v23  }
 0x3e5   :  { %3996 = vset.pattern.permute.xlu1 %v4796_v3 }
 0x3ea   :  { %2018 = vperm.xlu0 %4023, %v5418_v18  }
 0x3ec   :  { %3995 = vset.pattern.permute.xlu2 %v4772_v60 }
 0x3ed   :  { %1218 = vperm.xlu1 %3996, %v5000_v23  }
 0x3ee   :  { %v5427_v13 = vpop.permute.xlu2 %1121 }
 0x3ef   :  { %v5439_v36 = vpop.permute.xlu1 %1109 }
 0x3f4   :  { %1212 = vperm.xlu2 %3995, %v5000_v23  }
 0x3f5   :  { %3998 = vset.pattern.permute.xlu1 %v4817_v26 }
 0x3fc   :  { %3997 = vset.pattern.permute.xlu2 %v4782_v39 }
 0x3fd   :  { %1230 = vperm.xlu1 %3998, %v5000_v23  }
 0x3fe   :  { %v1134_v27 = vpop.permute.xlu2 %1133 }
 0x3ff   :  { %v5432_v63 = vadd.f32 %v1134_v27, %v4943_v58  ;;  %v5447_v58 = vpop.permute.xlu1 %1127 }
 0x401   :  { %7534 = vst [vmem:[#allocation167_spill] sm:$0xff] %v5432_v63  ;;  %2027 = vperm.xlu0 %4023, %v5432_v63   ;;  %v7539_v63 = vld [vmem:[#allocation116_spill] sm:$0xff] }
 0x404   :  { %1224 = vperm.xlu2 %3997, %v5000_v23  }
 0x405   :  { %4001 = vset.pattern.permute.xlu1 %v4841_v1 }
 0x40c   :  { %4000 = vset.pattern.permute.xlu2 %v4934_v7 }
 0x40d   :  { %1248 = vperm.xlu1 %4001, %v5000_v23  }
 0x40e   :  { %v1152_v26 = vpop.permute.xlu2 %1151 }
 0x40f   :  { %v5442_v16 = vadd.f32 %v1152_v26, %v4952_v38  ;;  %v5451_v27 = vpop.permute.xlu1 %1139 }
 0x411   :  { %7535 = vst [vmem:[#allocation168_spill] sm:$0xff] %v5442_v16  ;;  %2036 = vperm.xlu0 %4023, %v5442_v16  }
 0x414   :  { %1242 = vperm.xlu2 %4000, %v5000_v23  }
 0x415   :  { %4003 = vset.pattern.permute.xlu1 %v4862_v34  ;;  %v7537_v34 = vld [vmem:[#allocation83_spill] sm:$0xff] }
 0x41c   :  { %4002 = vset.pattern.permute.xlu2 %v4802_v53 }
 0x41d   :  { %1260 = vperm.xlu1 %4003, %v5000_v23  }
 0x41e   :  { %v5467_v18 = vpop.permute.xlu2 %1163 }
 0x41f   :  { %v5455_v38 = vpop.permute.xlu1 %1157 }
 0x420   :  { %7536 = vst [vmem:[#allocation169_spill] sm:$0xff] %v5455_v38 }
 0x424   :  { %1254 = vperm.xlu2 %4002, %v5000_v23  }
 0x425   :  { %4006 = vset.pattern.permute.xlu1 %v4883_v52 }
 0x42c   :  { %4005 = vset.pattern.permute.xlu2 %v4958_v47 }
 0x42d   :  { %1278 = vperm.xlu1 %4006, %v5000_v23  }
 0x42f   :  { %v1170_v26 = vpop.permute.xlu1 %1169 }
 0x430   :  { %v5460_v16 = vadd.f32 %v1170_v26, %v7537_v34  ;;  %v5475_v26 = vpop.permute.xlu2 %1181  ;;  %v7542_v34 = vld [vmem:[#allocation89_spill] sm:$0xff] }
 0x432   :  { %7538 = vst [vmem:[#allocation83_spill] sm:$0xff] %v5460_v16  ;;  %2045 = vperm.xlu0 %4023, %v5460_v16   ;;  %v5577_v16 = vpop.permute.xlu0 %1327 }
 0x434   :  { %1272 = vperm.xlu2 %4005, %v5000_v23  }
 0x435   :  { %4008 = vset.pattern.permute.xlu1 %v4716_v22  ;;  %v5479_v22 = vadd.f32 %v5169_v56, %v7542_v34  ;;  %v7544_v56 = vld [vmem:[#allocation92_spill] sm:$0xff] }
 0x437   :  { %7543 = vst [vmem:[#allocation86_spill] sm:$0xff] %v5479_v22 }
 0x43c   :  { %4007 = vset.pattern.permute.xlu2 %v4829_v20 }
 0x43d   :  { %1291 = vperm.xlu1 %4008, %v7539_v63  }
 0x43f   :  { %v1188_v17 = vpop.permute.xlu1 %1187 }
 0x440   :  { %v5470_v38 = vadd.f32 %v1188_v17, %v7540_v55  ;;  %v5484_v17 = vpop.permute.xlu2 %1194 }
 0x442   :  { %7541 = vst [vmem:[#allocation116_spill] sm:$0xff] %v5470_v38  ;;  %2054 = vperm.xlu0 %4023, %v5470_v38   ;;  %v7567_v38 = vld [vmem:[#allocation128_spill] sm:$0xff] }
 0x444   :  { %1284 = vperm.xlu2 %4007, %v5000_v23  }
 0x445   :  { %4011 = vset.pattern.permute.xlu1 %v4772_v60 }
 0x44a   :  { %2063 = vperm.xlu0 %4023, %v5479_v22  }
 0x44c   :  { %4010 = vset.pattern.permute.xlu2 %v4730_v42 }
 0x44d   :  { %1309 = vperm.xlu1 %4011, %v7539_v63  }
 0x44e   :  { %v5488_v23 = vpop.permute.xlu2 %1212 }
 0x454   :  { %1303 = vperm.xlu2 %4010, %v7539_v63  }
 0x455   :  { %4013 = vset.pattern.permute.xlu1 %v4782_v39  ;;  %v5500_v39 = vpop.permute.xlu1 %1200 }
 0x45c   :  { %4012 = vset.pattern.permute.xlu2 %v4796_v3  ;;  %v7546_v3 = vld [vmem:[#allocation95_spill] sm:$0xff] }
 0x45d   :  { %1321 = vperm.xlu1 %4013, %v7539_v63  }
 0x45e   :  { %v1225_v60 = vpop.permute.xlu2 %1224 }
 0x45f   :  { %v5493_v55 = vadd.f32 %v1225_v60, %v7544_v56  ;;  %v5508_v60 = vpop.permute.xlu1 %1218 }
 0x461   :  { %7545 = vst [vmem:[#allocation89_spill] sm:$0xff] %v5493_v55  ;;  %2072 = vperm.xlu0 %4023, %v5493_v55  }
 0x464   :  { %1315 = vperm.xlu2 %4012, %v7539_v63  }
 0x465   :  { %4016 = vset.pattern.permute.xlu1 %v4934_v7 }
 0x46c   :  { %4015 = vset.pattern.permute.xlu2 %v4810_v33 }
 0x46d   :  { %1339 = vperm.xlu1 %4016, %v7539_v63  }
 0x46e   :  { %v1243_v42 = vpop.permute.xlu2 %1242 }
 0x46f   :  { %v5503_v34 = vadd.f32 %v1243_v42, %v7546_v3  ;;  %v5512_v7 = vpop.permute.xlu1 %1230 }
 0x471   :  { %7547 = vst [vmem:[#allocation92_spill] sm:$0xff] %v5503_v34  ;;  %2081 = vperm.xlu0 %4023, %v5503_v34  }
 0x474   :  { %1333 = vperm.xlu2 %4015, %v7539_v63  }
 0x475   :  { %4018 = vset.pattern.permute.xlu1 %v4802_v53  ;;  %v7548_v53 = vld [vmem:[#allocation98_spill] sm:$0xff] }
 0x47c   :  { %4017 = vset.pattern.permute.xlu2 %v4841_v1 }
 0x47d   :  { %1351 = vperm.xlu1 %4018, %v7539_v63  }
 0x47f   :  { %v5516_v33 = vpop.permute.xlu1 %1248 }
 0x484   :  { %1345 = vperm.xlu2 %4017, %v7539_v63  }
 0x485   :  { %4020 = vset.pattern.permute.xlu1 %v4958_v47  ;;  %v5528_v47 = vpop.permute.xlu2 %1254 }
 0x48c   :  { %4019 = vset.pattern.permute.xlu2 %v4854_v62  ;;  %v7550_v62 = vld [vmem:[#allocation101_spill] sm:$0xff] }
 0x48d   :  { %1369 = vperm.xlu1 %4020, %v7539_v63  }
 0x48f   :  { %v1261_v56 = vpop.permute.xlu1 %1260 }
 0x490   :  { %v5521_v42 = vadd.f32 %v1261_v56, %v7548_v53  ;;  %v7552_v56 = vld [vmem:[#allocation25_spill] sm:$0xff] }
 0x491   :  { %v7553_v53 = vld [vmem:[#allocation125_spill] sm:$0xff] }
 0x492   :  { %7549 = vst [vmem:[#allocation95_spill] sm:$0xff] %v5521_v42  ;;  %2090 = vperm.xlu0 %4023, %v5521_v42   ;;  %v5536_v34 = vadd.f32 %v7553_v53, %v7552_v56  ;;  %v7555_v42 = vmov 0   ;;  %v7560_v56 = vld [vmem:[#allocation23_spill] sm:$0xff]  ;;  %v7561_v53 = vld [vmem:[#allocation122_spill] sm:$0xff] }
 0x494   :  { %1363 = vperm.xlu2 %4019, %v7539_v63   ;;  %7554 = vst [vmem:[#allocation101_spill] sm:$0xff] %v5536_v34 }
 0x495   :  { %4022 = vset.pattern.permute.xlu1 %v4829_v20  ;;  %v5540_v20 = vpop.permute.xlu2 %1272 }
 0x49c   :  { %4021 = vset.pattern.permute.xlu2 %v4883_v52  ;;  %v7556_v52 = vld [vmem:[#allocation104_spill] sm:$0xff] }
 0x49d   :  { %1381 = vperm.xlu1 %4022, %v7539_v63   ;;  %v5545_v55 = vadd.f32 %v5251_v40, %v7556_v52  ;;  %v7563_v40 = vld [vmem:[#allocation27_spill] sm:$0xff]  ;;  %v7564_v52 = vld [vmem:[#allocation120_spill] sm:$0xff] }
 0x49e   :  { %v5563_v22 = vadd.f32 %v7564_v52, %v7563_v40  ;;  %7572 = vst [vmem:[#allocation27_spill] sm:$0xff] %v5577_v16  ;;  %v7582_v16 = vld [vmem:[#allocation129_spill] sm:$0xff] }
 0x49f   :  { %v1279_v1 = vpop.permute.xlu1 %1278  ;;  %7557 = vst [vmem:[#allocation25_spill] sm:$0xff] %v5545_v55 }
 0x4a0   :  { %v5531_v3 = vadd.f32 %v1279_v1, %v7550_v62  ;;  %v7558_v1 = vld [vmem:[#allocation18_spill] sm:$0xff] }
 0x4a1   :  { %v5550_v62 = vadd.f32 %v5225_v21, %v7558_v1  ;;  %7565 = vst [vmem:[#allocation18_spill] sm:$0xff] %v5563_v22 }
 0x4a2   :  { %7551 = vst [vmem:[#allocation98_spill] sm:$0xff] %v5531_v3  ;;  %2099 = vperm.xlu0 %4023, %v5531_v3   ;;  %v5554_v3 = vadd.f32 %v7561_v53, %v7560_v56  ;;  %v7570_v56 = vld [vmem:[#allocation124_spill] sm:$0xff] }
 0x4a3   :  { %7559 = vst [vmem:[#allocation125_spill] sm:$0xff] %v5550_v62 }
 0x4a4   :  { %1375 = vperm.xlu2 %4021, %v7539_v63   ;;  %7562 = vst [vmem:[#allocation104_spill] sm:$0xff] %v5554_v3  ;;  %v5558_v63 = vpop.permute.xlu2 %1284 }
 0x4a5   :  { %4025 = vset.pattern.permute.xlu1 %v7555_v42 }
 0x4a6   :  { %1775 = vperm.xlu1 %4025, %v5536_v34   ;;  %v7574_v34 = vld [vmem:[#allocation130_spill] sm:$0xff] }
 0x4aa   :  { %2108 = vperm.xlu0 %4023, %v5545_v55   ;;  %v7566_v55 = vld [vmem:[#allocation29_spill] sm:$0xff] }
 0x4ab   :  { %v5567_v21 = vadd.f32 %v7567_v38, %v7566_v55  ;;  %v7576_v55 = vld [vmem:[#allocation107_spill] sm:$0xff] }
 0x4ac   :  { %4024 = vset.pattern.permute.xlu2 %v7555_v42  ;;  %v7569_v42 = vld [vmem:[#allocation19_spill] sm:$0xff] }
 0x4ad   :  { %1772 = vperm.xlu2 %4024, %v5550_v62   ;;  %7568 = vst [vmem:[#allocation23_spill] sm:$0xff] %v5567_v21  ;;  %v5575_v53 = vadd.f32 %v7570_v56, %v7569_v42  ;;  %v5593_v56 = vpop.permute.xlu0 %872  ;;  %v7581_v62 = vld [vmem:[#allocation33_spill] sm:$0xff] }
 0x4ae   :  { %1781 = vperm.xlu1 %4025, %v5554_v3   ;;  %v5570_v1 = vpop.permute.xlu2 %1303  ;;  %v7573_v3 = vld [vmem:[#allocation31_spill] sm:$0xff] }
 0x4af   :  { %7571 = vst [vmem:[#allocation122_spill] sm:$0xff] %v5575_v53  ;;  %v5581_v40 = vadd.f32 %v7574_v34, %v7573_v3  ;;  %v5597_v34 = vadd.f32 %v7582_v16, %v7581_v62  ;;  %v7584_v3 = vld [vmem:[#allocation21_spill] sm:$0xff]  ;;  %v5613_v16 = vpop.permute.xlu1 %1291 }
 0x4b0   :  { %v7588_v62 = vld [vmem:[#allocation109_spill] sm:$0xff] }
 0x4b1   :  { %7575 = vst [vmem:[#allocation120_spill] sm:$0xff] %v5581_v40 }
 0x4b2   :  { %7583 = vst [vmem:[#allocation19_spill] sm:$0xff] %v5597_v34 }
 0x4b5   :  { %1778 = vperm.xlu2 %4024, %v5563_v22   ;;  %v7579_v22 = vld [vmem:[#allocation126_spill] sm:$0xff] }
 0x4b6   :  { %1790 = vperm.xlu1 %4025, %v5567_v21   ;;  %v7578_v21 = vld [vmem:[#allocation20_spill] sm:$0xff] }
 0x4b7   :  { %v5591_v42 = vadd.f32 %v7579_v22, %v7578_v21  ;;  %v5609_v22 = vpop.permute.xlu0 %1357 }
 0x4b9   :  { %7580 = vst [vmem:[#allocation128_spill] sm:$0xff] %v5591_v42 }
 0x4bd   :  { %1787 = vperm.xlu2 %4024, %v5575_v53  }
 0x4be   :  { %v1316_v38 = vpop.permute.xlu2 %1315  ;;  %1799 = vperm.xlu1 %4025, %v5581_v40   ;;  %v7607_v40 = vld [vmem:[#allocation141_spill] sm:$0xff] }
 0x4bf   :  { %v5586_v52 = vadd.f32 %v1316_v38, %v7576_v55  ;;  %v5603_v38 = vadd.f32 %v5147_v43, %v7584_v3  ;;  %v7586_v55 = vld [vmem:[#allocation35_spill] sm:$0xff]  ;;  %v7590_v43 = vld [vmem:[#allocation22_spill] sm:$0xff] }
 0x4c0   :  { %v5621_v3 = vadd.f32 %v5159_v28, %v7590_v43 }
 0x4c1   :  { %7577 = vst [vmem:[#allocation29_spill] sm:$0xff] %v5586_v52  ;;  %2117 = vperm.xlu0 %4023, %v5586_v52   ;;  %v5607_v52 = vadd.f32 %v5153_v41, %v7586_v55  ;;  %v7592_v41 = vld [vmem:[#allocation37_spill] sm:$0xff] }
 0x4c2   :  { %7585 = vst [vmem:[#allocation124_spill] sm:$0xff] %v5603_v38  ;;  %v5625_v55 = vadd.f32 %v5162_v30, %v7592_v41  ;;  %v7599_v41 = vld [vmem:[#allocation26_spill] sm:$0xff] }
 0x4c3   :  { %7587 = vst [vmem:[#allocation31_spill] sm:$0xff] %v5607_v52 }
 0x4c4   :  { %7591 = vst [vmem:[#allocation107_spill] sm:$0xff] %v5621_v3 }
 0x4c5   :  { %1796 = vperm.xlu2 %4024, %v5591_v42   ;;  %7593 = vst [vmem:[#allocation20_spill] sm:$0xff] %v5625_v55 }
 0x4c6   :  { %1808 = vperm.xlu1 %4025, %v5597_v34   ;;  %v5631_v34 = vpop.permute.xlu1 %1309 }
 0x4cd   :  { %1805 = vperm.xlu2 %4024, %v5603_v38  }
 0x4ce   :  { %v1334_v21 = vpop.permute.xlu2 %1333  ;;  %1817 = vperm.xlu1 %4025, %v5607_v52   ;;  %v5629_v52 = vpop.permute.xlu0 %1769 }
 0x4cf   :  { %v5616_v42 = vadd.f32 %v1334_v21, %v7588_v62  ;;  %v7594_v21 = vld [vmem:[#allocation24_spill] sm:$0xff]  ;;  %v7595_v62 = vld [vmem:[#allocation134_spill] sm:$0xff]  ;;  %v5643_v30 = vpop.permute.xlu1 %1321 }
 0x4d0   :  { %v5635_v38 = vadd.f32 %v7595_v62, %v7594_v21 }
 0x4d1   :  { %7589 = vst [vmem:[#allocation130_spill] sm:$0xff] %v5616_v42  ;;  %2126 = vperm.xlu0 %4023, %v5616_v42   ;;  %v7597_v42 = vld [vmem:[#allocation39_spill] sm:$0xff] }
 0x4d2   :  { %7596 = vst [vmem:[#allocation126_spill] sm:$0xff] %v5635_v38  ;;  %v5639_v28 = vadd.f32 %v5187_v19, %v7597_v42  ;;  %v7604_v42 = vld [vmem:[#allocation28_spill] sm:$0xff] }
 0x4d3   :  { %v5661_v62 = vadd.f32 %v5183_v2, %v7604_v42  ;;  %v7611_v2 = vld [vmem:[#allocation30_spill] sm:$0xff] }
 0x4d4   :  { %7598 = vst [vmem:[#allocation33_spill] sm:$0xff] %v5639_v28  ;;  %v5679_v42 = vadd.f32 %v5207_v45, %v7611_v2 }
 0x4d5   :  { %1814 = vperm.xlu2 %4024, %v5621_v3   ;;  %v7602_v3 = vld [vmem:[#allocation41_spill] sm:$0xff]  ;;  %7605 = vst [vmem:[#allocation35_spill] sm:$0xff] %v5661_v62 }
 0x4d6   :  { %1826 = vperm.xlu1 %4025, %v5625_v55   ;;  %v5645_v43 = vpop.permute.xlu0 %1784  ;;  %v7600_v55 = vld [vmem:[#allocation137_spill] sm:$0xff]  ;;  %v5653_v21 = vadd.f32 %v5197_v32, %v7602_v3  ;;  %7612 = vst [vmem:[#allocation37_spill] sm:$0xff] %v5679_v42 }
 0x4d7   :  { %v5649_v53 = vadd.f32 %v7600_v55, %v7599_v41  ;;  %v7609_v41 = vld [vmem:[#allocation112_spill] sm:$0xff] }
 0x4d8   :  { %7603 = vst [vmem:[#allocation21_spill] sm:$0xff] %v5653_v21 }
 0x4d9   :  { %7601 = vst [vmem:[#allocation129_spill] sm:$0xff] %v5649_v53 }
 0x4dd   :  { %1823 = vperm.xlu2 %4024, %v5635_v38   ;;  %v7606_v38 = vld [vmem:[#allocation43_spill] sm:$0xff] }
 0x4de   :  { %1835 = vperm.xlu1 %4025, %v5639_v28   ;;  %v5663_v28 = vpop.permute.xlu0 %1793  ;;  %v5667_v55 = vadd.f32 %v7607_v40, %v7606_v38  ;;  %v5670_v32 = vpop.permute.xlu2 %1345 }
 0x4df   :  { %v5657_v19 = vpop.permute.xlu1 %1339 }
 0x4e0   :  { %7608 = vst [vmem:[#allocation109_spill] sm:$0xff] %v5667_v55 }
 0x4e5   :  { %1832 = vperm.xlu2 %4024, %v5649_v53   ;;  %v7613_v53 = vld [vmem:[#allocation45_spill] sm:$0xff] }
 0x4e6   :  { %1844 = vperm.xlu1 %4025, %v5653_v21   ;;  %v5683_v40 = vadd.f32 %v5216_v8, %v7613_v53  ;;  %v5685_v38 = vpop.permute.xlu0 %1802 }
 0x4e7   :  { %7615 = vst [vmem:[#allocation134_spill] sm:$0xff] %v5685_v38 }
 0x4e8   :  { %7614 = vst [vmem:[#allocation24_spill] sm:$0xff] %v5683_v40 }
 0x4ed   :  { %1841 = vperm.xlu2 %4024, %v5661_v62  }
 0x4ee   :  { %1853 = vperm.xlu1 %4025, %v5667_v55   ;;  %v5688_v62 = vpop.permute.xlu2 %1363  ;;  %v7619_v55 = vld [vmem:[#allocation146_spill] sm:$0xff]  ;;  %v5703_v53 = vpop.permute.xlu0 %1811 }
 0x4ef   :  { %v1352_v3 = vpop.permute.xlu1 %1351  ;;  %7621 = vst [vmem:[#allocation137_spill] sm:$0xff] %v5703_v53 }
 0x4f0   :  { %v5674_v21 = vadd.f32 %v1352_v3, %v7609_v41  ;;  %v7616_v3 = vld [vmem:[#allocation32_spill] sm:$0xff] }
 0x4f1   :  { %v5693_v41 = vadd.f32 %v5219_v61, %v7616_v3  ;;  %v7624_v61 = vld [vmem:[#allocation34_spill] sm:$0xff] }
 0x4f2   :  { %7610 = vst [vmem:[#allocation22_spill] sm:$0xff] %v5674_v21  ;;  %2135 = vperm.xlu0 %4023, %v5674_v21   ;;  %v7618_v21 = vld [vmem:[#allocation47_spill] sm:$0xff]  ;;  %v5711_v3 = vadd.f32 %v5236_v48, %v7624_v61 }
 0x4f3   :  { %7617 = vst [vmem:[#allocation39_spill] sm:$0xff] %v5693_v41  ;;  %v5697_v45 = vadd.f32 %v7619_v55, %v7618_v21  ;;  %v7626_v21 = vld [vmem:[#allocation49_spill] sm:$0xff] }
 0x4f4   :  { %7625 = vst [vmem:[#allocation28_spill] sm:$0xff] %v5711_v3  ;;  %v5715_v55 = vadd.f32 %v5249_v46, %v7626_v21  ;;  %v7632_v21 = vld [vmem:[#allocation38_spill] sm:$0xff] }
 0x4f5   :  { %1850 = vperm.xlu2 %4024, %v5679_v42   ;;  %7620 = vst [vmem:[#allocation26_spill] sm:$0xff] %v5697_v45  ;;  %v7622_v42 = vld [vmem:[#allocation115_spill] sm:$0xff] }
 0x4f6   :  { %1862 = vperm.xlu1 %4025, %v5683_v40   ;;  %7627 = vst [vmem:[#allocation43_spill] sm:$0xff] %v5715_v55  ;;  %v5721_v40 = vpop.permute.xlu0 %1820 }
 0x4fd   :  { %1859 = vperm.xlu2 %4024, %v5693_v41  }
 0x4fe   :  { %v5700_v8 = vpop.permute.xlu2 %1375  ;;  %1871 = vperm.xlu1 %4025, %v5697_v45   ;;  %v5741_v41 = vpop.permute.xlu0 %1829 }
 0x4ff   :  { %v1370_v2 = vpop.permute.xlu1 %1369  ;;  %7635 = vst [vmem:[#allocation45_spill] sm:$0xff] %v5741_v41 }
 0x500   :  { %v5706_v38 = vadd.f32 %v1370_v2, %v7622_v42  ;;  %v7628_v42 = vld [vmem:[#allocation36_spill] sm:$0xff] }
 0x501   :  { %v5725_v2 = vadd.f32 %v5238_v50, %v7628_v42  ;;  %v7636_v50 = vld [vmem:[#allocation53_spill] sm:$0xff] }
 0x502   :  { %7623 = vst [vmem:[#allocation41_spill] sm:$0xff] %v5706_v38  ;;  %2144 = vperm.xlu0 %4023, %v5706_v38   ;;  %v7630_v38 = vld [vmem:[#allocation51_spill] sm:$0xff]  ;;  %v5745_v42 = vadd.f32 %v5593_v56, %v7636_v50 }
 0x503   :  { %7629 = vst [vmem:[#allocation141_spill] sm:$0xff] %v5725_v2  ;;  %v5729_v48 = vadd.f32 %v5259_v4, %v7630_v38 }
 0x504   :  { %7637 = vst [vmem:[#allocation32_spill] sm:$0xff] %v5745_v42 }
 0x505   :  { %1868 = vperm.xlu2 %4024, %v5711_v3   ;;  %7631 = vst [vmem:[#allocation112_spill] sm:$0xff] %v5729_v48 }
 0x506   :  { %1880 = vperm.xlu1 %4025, %v5715_v55   ;;  %v7633_v55 = vld [vmem:[#allocation149_spill] sm:$0xff]  ;;  %v5761_v41 = vpop.permute.xlu0 %1838 }
 0x507   :  { %v5719_v45 = vpop.permute.xlu2 %1772  ;;  %v5739_v3 = vadd.f32 %v7633_v55, %v7632_v21  ;;  %v7640_v55 = vld [vmem:[#allocation55_spill] sm:$0xff]  ;;  %7642 = vst [vmem:[#allocation115_spill] sm:$0xff] %v5761_v41 }
 0x508   :  { %v5759_v21 = vadd.f32 %v5275_v37, %v7640_v55 }
 0x509   :  { %7634 = vst [vmem:[#allocation30_spill] sm:$0xff] %v5739_v3 }
 0x50a   :  { %7641 = vst [vmem:[#allocation146_spill] sm:$0xff] %v5759_v21 }
 0x50d   :  { %1877 = vperm.xlu2 %4024, %v5725_v2  }
 0x50e   :  { %1889 = vperm.xlu1 %4025, %v5729_v48   ;;  %v7638_v48 = vld [vmem:[#allocation40_spill] sm:$0xff]  ;;  %v5779_v37 = vpop.permute.xlu0 %1847 }
 0x50f   :  { %v5733_v46 = vpop.permute.xlu2 %1778  ;;  %v5735_v61 = vpop.permute.xlu1 %1381  ;;  %v5755_v2 = vadd.f32 %v5267_v31, %v7638_v48  ;;  %v7646_v31 = vld [vmem:[#allocation57_spill] sm:$0xff] }
 0x510   :  { %v5775_v48 = vadd.f32 %v5285_v9, %v7646_v31 }
 0x511   :  { %7639 = vst [vmem:[#allocation47_spill] sm:$0xff] %v5755_v2 }
 0x512   :  { %7647 = vst [vmem:[#allocation36_spill] sm:$0xff] %v5775_v48 }
 0x515   :  { %1886 = vperm.xlu2 %4024, %v5739_v3  }
 0x516   :  { %1898 = vperm.xlu1 %4025, %v5745_v42   ;;  %v7644_v42 = vld [vmem:[#allocation42_spill] sm:$0xff] }
 0x517   :  { %v5749_v4 = vpop.permute.xlu2 %1787  ;;  %v5771_v3 = vadd.f32 %v5277_v54, %v7644_v42  ;;  %v7652_v54 = vld [vmem:[#allocation59_spill] sm:$0xff] }
 0x518   :  { %v5751_v38 = vpop.permute.xlu1 %1775  ;;  %v5791_v42 = vadd.f32 %v5317_v59, %v7652_v54 }
 0x519   :  { %7645 = vst [vmem:[#allocation49_spill] sm:$0xff] %v5771_v3 }
 0x51a   :  { %7653 = vst [vmem:[#allocation149_spill] sm:$0xff] %v5791_v42 }
 0x51d   :  { %1895 = vperm.xlu2 %4024, %v5755_v2   ;;  %v7649_v2 = vld [vmem:[#allocation44_spill] sm:$0xff] }
 0x51e   :  { %1907 = vperm.xlu1 %4025, %v5759_v21  }
 0x51f   :  { %v5765_v56 = vpop.permute.xlu2 %1796 }
 0x520   :  { %7643 = vst [vmem:[#allocation34_spill] sm:$0xff] %v5765_v56  ;;  %v5767_v50 = vpop.permute.xlu1 %1781  ;;  %v7650_v56 = vld [vmem:[#allocation106_spill] sm:$0xff] }
 0x521   :  { %v5787_v41 = vadd.f32 %v7650_v56, %v7649_v2  ;;  %v7658_v2 = vld [vmem:[#allocation61_spill] sm:$0xff] }
 0x522   :  { %v5807_v56 = vadd.f32 %v5325_v14, %v7658_v2 }
 0x523   :  { %7651 = vst [vmem:[#allocation38_spill] sm:$0xff] %v5787_v41 }
 0x524   :  { %7659 = vst [vmem:[#allocation42_spill] sm:$0xff] %v5807_v56 }
 0x525   :  { %1904 = vperm.xlu2 %4024, %v5771_v3   ;;  %v7656_v3 = vld [vmem:[#allocation46_spill] sm:$0xff] }
 0x526   :  { %1916 = vperm.xlu1 %4025, %v5775_v48   ;;  %v5799_v48 = vpop.permute.xlu0 %1856 }
 0x527   :  { %v5781_v55 = vpop.permute.xlu2 %1805 }
 0x528   :  { %7648 = vst [vmem:[#allocation51_spill] sm:$0xff] %v5781_v55  ;;  %v5783_v21 = vpop.permute.xlu1 %1790  ;;  %v5803_v55 = vadd.f32 %v5293_v29, %v7656_v3  ;;  %v7663_v29 = vld [vmem:[#allocation63_spill] sm:$0xff]  ;;  %v7664_v3 = vld [vmem:[#allocation110_spill] sm:$0xff] }
 0x52a   :  { %7657 = vst [vmem:[#allocation55_spill] sm:$0xff] %v5803_v55 }
 0x52d   :  { %1913 = vperm.xlu2 %4024, %v5787_v41  }
 0x52e   :  { %1925 = vperm.xlu1 %4025, %v5791_v42   ;;  %v7661_v42 = vld [vmem:[#allocation48_spill] sm:$0xff] }
 0x52f   :  { %v5795_v9 = vpop.permute.xlu2 %1814  ;;  %v5817_v41 = vadd.f32 %v5301_v12, %v7661_v42  ;;  %v7669_v12 = vld [vmem:[#allocation65_spill] sm:$0xff] }
 0x530   :  { %7654 = vst [vmem:[#allocation53_spill] sm:$0xff] %v5795_v9  ;;  %v5797_v31 = vpop.permute.xlu1 %1799  ;;  %v5819_v9 = vpop.permute.xlu0 %1865  ;;  %v5837_v42 = vadd.f32 %v5345_v11, %v7669_v12 }
 0x531   :  { %7655 = vst [vmem:[#allocation40_spill] sm:$0xff] %v5797_v31  ;;  %v5823_v31 = vadd.f32 %v7664_v3, %v7663_v29 }
 0x532   :  { %7662 = vst [vmem:[#allocation44_spill] sm:$0xff] %v5817_v41 }
 0x533   :  { %7665 = vst [vmem:[#allocation106_spill] sm:$0xff] %v5823_v31 }
 0x534   :  { %7670 = vst [vmem:[#allocation61_spill] sm:$0xff] %v5837_v42 }
 0x535   :  { %1922 = vperm.xlu2 %4024, %v5803_v55  }
 0x536   :  { %1934 = vperm.xlu1 %4025, %v5807_v56   ;;  %v7667_v56 = vld [vmem:[#allocation50_spill] sm:$0xff] }
 0x537   :  { %v5811_v59 = vpop.permute.xlu2 %1823  ;;  %v5833_v55 = vadd.f32 %v5329_v0, %v7667_v56  ;;  %v7674_v0 = vld [vmem:[#allocation67_spill] sm:$0xff] }
 0x538   :  { %v5813_v54 = vpop.permute.xlu1 %1808  ;;  %v5853_v56 = vadd.f32 %v5353_v35, %v7674_v0 }
 0x539   :  { %7660 = vst [vmem:[#allocation57_spill] sm:$0xff] %v5813_v54  ;;  %v5839_v54 = vpop.permute.xlu0 %1874 }
 0x53a   :  { %7668 = vst [vmem:[#allocation46_spill] sm:$0xff] %v5833_v55 }
 0x53b   :  { %7675 = vst [vmem:[#allocation110_spill] sm:$0xff] %v5853_v56 }
 0x53d   :  { %1931 = vperm.xlu2 %4024, %v5817_v41  }
 0x53e   :  { %1943 = vperm.xlu1 %4025, %v5823_v31   ;;  %v7672_v31 = vld [vmem:[#allocation52_spill] sm:$0xff] }
 0x53f   :  { %v5827_v14 = vpop.permute.xlu2 %1832  ;;  %v5849_v41 = vadd.f32 %v5333_v15, %v7672_v31  ;;  %v7680_v15 = vld [vmem:[#allocation69_spill] sm:$0xff] }
 0x540   :  { %7666 = vst [vmem:[#allocation59_spill] sm:$0xff] %v5827_v14  ;;  %v5829_v2 = vpop.permute.xlu1 %1817  ;;  %v5869_v31 = vadd.f32 %v5378_v10, %v7680_v15 }
 0x541   :  { %7673 = vst [vmem:[#allocation63_spill] sm:$0xff] %v5849_v41  ;;  %v5857_v11 = vpop.permute.xlu0 %1883 }
 0x542   :  { %7681 = vst [vmem:[#allocation52_spill] sm:$0xff] %v5869_v31 }
 0x545   :  { %1940 = vperm.xlu2 %4024, %v5833_v55   ;;  %v7677_v55 = vld [vmem:[#allocation54_spill] sm:$0xff] }
 0x546   :  { %1952 = vperm.xlu1 %4025, %v5837_v42  }
 0x547   :  { %v5843_v29 = vpop.permute.xlu2 %1841 }
 0x548   :  { %7671 = vst [vmem:[#allocation48_spill] sm:$0xff] %v5843_v29  ;;  %v5845_v3 = vpop.permute.xlu1 %1826  ;;  %v7678_v29 = vld [vmem:[#allocation113_spill] sm:$0xff] }
 0x549   :  { %v5865_v14 = vadd.f32 %v7678_v29, %v7677_v55  ;;  %v7686_v55 = vld [vmem:[#allocation71_spill] sm:$0xff] }
 0x54a   :  { %v5885_v29 = vadd.f32 %v5386_v51, %v7686_v55 }
 0x54b   :  { %7679 = vst [vmem:[#allocation65_spill] sm:$0xff] %v5865_v14 }
 0x54c   :  { %7687 = vst [vmem:[#allocation69_spill] sm:$0xff] %v5885_v29 }
 0x54d   :  { %1949 = vperm.xlu2 %4024, %v5849_v41   ;;  %v7684_v41 = vld [vmem:[#allocation56_spill] sm:$0xff] }
 0x54e   :  { %1961 = vperm.xlu1 %4025, %v5853_v56   ;;  %v5877_v56 = vpop.permute.xlu0 %1892 }
 0x54f   :  { %v5859_v12 = vpop.permute.xlu2 %1850 }
 0x550   :  { %7676 = vst [vmem:[#allocation50_spill] sm:$0xff] %v5859_v12  ;;  %v5861_v42 = vpop.permute.xlu1 %1835  ;;  %v5881_v12 = vadd.f32 %v5362_v49, %v7684_v41  ;;  %v7691_v49 = vld [vmem:[#allocation73_spill] sm:$0xff]  ;;  %v7692_v41 = vld [vmem:[#allocation118_spill] sm:$0xff] }
 0x552   :  { %7685 = vst [vmem:[#allocation113_spill] sm:$0xff] %v5881_v12 }
 0x555   :  { %1958 = vperm.xlu2 %4024, %v5865_v14  }
 0x556   :  { %1970 = vperm.xlu1 %4025, %v5869_v31   ;;  %v7689_v31 = vld [vmem:[#allocation58_spill] sm:$0xff] }
 0x557   :  { %v5873_v35 = vpop.permute.xlu2 %1859  ;;  %v5895_v14 = vadd.f32 %v5366_v5, %v7689_v31  ;;  %v7698_v5 = vld [vmem:[#allocation75_spill] sm:$0xff] }
 0x558   :  { %7682 = vst [vmem:[#allocation67_spill] sm:$0xff] %v5873_v35  ;;  %v5875_v0 = vpop.permute.xlu1 %1844  ;;  %v5897_v35 = vpop.permute.xlu0 %1901  ;;  %v5915_v31 = vadd.f32 %v5406_v57, %v7698_v5 }
 0x559   :  { %7683 = vst [vmem:[#allocation54_spill] sm:$0xff] %v5875_v0  ;;  %v5901_v0 = vadd.f32 %v7692_v41, %v7691_v49 }
 0x55a   :  { %7690 = vst [vmem:[#allocation71_spill] sm:$0xff] %v5895_v14 }
 0x55b   :  { %7693 = vst [vmem:[#allocation58_spill] sm:$0xff] %v5901_v0 }
 0x55c   :  { %7699 = vst [vmem:[#allocation75_spill] sm:$0xff] %v5915_v31 }
 0x55d   :  { %1967 = vperm.xlu2 %4024, %v5881_v12  }
 0x55e   :  { %1979 = vperm.xlu1 %4025, %v5885_v29   ;;  %v7696_v29 = vld [vmem:[#allocation60_spill] sm:$0xff] }
 0x55f   :  { %v5889_v10 = vpop.permute.xlu2 %1868  ;;  %v5911_v12 = vadd.f32 %v5390_v6, %v7696_v29  ;;  %v7704_v6 = vld [vmem:[#allocation77_spill] sm:$0xff] }
 0x560   :  { %v5891_v15 = vpop.permute.xlu1 %1853  ;;  %v5931_v29 = vadd.f32 %v5414_v24, %v7704_v6 }
 0x561   :  { %7688 = vst [vmem:[#allocation56_spill] sm:$0xff] %v5891_v15  ;;  %v5917_v15 = vpop.permute.xlu0 %1910 }
 0x562   :  { %7697 = vst [vmem:[#allocation60_spill] sm:$0xff] %v5911_v12 }
 0x563   :  { %7700 = vst [vmem:[#allocation170_spill] sm:$0xff] %v5917_v15 }
 0x564   :  { %7705 = vst [vmem:[#allocation77_spill] sm:$0xff] %v5931_v29 }
 0x565   :  { %1976 = vperm.xlu2 %4024, %v5895_v14  }
 0x566   :  { %1988 = vperm.xlu1 %4025, %v5901_v0   ;;  %v7702_v0 = vld [vmem:[#allocation62_spill] sm:$0xff] }
 0x567   :  { %v5905_v51 = vpop.permute.xlu2 %1877  ;;  %v5927_v14 = vadd.f32 %v5394_v44, %v7702_v0  ;;  %v7711_v44 = vld [vmem:[#allocation79_spill] sm:$0xff] }
 0x568   :  { %7694 = vst [vmem:[#allocation73_spill] sm:$0xff] %v5905_v51  ;;  %v5907_v55 = vpop.permute.xlu1 %1862  ;;  %v5947_v0 = vadd.f32 %v5439_v36, %v7711_v44 }
 0x569   :  { %7695 = vst [vmem:[#allocation118_spill] sm:$0xff] %v5907_v55  ;;  %v5935_v57 = vpop.permute.xlu0 %1919  ;;  %v7709_v55 = vld [vmem:[#allocation121_spill] sm:$0xff] }
 0x56a   :  { %7703 = vst [vmem:[#allocation62_spill] sm:$0xff] %v5927_v14 }
 0x56b   :  { %7712 = vst [vmem:[#allocation121_spill] sm:$0xff] %v5947_v0 }
 0x56d   :  { %1985 = vperm.xlu2 %4024, %v5911_v12   ;;  %v7708_v12 = vld [vmem:[#allocation64_spill] sm:$0xff] }
 0x56e   :  { %1997 = vperm.xlu1 %4025, %v5915_v31  }
 0x56f   :  { %v5921_v49 = vpop.permute.xlu2 %1886 }
 0x570   :  { %7701 = vst [vmem:[#allocation171_spill] sm:$0xff] %v5921_v49  ;;  %v5923_v41 = vpop.permute.xlu1 %1871  ;;  %v5943_v49 = vadd.f32 %v7709_v55, %v7708_v12  ;;  %v7717_v12 = vld [vmem:[#allocation81_spill] sm:$0xff] }
 0x571   :  { %v5963_v55 = vadd.f32 %v5447_v58, %v7717_v12 }
 0x572   :  { %7710 = vst [vmem:[#allocation64_spill] sm:$0xff] %v5943_v49 }
 0x573   :  { %7718 = vst [vmem:[#allocation81_spill] sm:$0xff] %v5963_v55 }
 0x575   :  { %1994 = vperm.xlu2 %4024, %v5927_v14   ;;  %v7715_v14 = vld [vmem:[#allocation66_spill] sm:$0xff] }
 0x576   :  { %2006 = vperm.xlu1 %4025, %v5931_v29   ;;  %v5955_v29 = vpop.permute.xlu0 %1928 }
 0x577   :  { %v5937_v5 = vpop.permute.xlu2 %1895 }
 0x578   :  { %7706 = vst [vmem:[#allocation172_spill] sm:$0xff] %v5937_v5  ;;  %v5939_v31 = vpop.permute.xlu1 %1880  ;;  %v5959_v5 = vadd.f32 %v5423_v25, %v7715_v14  ;;  %v7722_v25 = vld [vmem:[#allocation84_spill] sm:$0xff]  ;;  %v7723_v14 = vld [vmem:[#allocation127_spill] sm:$0xff] }
 0x579   :  { %7707 = vst [vmem:[#allocation173_spill] sm:$0xff] %v5939_v31 }
 0x57a   :  { %7716 = vst [vmem:[#allocation66_spill] sm:$0xff] %v5959_v5 }
 0x57d   :  { %2003 = vperm.xlu2 %4024, %v5943_v49   ;;  %v7720_v49 = vld [vmem:[#allocation68_spill] sm:$0xff] }
 0x57e   :  { %2015 = vperm.xlu1 %4025, %v5947_v0   ;;  %v5971_v0 = vpop.permute.xlu0 %1937 }
 0x57f   :  { %v5951_v24 = vpop.permute.xlu2 %1904 }
 0x580   :  { %7713 = vst [vmem:[#allocation79_spill] sm:$0xff] %v5951_v24  ;;  %v5953_v6 = vpop.permute.xlu1 %1889  ;;  %v5975_v24 = vadd.f32 %v5427_v13, %v7720_v49 }
 0x581   :  { %7714 = vst [vmem:[#allocation174_spill] sm:$0xff] %v5953_v6  ;;  %v5979_v6 = vadd.f32 %v7723_v14, %v7722_v25 }
 0x582   :  { %7721 = vst [vmem:[#allocation68_spill] sm:$0xff] %v5975_v24 }
 0x583   :  { %7724 = vst [vmem:[#allocation84_spill] sm:$0xff] %v5979_v6 }
 0x585   :  { %2012 = vperm.xlu2 %4024, %v5959_v5  }
 0x586   :  { %2024 = vperm.xlu1 %4025, %v5963_v55   ;;  %v7727_v55 = vld [vmem:[#allocation70_spill] sm:$0xff]  ;;  %v5995_v49 = vpop.permute.xlu0 %1946 }
 0x587   :  { %v5967_v36 = vpop.permute.xlu2 %1913  ;;  %v5989_v5 = vadd.f32 %v5451_v27, %v7727_v55  ;;  %v7735_v27 = vld [vmem:[#allocation90_spill] sm:$0xff] }
 0x588   :  { %v5969_v44 = vpop.permute.xlu1 %1898  ;;  %v6009_v55 = vadd.f32 %v5475_v26, %v7735_v27 }
 0x589   :  { %7719 = vst [vmem:[#allocation175_spill] sm:$0xff] %v5969_v44  ;;  %v7729_v44 = vld [vmem:[#allocation87_spill] sm:$0xff] }
 0x58a   :  { %7728 = vst [vmem:[#allocation70_spill] sm:$0xff] %v5989_v5  ;;  %v5993_v13 = vadd.f32 %v5467_v18, %v7729_v44 }
 0x58c   :  { %7730 = vst [vmem:[#allocation87_spill] sm:$0xff] %v5993_v13 }
 0x58d   :  { %2021 = vperm.xlu2 %4024, %v5975_v24   ;;  %v7733_v24 = vld [vmem:[#allocation169_spill] sm:$0xff] }
 0x58e   :  { %2033 = vperm.xlu1 %4025, %v5979_v6   ;;  %v7732_v6 = vld [vmem:[#allocation72_spill] sm:$0xff]  ;;  %7736 = vst [vmem:[#allocation169_spill] sm:$0xff] %v6009_v55  ;;  %v6011_v18 = vpop.permute.xlu0 %1955 }
 0x58f   :  { %v5983_v58 = vpop.permute.xlu2 %1922  ;;  %7737 = vst [vmem:[#allocation90_spill] sm:$0xff] %v6011_v18 }
 0x590   :  { %7725 = vst [vmem:[#allocation127_spill] sm:$0xff] %v5983_v58  ;;  %v5985_v12 = vpop.permute.xlu1 %1907 }
 0x591   :  { %7726 = vst [vmem:[#allocation176_spill] sm:$0xff] %v5985_v12  ;;  %v6005_v12 = vadd.f32 %v7733_v24, %v7732_v6  ;;  %v7743_v24 = vld [vmem:[#allocation93_spill] sm:$0xff] }
 0x592   :  { %v6025_v6 = vadd.f32 %v5500_v39, %v7743_v24 }
 0x593   :  { %7734 = vst [vmem:[#allocation72_spill] sm:$0xff] %v6005_v12 }
 0x595   :  { %2030 = vperm.xlu2 %4024, %v5989_v5   ;;  %v7740_v5 = vld [vmem:[#allocation74_spill] sm:$0xff] }
 0x596   :  { %2042 = vperm.xlu1 %4025, %v5993_v13   ;;  %v6027_v26 = vpop.permute.xlu0 %1964 }
 0x597   :  { %v5999_v25 = vpop.permute.xlu2 %1931 }
 0x598   :  { %7731 = vst [vmem:[#allocation177_spill] sm:$0xff] %v5999_v25  ;;  %v6001_v14 = vpop.permute.xlu1 %1916  ;;  %v7741_v25 = vld [vmem:[#allocation132_spill] sm:$0xff] }
 0x599   :  { %v6021_v58 = vadd.f32 %v7741_v25, %v7740_v5  ;;  %7744 = vst [vmem:[#allocation132_spill] sm:$0xff] %v6025_v6  ;;  %v7749_v5 = vld [vmem:[#allocation96_spill] sm:$0xff] }
 0x59a   :  { %v6041_v25 = vadd.f32 %v5508_v60, %v7749_v5 }
 0x59b   :  { %7742 = vst [vmem:[#allocation74_spill] sm:$0xff] %v6021_v58 }
 0x59c   :  { %7750 = vst [vmem:[#allocation96_spill] sm:$0xff] %v6041_v25 }
 0x59d   :  { %2039 = vperm.xlu2 %4024, %v6005_v12   ;;  %v7747_v12 = vld [vmem:[#allocation76_spill] sm:$0xff] }
 0x59e   :  { %2051 = vperm.xlu1 %4025, %v6009_v55   ;;  %v6045_v39 = vpop.permute.xlu0 %1973 }
 0x59f   :  { %v6015_v44 = vpop.permute.xlu2 %1940 }
 0x5a0   :  { %7738 = vst [vmem:[#allocation178_spill] sm:$0xff] %v6015_v44  ;;  %v6017_v13 = vpop.permute.xlu1 %1925  ;;  %v6037_v44 = vadd.f32 %v5484_v17, %v7747_v12  ;;  %v7755_v17 = vld [vmem:[#allocation99_spill] sm:$0xff] }
 0x5a1   :  { %7739 = vst [vmem:[#allocation179_spill] sm:$0xff] %v6017_v13  ;;  %v7756_v12 = vld [vmem:[#allocation139_spill] sm:$0xff]  ;;  %v7830_v13 = vld [vmem:[#allocation134_spill] sm:$0xff] }
 0x5a2   :  { %7748 = vst [vmem:[#allocation76_spill] sm:$0xff] %v6037_v44 }
 0x5a5   :  { %2048 = vperm.xlu2 %4024, %v6021_v58   ;;  %v7753_v58 = vld [vmem:[#allocation78_spill] sm:$0xff] }
 0x5a6   :  { %2060 = vperm.xlu1 %4025, %v6025_v6   ;;  %v6061_v60 = vpop.permute.xlu0 %1982 }
 0x5a7   :  { %v6031_v27 = vpop.permute.xlu2 %1949 }
 0x5a8   :  { %7745 = vst [vmem:[#allocation93_spill] sm:$0xff] %v6031_v27  ;;  %v6033_v55 = vpop.permute.xlu1 %1934  ;;  %v6053_v27 = vadd.f32 %v5488_v23, %v7753_v58  ;;  %v7762_v23 = vld [vmem:[#allocation102_spill] sm:$0xff] }
 0x5a9   :  { %7746 = vst [vmem:[#allocation180_spill] sm:$0xff] %v6033_v55  ;;  %v6057_v55 = vadd.f32 %v7756_v12, %v7755_v17  ;;  %v6073_v58 = vadd.f32 %v5528_v47, %v7762_v23 }
 0x5aa   :  { %7754 = vst [vmem:[#allocation78_spill] sm:$0xff] %v6053_v27 }
 0x5ab   :  { %7757 = vst [vmem:[#allocation99_spill] sm:$0xff] %v6057_v55 }
 0x5ac   :  { %7763 = vst [vmem:[#allocation102_spill] sm:$0xff] %v6073_v58 }
 0x5ad   :  { %2057 = vperm.xlu2 %4024, %v6037_v44   ;;  %v7760_v44 = vld [vmem:[#allocation80_spill] sm:$0xff] }
 0x5ae   :  { %2069 = vperm.xlu1 %4025, %v6041_v25   ;;  %v6077_v17 = vpop.permute.xlu0 %1991 }
 0x5af   :  { %v6047_v24 = vpop.permute.xlu2 %1958 }
 0x5b0   :  { %7751 = vst [vmem:[#allocation181_spill] sm:$0xff] %v6047_v24  ;;  %v6049_v6 = vpop.permute.xlu1 %1943  ;;  %v6069_v24 = vadd.f32 %v5512_v7, %v7760_v44  ;;  %v7768_v7 = vld [vmem:[#allocation105_spill] sm:$0xff] }
 0x5b1   :  { %7752 = vst [vmem:[#allocation182_spill] sm:$0xff] %v6049_v6  ;;  %v6089_v44 = vadd.f32 %v5540_v20, %v7768_v7  ;;  %v7774_v6 = vld [vmem:[#allocation143_spill] sm:$0xff] }
 0x5b2   :  { %7761 = vst [vmem:[#allocation80_spill] sm:$0xff] %v6069_v24 }
 0x5b3   :  { %7769 = vst [vmem:[#allocation105_spill] sm:$0xff] %v6089_v44 }
 0x5b5   :  { %2066 = vperm.xlu2 %4024, %v6053_v27   ;;  %v7766_v27 = vld [vmem:[#allocation82_spill] sm:$0xff] }
 0x5b6   :  { %2078 = vperm.xlu1 %4025, %v6057_v55   ;;  %v6093_v47 = vpop.permute.xlu0 %2000 }
 0x5b7   :  { %v6063_v5 = vpop.permute.xlu2 %1967  ;;  %7770 = vst [vmem:[#allocation186_spill] sm:$0xff] %v6093_v47 }
 0x5b8   :  { %7758 = vst [vmem:[#allocation139_spill] sm:$0xff] %v6063_v5  ;;  %v6065_v25 = vpop.permute.xlu1 %1952 }
 0x5b9   :  { %7759 = vst [vmem:[#allocation183_spill] sm:$0xff] %v6065_v25  ;;  %v6085_v25 = vadd.f32 %v5516_v33, %v7766_v27  ;;  %v7776_v33 = vld [vmem:[#allocation108_spill] sm:$0xff] }
 0x5ba   :  { %v6105_v27 = vadd.f32 %v5613_v16, %v7776_v33 }
 0x5bb   :  { %7767 = vst [vmem:[#allocation82_spill] sm:$0xff] %v6085_v25 }
 0x5bc   :  { %7777 = vst [vmem:[#allocation143_spill] sm:$0xff] %v6105_v27 }
 0x5bd   :  { %2075 = vperm.xlu2 %4024, %v6069_v24   ;;  %v7773_v24 = vld [vmem:[#allocation85_spill] sm:$0xff] }
 0x5be   :  { %2087 = vperm.xlu1 %4025, %v6073_v58   ;;  %v6109_v20 = vpop.permute.xlu0 %2009 }
 0x5bf   :  { %v6079_v12 = vpop.permute.xlu2 %1976 }
 0x5c0   :  { %7764 = vst [vmem:[#allocation184_spill] sm:$0xff] %v6079_v12  ;;  %v6081_v55 = vpop.permute.xlu1 %1961  ;;  %v6101_v12 = vadd.f32 %v7774_v6, %v7773_v24  ;;  %v7782_v6 = vld [vmem:[#allocation111_spill] sm:$0xff] }
 0x5c1   :  { %7765 = vst [vmem:[#allocation185_spill] sm:$0xff] %v6081_v55  ;;  %v6121_v24 = vadd.f32 %v5631_v34, %v7782_v6 }
 0x5c2   :  { %7775 = vst [vmem:[#allocation85_spill] sm:$0xff] %v6101_v12 }
 0x5c3   :  { %7783 = vst [vmem:[#allocation111_spill] sm:$0xff] %v6121_v24 }
 0x5c5   :  { %2084 = vperm.xlu2 %4024, %v6085_v25   ;;  %v7780_v25 = vld [vmem:[#allocation88_spill] sm:$0xff] }
 0x5c6   :  { %2096 = vperm.xlu1 %4025, %v6089_v44  }
 0x5c7   :  { %v6095_v23 = vpop.permute.xlu2 %1985 }
 0x5c8   :  { %7771 = vst [vmem:[#allocation187_spill] sm:$0xff] %v6095_v23  ;;  %v6097_v58 = vpop.permute.xlu1 %1970  ;;  %v6117_v23 = vadd.f32 %v5558_v63, %v7780_v25  ;;  %v7788_v63 = vld [vmem:[#allocation114_spill] sm:$0xff]  ;;  %v7789_v25 = vld [vmem:[#allocation27_spill] sm:$0xff] }
 0x5c9   :  { %7772 = vst [vmem:[#allocation188_spill] sm:$0xff] %v6097_v58 }
 0x5ca   :  { %7781 = vst [vmem:[#allocation88_spill] sm:$0xff] %v6117_v23 }
 0x5cd   :  { %2093 = vperm.xlu2 %4024, %v6101_v12   ;;  %v7786_v12 = vld [vmem:[#allocation91_spill] sm:$0xff] }
 0x5ce   :  { %2105 = vperm.xlu1 %4025, %v6105_v27   ;;  %v6129_v27 = vpop.permute.xlu0 %2018 }
 0x5cf   :  { %v6111_v7 = vpop.permute.xlu2 %1994 }
 0x5d0   :  { %7778 = vst [vmem:[#allocation108_spill] sm:$0xff] %v6111_v7  ;;  %v6113_v44 = vpop.permute.xlu1 %1979  ;;  %v6133_v7 = vadd.f32 %v5570_v1, %v7786_v12  ;;  %v7795_v1 = vld [vmem:[#allocation117_spill] sm:$0xff] }
 0x5d1   :  { %7779 = vst [vmem:[#allocation189_spill] sm:$0xff] %v6113_v44  ;;  %v6137_v44 = vadd.f32 %v7789_v25, %v7788_v63  ;;  %v6153_v12 = vadd.f32 %v5670_v32, %v7795_v1 }
 0x5d2   :  { %7787 = vst [vmem:[#allocation91_spill] sm:$0xff] %v6133_v7 }
 0x5d3   :  { %7790 = vst [vmem:[#allocation114_spill] sm:$0xff] %v6137_v44 }
 0x5d4   :  { %7796 = vst [vmem:[#allocation117_spill] sm:$0xff] %v6153_v12 }
 0x5d5   :  { %2102 = vperm.xlu2 %4024, %v6117_v23   ;;  %v7793_v23 = vld [vmem:[#allocation94_spill] sm:$0xff] }
 0x5d6   :  { %2114 = vperm.xlu1 %4025, %v6121_v24   ;;  %v6145_v24 = vpop.permute.xlu0 %2027 }
 0x5d7   :  { %v6125_v16 = vpop.permute.xlu2 %2003 }
 0x5d8   :  { %7784 = vst [vmem:[#allocation190_spill] sm:$0xff] %v6125_v16  ;;  %v6127_v33 = vpop.permute.xlu1 %1988  ;;  %v6149_v16 = vadd.f32 %v5643_v30, %v7793_v23  ;;  %v7801_v30 = vld [vmem:[#allocation119_spill] sm:$0xff] }
 0x5d9   :  { %7785 = vst [vmem:[#allocation191_spill] sm:$0xff] %v6127_v33  ;;  %v6169_v23 = vadd.f32 %v5688_v62, %v7801_v30 }
 0x5da   :  { %7794 = vst [vmem:[#allocation94_spill] sm:$0xff] %v6149_v16 }
 0x5db   :  { %7802 = vst [vmem:[#allocation119_spill] sm:$0xff] %v6169_v23 }
 0x5dd   :  { %2111 = vperm.xlu2 %4024, %v6133_v7   ;;  %v7799_v7 = vld [vmem:[#allocation97_spill] sm:$0xff] }
 0x5de   :  { %2123 = vperm.xlu1 %4025, %v6137_v44   ;;  %v6161_v44 = vpop.permute.xlu0 %2036 }
 0x5df   :  { %v6141_v34 = vpop.permute.xlu2 %2012 }
 0x5e0   :  { %7791 = vst [vmem:[#allocation27_spill] sm:$0xff] %v6141_v34  ;;  %v6143_v6 = vpop.permute.xlu1 %1997 }
 0x5e1   :  { %7792 = vst [vmem:[#allocation192_spill] sm:$0xff] %v6143_v6  ;;  %v6165_v6 = vadd.f32 %v5657_v19, %v7799_v7  ;;  %v7808_v19 = vld [vmem:[#allocation123_spill] sm:$0xff] }
 0x5e2   :  { %v6185_v7 = vadd.f32 %v5735_v61, %v7808_v19 }
 0x5e3   :  { %7800 = vst [vmem:[#allocation97_spill] sm:$0xff] %v6165_v6 }
 0x5e4   :  { %7809 = vst [vmem:[#allocation123_spill] sm:$0xff] %v6185_v7 }
 0x5e5   :  { %2120 = vperm.xlu2 %4024, %v6149_v16   ;;  %v7806_v16 = vld [vmem:[#allocation100_spill] sm:$0xff] }
 0x5e6   :  { %2132 = vperm.xlu1 %4025, %v6153_v12   ;;  %v6177_v12 = vpop.permute.xlu0 %2045 }
 0x5e7   :  { %v6157_v63 = vpop.permute.xlu2 %2021  ;;  %7805 = vst [vmem:[#allocation197_spill] sm:$0xff] %v6177_v12 }
 0x5e8   :  { %7797 = vst [vmem:[#allocation193_spill] sm:$0xff] %v6157_v63  ;;  %v6159_v25 = vpop.permute.xlu1 %2006 }
 0x5e9   :  { %7798 = vst [vmem:[#allocation194_spill] sm:$0xff] %v6159_v25  ;;  %v6181_v25 = vadd.f32 %v5609_v22, %v7806_v16 }
 0x5eb   :  { %7807 = vst [vmem:[#allocation100_spill] sm:$0xff] %v6181_v25 }
 0x5ed   :  { %2129 = vperm.xlu2 %4024, %v6165_v6   ;;  %v7813_v6 = vld [vmem:[#allocation103_spill] sm:$0xff] }
 0x5ee   :  { %2141 = vperm.xlu1 %4025, %v6169_v23   ;;  %v6193_v23 = vpop.permute.xlu0 %2054  ;;  %v6197_v33 = vadd.f32 %v5700_v8, %v7813_v6 }
 0x5ef   :  { %v6173_v32 = vpop.permute.xlu2 %2030  ;;  %7812 = vst [vmem:[#allocation200_spill] sm:$0xff] %v6193_v23 }
 0x5f0   :  { %7803 = vst [vmem:[#allocation195_spill] sm:$0xff] %v6173_v32  ;;  %v6175_v1 = vpop.permute.xlu1 %2015 }
 0x5f1   :  { %7804 = vst [vmem:[#allocation196_spill] sm:$0xff] %v6175_v1 }
 0x5f2   :  { %7814 = vst [vmem:[#allocation103_spill] sm:$0xff] %v6197_v33 }
 0x5f5   :  { %2138 = vperm.xlu2 %4024, %v6181_v25  }
 0x5f6   :  { %2150 = vperm.xlu1 %4025, %v6185_v7   ;;  %v6204_v16 = vpop.permute.xlu0 %2063 }
 0x5f7   :  { %v6189_v62 = vpop.permute.xlu2 %2039 }
 0x5f8   :  { %7810 = vst [vmem:[#allocation198_spill] sm:$0xff] %v6189_v62  ;;  %v6191_v30 = vpop.permute.xlu1 %2024 }
 0x5f9   :  { %7811 = vst [vmem:[#allocation199_spill] sm:$0xff] %v6191_v30 }
 0x5fd   :  { %2147 = vperm.xlu2 %4024, %v6197_v33  }
 0x5fe   :  { %v6210_v25 = vpop.permute.xlu0 %2072 }
 0x5ff   :  { %v6200_v22 = vpop.permute.xlu2 %2048  ;;  %7819 = vst [vmem:[#allocation205_spill] sm:$0xff] %v6210_v25 }
 0x600   :  { %7815 = vst [vmem:[#allocation201_spill] sm:$0xff] %v6200_v22  ;;  %v6202_v61 = vpop.permute.xlu1 %2033  ;;  %v7825_v22 = vlaneseq }
 0x601   :  { %7816 = vst [vmem:[#allocation202_spill] sm:$0xff] %v6202_v61 }
 0x602   :  { %v6223_v61 = vand.u32 127, %v7825_v22 }
 0x604   :  { %v6228_v30 = vadd.s32 4294967288, %v6223_v61  ;;  %v2154_v22 = vperm.slane %v5629_v52, %v6223_v61  ;;  %v6244_v58 = vadd.s32 4294967264, %v6223_v61  ;;  %v6251_v1 = vadd.s32 4294967256, %v6223_v61 }
 0x605   :  { %v6262_v34 = vadd.s32 4294967208, %v6223_v61  ;;  %v6306_v51 = vadd.s32 4294967224, %v6223_v61  ;;  %v2246_v53 = vperm.slane %v5819_v9, %v6223_v61 }
 0x606   :  { %v6216_v8 = vpop.permute.xlu0 %2081  ;;  %v2168_v52 = vperm.slane %v5767_v50, %v6244_v58  ;;  %v2172_v50 = vperm.slane %v5645_v43, %v6251_v1  ;;  %v6290_v43 = vadd.s32 4294967192, %v6223_v61 }
 0x607   :  { %v6206_v19 = vpop.permute.xlu2 %2057  ;;  %7822 = vst [vmem:[#allocation208_spill] sm:$0xff] %v6216_v8  ;;  %v6309_v8 = vadd.s32 4294967200, %v6223_v61 }
 0x608   :  { %7817 = vst [vmem:[#allocation203_spill] sm:$0xff] %v6206_v19  ;;  %v6208_v7 = vpop.permute.xlu1 %2042  ;;  %v6247_v19 = vadd.s32 4294967272, %v6223_v61 }
 0x609   :  { %7818 = vst [vmem:[#allocation204_spill] sm:$0xff] %v6208_v7  ;;  %v6231_v7 = vadd.s32 4294967280, %v6223_v61 }
 0x60e   :  { %v6225_v63 = vpop.permute.xlu0 %2090 }
 0x60f   :  { %v6212_v62 = vpop.permute.xlu2 %2066  ;;  %7826 = vst [vmem:[#allocation211_spill] sm:$0xff] %v6225_v63 }
 0x610   :  { %7820 = vst [vmem:[#allocation206_spill] sm:$0xff] %v6212_v62  ;;  %v6214_v32 = vpop.permute.xlu1 %2051 }
 0x611   :  { %7821 = vst [vmem:[#allocation207_spill] sm:$0xff] %v6214_v32  ;;  %v2156_v32 = vperm.slane %v5719_v45, %v6228_v30 }
 0x613   :  { %v2158_v45 = vsel %vm2157_vm0, %v2156_v32, %v2154_v22  ;;  %v2164_v32 = vperm.slane %v5733_v46, %v6247_v19  ;;  %v2215_v22 = vperm.slane %v5829_v2, %v6223_v61 }
 0x617   :  { %v6218_v6 = vpop.permute.xlu2 %2075 }
 0x618   :  { %7823 = vst [vmem:[#allocation209_spill] sm:$0xff] %v6218_v6  ;;  %v6220_v33 = vpop.permute.xlu1 %2060  ;;  %v2160_v6 = vperm.slane %v5751_v38, %v6231_v7  ;;  %v6253_v38 = vpop.permute.xlu0 %2099 }
 0x619   :  { %7824 = vst [vmem:[#allocation210_spill] sm:$0xff] %v6220_v33  ;;  %v6269_v33 = vadd.s32 4294967184, %v6223_v61 }
 0x61a   :  { %7829 = vst [vmem:[#allocation214_spill] sm:$0xff] %v6253_v38  ;;  %v6282_v38 = vadd.s32 4294967240, %v6223_v61 }
 0x61c   :  { %v2180_v63 = vperm.slane %v5783_v21, %v6282_v38  ;;  %v6318_v21 = vadd.s32 4294967176, %v6223_v61 }
 0x61f   :  { %v6237_v62 = vpop.permute.xlu2 %2084 }
 0x620   :  { %7827 = vst [vmem:[#allocation212_spill] sm:$0xff] %v6237_v62  ;;  %v6241_v5 = vpop.permute.xlu1 %2069  ;;  %v2162_v62 = vsel %vm2161_vm1, %v2160_v6, %v2158_v45  ;;  %v2216_v45 = vperm.slane %v5721_v40, %v6228_v30  ;;  %v6293_v40 = vadd.s32 4294967248, %v6223_v61  ;;  %v6325_v31 = vpop.permute.xlu0 %2108 }
 0x621   :  { %7828 = vst [vmem:[#allocation213_spill] sm:$0xff] %v6241_v5  ;;  %v6259_v5 = vadd.s32 4294967232, %v6223_v61  ;;  %v2166_v6 = vsel %vm2165_vm2, %v2164_v32, %v2162_v62  ;;  %v6285_v62 = vadd.s32 4294967216, %v6223_v61 }
 0x622   :  { %v2170_v55 = vsel %vm2169_vm3, %v2168_v52, %v2166_v6  ;;  %v2217_v52 = vsel %vm2157_vm0, %v2216_v45, %v2215_v22  ;;  %v7833_v22 = vld [vmem:[#allocation45_spill] sm:$0xff]  ;;  %v7834_v45 = vld [vmem:[#allocation115_spill] sm:$0xff] }
 0x623   :  { %v2184_v46 = vperm.slane %v5663_v28, %v6259_v5  ;;  %v2220_v28 = vperm.slane %v5845_v3, %v6247_v19  ;;  %v2174_v2 = vsel %vm2173_vm4, %v2172_v50, %v2170_v55  ;;  %v2176_v3 = vperm.slane %v5749_v4, %v6293_v40 }
 0x624   :  { %v2222_v50 = vperm.slane %v7833_v22, %v6244_v58 }
 0x625   :  { %v2178_v4 = vsel %vm2177_vm5, %v2176_v3, %v2174_v2  ;;  %v7835_v2 = vld [vmem:[#allocation40_spill] sm:$0xff] }
 0x626   :  { %v2192_v22 = vperm.slane %v7835_v2, %v6285_v62 }
 0x627   :  { %v6298_v6 = vpop.permute.xlu2 %2093 }
 0x628   :  { %v6287_v32 = vpop.permute.xlu1 %2078  ;;  %7832 = vst [vmem:[#allocation215_spill] sm:$0xff] %v6298_v6  ;;  %v2228_v6 = vperm.slane %v7834_v45, %v6282_v38  ;;  %v6380_v25 = vpop.permute.xlu0 %2117 }
 0x629   :  { %7831 = vst [vmem:[#allocation134_spill] sm:$0xff] %v6287_v32  ;;  %v2218_v32 = vperm.slane %v5811_v59, %v6231_v7 }
 0x62b   :  { %v2219_v59 = vsel %vm2161_vm1, %v2218_v32, %v2217_v52  ;;  %v2182_v32 = vsel %vm2181_vm6, %v2180_v63, %v2178_v4  ;;  %v2251_v52 = vperm.slane %v5839_v54, %v6247_v19  ;;  %v2226_v54 = vperm.slane %v5861_v42, %v6293_v40 }
 0x62c   :  { %v2221_v55 = vsel %vm2165_vm2, %v2220_v28, %v2219_v59  ;;  %v2186_v4 = vsel %vm2185_vm7, %v2184_v46, %v2182_v32  ;;  %v7836_v28 = vld [vmem:[#allocation59_spill] sm:$0xff]  ;;  %v2247_v46 = vperm.slane %v5889_v10, %v6228_v30 }
 0x62d   :  { %v2223_v63 = vsel %vm2169_vm3, %v2222_v50, %v2221_v55  ;;  %v2224_v45 = vperm.slane %v7836_v28, %v6251_v1  ;;  %v7837_v50 = vld [vmem:[#allocation34_spill] sm:$0xff]  ;;  %v7842_v55 = vld [vmem:[#allocation48_spill] sm:$0xff] }
 0x62e   :  { %v2188_v42 = vperm.slane %v7837_v50, %v6306_v51  ;;  %v2248_v10 = vsel %vm2157_vm0, %v2247_v46, %v2246_v53 }
 0x62f   :  { %v2225_v28 = vsel %vm2173_vm4, %v2224_v45, %v2223_v63  ;;  %v6369_v9 = vpop.permute.xlu2 %2102  ;;  %v2249_v45 = vperm.slane %v5923_v41, %v6231_v7  ;;  %v7839_v41 = vld [vmem:[#allocation54_spill] sm:$0xff]  ;;  %v7841_v63 = vld [vmem:[#allocation57_spill] sm:$0xff] }
 0x630   :  { %v6349_v59 = vpop.permute.xlu1 %2087  ;;  %7838 = vst [vmem:[#allocation45_spill] sm:$0xff] %v6369_v9  ;;  %v2190_v3 = vsel %vm2189_vm8, %v2188_v42, %v2186_v4  ;;  %v2227_v50 = vsel %vm2177_vm5, %v2226_v54, %v2225_v28  ;;  %v2232_v42 = vperm.slane %v7839_v41, %v6306_v51  ;;  %v7840_v28 = vperm.slane %v7830_v13, %v6262_v34  ;;  %v7852_v9 = vld [vmem:[#allocation137_spill] sm:$0xff] }
 0x631   :  { %v2194_v2 = vsel %vm2193_vm9, %v2192_v22, %v2190_v3  ;;  %v2229_v3 = vsel %vm2181_vm6, %v2228_v6, %v2227_v50  ;;  %v2204_v32 = vperm.slane %v7841_v63, %v6290_v43  ;;  %v2230_v4 = vperm.slane %v7842_v55, %v6259_v5  ;;  %v7843_v6 = vld [vmem:[#allocation51_spill] sm:$0xff]  ;;  %v7844_v63 = vld [vmem:[#allocation173_spill] sm:$0xff] }
 0x632   :  { %v2198_v54 = vsel %vm2197_vm10, %v7840_v28, %v2194_v2  ;;  %v2200_v50 = vperm.slane %v7843_v6, %v6309_v8  ;;  %v2250_v41 = vsel %vm2161_vm1, %v2249_v45, %v2248_v10  ;;  %v2278_v13 = vperm.slane %v6001_v14, %v6228_v30  ;;  %v7846_v2 = vld [vmem:[#allocation208_spill] sm:$0xff] }
 0x633   :  { %v2231_v55 = vsel %vm2185_vm7, %v2230_v4, %v2229_v3  ;;  %v2277_v14 = vperm.slane %v5967_v36, %v6223_v61  ;;  %v2252_v6 = vsel %vm2165_vm2, %v2251_v52, %v2250_v41  ;;  %v2255_v53 = vperm.slane %v7844_v63, %v6251_v1  ;;  %v7845_v4 = vld [vmem:[#allocation205_spill] sm:$0xff]  ;;  %v7848_v52 = vld [vmem:[#allocation211_spill] sm:$0xff]  ;;  %v7851_v3 = vld [vmem:[#allocation56_spill] sm:$0xff] }
 0x634   :  { %v2202_v28 = vsel %vm2201_vm11, %v2200_v50, %v2198_v54  ;;  %v2233_v45 = vsel %vm2189_vm8, %v2232_v42, %v2231_v55  ;;  %v6434_v54 = vpop.permute.xlu0 %2126  ;;  %v7847_v42 = vld [vmem:[#allocation73_spill] sm:$0xff]  ;;  %v2238_v23 = vperm.slane %v7851_v3, %v6309_v8 }
 0x635   :  { %v2206_v10 = vsel %vm2205_vm12, %v2204_v32, %v2202_v28  ;;  %v2253_v50 = vperm.slane %v7847_v42, %v6244_v58  ;;  %v2279_v36 = vsel %vm2157_vm0, %v2278_v13, %v2277_v14  ;;  %v7850_v28 = vperm.slane %v5779_v37, %v6285_v62  ;;  %v7854_v14 = vld [vmem:[#allocation50_spill] sm:$0xff]  ;;  %v7855_v63 = vld [vmem:[#allocation53_spill] sm:$0xff] }
 0x636   :  { %v7853_v42 = vperm.slane %v7852_v9, %v6269_v33  ;;  %v2236_v15 = vperm.slane %v7854_v14, %v6262_v34  ;;  %v2212_v41 = vperm.slane %v7855_v63, %v6318_v21  ;;  %v7857_v9 = vld [vmem:[#allocation179_spill] sm:$0xff]  ;;  %v7859_v63 = vld [vmem:[#allocation185_spill] sm:$0xff] }
 0x637   :  { %v6439_v55 = vpop.permute.xlu2 %2111  ;;  %v2235_v46 = vsel %vm2193_vm9, %v7850_v28, %v2233_v45  ;;  %v2254_v32 = vsel %vm2169_vm3, %v2253_v50, %v2252_v6  ;;  %v7856_v45 = vperm.slane %v5935_v57, %v6231_v7  ;;  %v2284_v28 = vperm.slane %v7857_v9, %v6244_v58  ;;  %v7858_v6 = vld [vmem:[#allocation127_spill] sm:$0xff] }
 0x638   :  { %v6406_v22 = vpop.permute.xlu1 %2096  ;;  %v2210_v13 = vsel %vm2209_vm13, %v7853_v42, %v2206_v10  ;;  %v2256_v37 = vsel %vm2173_vm4, %v2255_v53, %v2254_v32  ;;  %v2402_v42 = vperm.slane %v6325_v31, %v6228_v30  ;;  %v2237_v14 = vsel %vm2197_vm10, %v2236_v15, %v2235_v46  ;;  %v7863_v46 = vld [vmem:[#allocation174_spill] sm:$0xff]  ;;  %v7864_v57 = vld [vmem:[#allocation27_spill] sm:$0xff] }
 0x639   :  { %v2281_v3 = vsel %vm2161_vm1, %v7856_v45, %v2279_v36  ;;  %v2282_v50 = vperm.slane %v7858_v6, %v6247_v19  ;;  %v2308_v53 = vperm.slane %v7859_v63, %v6223_v61  ;;  %v2239_v36 = vsel %vm2201_vm11, %v2238_v23, %v2237_v14  ;;  %v7861_v45 = vld [vmem:[#allocation210_spill] sm:$0xff]  ;;  %v7865_v23 = vld [vmem:[#allocation171_spill] sm:$0xff]  ;;  %v7866_v14 = vld [vmem:[#allocation196_spill] sm:$0xff] }
 0x63a   :  { %v6478_v32 = vsel %vm2213_vm14, %v2212_v41, %v2210_v13  ;;  %v2371_v9 = vperm.slane %v7861_v45, %v6228_v30  ;;  %v7862_v15 = vperm.slane %v5857_v11, %v6293_v40  ;;  %v2261_v6 = vperm.slane %v7863_v46, %v6259_v5  ;;  %v7867_v11 = vld [vmem:[#allocation203_spill] sm:$0xff] }
 0x63b   :  { %7860 = vst [vmem:[#allocation115_spill] sm:$0xff] %v6478_v32  ;;  %v2283_v63 = vsel %vm2165_vm2, %v2282_v50, %v2281_v3  ;;  %v2340_v47 = vperm.slane %v7864_v57, %v6228_v30  ;;  %v2259_v41 = vperm.slane %v7865_v23, %v6282_v38  ;;  %v2342_v45 = vperm.slane %v7866_v14, %v6231_v7 }
 0x63c   :  { %v2258_v31 = vsel %vm2177_vm5, %v7862_v15, %v2256_v37  ;;  %v2285_v13 = vsel %vm2169_vm3, %v2284_v28, %v2283_v63  ;;  %v2370_v32 = vperm.slane %v7867_v11, %v6223_v61  ;;  %v7868_v15 = vld [vmem:[#allocation67_spill] sm:$0xff]  ;;  %v6502_v50 = vpop.permute.xlu0 %2135  ;;  %v7869_v57 = vperm.slane %v6027_v26, %v6228_v30  ;;  %v7870_v28 = vld [vmem:[#allocation188_spill] sm:$0xff] }
 0x63d   :  { %v2242_v3 = vperm.slane %v7868_v15, %v6269_v33  ;;  %v2313_v63 = vperm.slane %v7870_v28, %v6247_v19  ;;  %v7871_v23 = vperm.slane %v5799_v48, %v6290_v43  ;;  %v2260_v11 = vsel %vm2181_vm6, %v2259_v41, %v2258_v31  ;;  %v7872_v37 = vld [vmem:[#allocation139_spill] sm:$0xff] }
 0x63e   :  { %v2310_v46 = vsel %vm2157_vm0, %v7869_v57, %v2308_v53  ;;  %v2311_v15 = vperm.slane %v7872_v37, %v6231_v7  ;;  %v2372_v18 = vsel %vm2157_vm0, %v2371_v9, %v2370_v32  ;;  %v2262_v12 = vsel %vm2185_vm7, %v2261_v6, %v2260_v11  ;;  %v7875_v32 = vld [vmem:[#allocation177_spill] sm:$0xff]  ;;  %v7876_v37 = vld [vmem:[#allocation172_spill] sm:$0xff] }
 0x63f   :  { %v2241_v14 = vsel %vm2205_vm12, %v7871_v23, %v2239_v36  ;;  %v7873_v26 = vperm.slane %v5955_v29, %v6251_v1  ;;  %v7874_v53 = vperm.slane %v6109_v20, %v6223_v61  ;;  %v6527_v36 = vpop.permute.xlu2 %2120  ;;  %v2420_v41 = vperm.slane %v6502_v50, %v6285_v62  ;;  %v7880_v11 = vld [vmem:[#allocation180_spill] sm:$0xff] }
 0x640   :  { %v2106_v10 = vpop.permute.xlu1 %2105  ;;  %v2288_v9 = vperm.slane %v7875_v32, %v6293_v40  ;;  %v2312_v6 = vsel %vm2161_vm1, %v2311_v15, %v2310_v46  ;;  %v2265_v20 = vperm.slane %v7876_v37, %v6285_v62  ;;  %v7877_v57 = vperm.slane %v6204_v16, %v6231_v7 }
 0x641   :  { %v2287_v30 = vsel %vm2173_vm4, %v7873_v26, %v2285_v13  ;;  %v2341_v48 = vsel %vm2157_vm0, %v2340_v47, %v7874_v53  ;;  %v2401_v31 = vperm.slane %v2106_v10, %v6223_v61  ;;  %v2314_v47 = vsel %vm2165_vm2, %v2313_v63, %v2312_v6  ;;  %v7878_v10 = vld [vmem:[#allocation213_spill] sm:$0xff]  ;;  %v7881_v63 = vld [vmem:[#allocation206_spill] sm:$0xff]  ;;  %v7883_v53 = vld [vmem:[#allocation199_spill] sm:$0xff] }
 0x642   :  { %v2343_v29 = vsel %vm2161_vm1, %v2342_v45, %v2341_v48  ;;  %v2374_v61 = vsel %vm2161_vm1, %v7877_v57, %v2372_v18  ;;  %v2377_v28 = vperm.slane %v7878_v10, %v6244_v58  ;;  %v7879_v23 = vperm.slane %v5877_v56, %v6306_v51 }
 0x643   :  { %v2289_v45 = vsel %vm2177_vm5, %v2288_v9, %v2287_v30  ;;  %v2290_v15 = vperm.slane %v7880_v11, %v6282_v38  ;;  %v2375_v26 = vperm.slane %v7881_v63, %v6247_v19  ;;  %v7882_v16 = vperm.slane %v6129_v27, %v6247_v19  ;;  %v7885_v9 = vld [vmem:[#allocation193_spill] sm:$0xff] }
 0x644   :  { %v2264_v46 = vsel %vm2189_vm8, %v7879_v23, %v2262_v12  ;;  %v2348_v48 = vperm.slane %v7883_v53, %v6251_v1  ;;  %v2403_v56 = vsel %vm2157_vm0, %v2402_v42, %v2401_v31  ;;  %v7884_v30 = vperm.slane %v6045_v39, %v6244_v58  ;;  %v7887_v39 = vld [vmem:[#allocation184_spill] sm:$0xff] }
 0x645   :  { %v2345_v18 = vsel %vm2165_vm2, %v7882_v16, %v2343_v29  ;;  %v2346_v6 = vperm.slane %v7885_v9, %v6244_v58  ;;  %v2376_v37 = vsel %vm2165_vm2, %v2375_v26, %v2374_v61  ;;  %v2404_v27 = vperm.slane %v6439_v55, %v6231_v7  ;;  %v7886_v29 = vld [vmem:[#allocation189_spill] sm:$0xff]  ;;  %v7888_v55 = vld [vmem:[#allocation118_spill] sm:$0xff] }
 0x646   :  { %v2316_v32 = vsel %vm2169_vm3, %v7884_v30, %v2314_v47  ;;  %v2319_v57 = vperm.slane %v7886_v29, %v6293_v40  ;;  %v2378_v42 = vsel %vm2169_vm3, %v2377_v28, %v2376_v37  ;;  %v2317_v31 = vperm.slane %v7887_v39, %v6251_v1  ;;  %v7890_v26 = vld [vmem:[#allocation134_spill] sm:$0xff] }
 0x647   :  { %v2405_v47 = vsel %vm2161_vm1, %v2404_v27, %v2403_v56  ;;  %v4550_v10 = vmov -1e+30   ;;  %v2243_v7 = vsel %vm2209_vm13, %v2242_v3, %v2241_v14  ;;  %v2244_v61 = vperm.slane %v7888_v55, %v6318_v21  ;;  %v7891_v14 = vld [vmem:[#allocation175_spill] sm:$0xff]  ;;  %v7897_v27 = vld [vmem:[#allocation182_spill] sm:$0xff] }
 0x648   :  { %v2115_v13 = vpop.permute.xlu1 %2114  ;;  %66 = vst.msk [vmem:[#allocation3] sm:$0xff] %vm65_vm15, %v4550_v10  ;;  %v2318_v11 = vsel %vm2173_vm4, %v2317_v31, %v2316_v32  ;;  %v2383_v16 = vperm.slane %v7890_v26, %v6282_v38  ;;  %v7892_v53 = vperm.slane %v5971_v0, %v6259_v5  ;;  %v7895_v32 = vld [vmem:[#allocation202_spill] sm:$0xff]  ;;  %v2296_v29 = vperm.slane %v7897_v27, %v6285_v62  ;;  %v7902_v55 = vld [vmem:[#allocation187_spill] sm:$0xff] }
 0x649   :  { %v2406_v12 = vperm.slane %v2115_v13, %v6247_v19  ;;  %v2291_v19 = vsel %vm2181_vm6, %v2290_v15, %v2289_v45  ;;  %v2347_v13 = vsel %vm2169_vm3, %v2346_v6, %v2345_v18  ;;  %v2266_v45 = vsel %vm2193_vm9, %v2265_v20, %v2264_v46  ;;  %v7893_v46 = vld [vmem:[#allocation209_spill] sm:$0xff]  ;;  %v7899_v39 = vld [vmem:[#allocation178_spill] sm:$0xff] }
 0x64a   :  { %v2349_v28 = vsel %vm2173_vm4, %v2348_v48, %v2347_v13  ;;  %v7889_v15 = vperm.slane %v7845_v4, %v6251_v1  ;;  %v2267_v18 = vperm.slane %v7891_v14, %v6262_v34  ;;  %v2293_v48 = vsel %vm2185_vm7, %v7892_v53, %v2291_v19  ;;  %v2130_v4 = vpop.permute.xlu2 %2129  ;;  %v7905_v14 = vld [vmem:[#allocation176_spill] sm:$0xff] }
 0x64b   :  { %v2407_v23 = vsel %vm2165_vm2, %v2406_v12, %v2405_v47  ;;  %v2320_v20 = vsel %vm2177_vm5, %v2319_v57, %v2318_v11  ;;  %v2381_v56 = vperm.slane %v7893_v46, %v6293_v40  ;;  %v7894_v12 = vperm.slane %v6145_v24, %v6293_v40  ;;  %v7898_v57 = vld [vmem:[#allocation195_spill] sm:$0xff] }
 0x64c   :  { %v2380_v63 = vsel %vm2173_vm4, %v7889_v15, %v2378_v42  ;;  %v2354_v9 = vperm.slane %v7895_v32, %v6259_v5  ;;  %v7896_v6 = vperm.slane %v6380_v25, %v6244_v58  ;;  %v2352_v42 = vperm.slane %v7898_v57, %v6282_v38 }
 0x64d   :  { %v2351_v30 = vsel %vm2177_vm5, %v7894_v12, %v2349_v28  ;;  %v2382_v24 = vsel %vm2177_vm5, %v2381_v56, %v2380_v63  ;;  %v2410_v19 = vperm.slane %v6527_v36, %v6251_v1  ;;  %v2294_v31 = vperm.slane %v7899_v39, %v6306_v51 }
 0x64e   :  { %v2409_v0 = vsel %vm2169_vm3, %v7896_v6, %v2407_v23  ;;  %v7900_v58 = vperm.slane %v6061_v60, %v6282_v38  ;;  %v2384_v47 = vsel %vm2181_vm6, %v2383_v16, %v2382_v24  ;;  %v2268_v10 = vsel %vm2197_vm10, %v2267_v18, %v2266_v45 }
 0x64f   :  { %v2323_v28 = vperm.slane %v7902_v55, %v6259_v5  ;;  %v2353_v1 = vsel %vm2181_vm6, %v2352_v42, %v2351_v30  ;;  %v2411_v36 = vsel %vm2173_vm4, %v2410_v19, %v2409_v0  ;;  %v6635_v23 = vsel %vm2213_vm14, %v2244_v61, %v2243_v7  ;;  %v7911_v0 = vld [vmem:[#allocation198_spill] sm:$0xff]  ;;  %v7915_v19 = vld [vmem:[#allocation93_spill] sm:$0xff] }
 0x650   :  { %v2124_v3 = vpop.permute.xlu1 %2123  ;;  %v2322_v25 = vsel %vm2181_vm6, %v7900_v58, %v2320_v20  ;;  %v2295_v60 = vsel %vm2189_vm8, %v2294_v31, %v2293_v48  ;;  %v2355_v11 = vsel %vm2185_vm7, %v2354_v9, %v2353_v1  ;;  %v7903_v26 = vperm.slane %v7846_v2, %v6259_v5  ;;  %v7906_v48 = vld [vmem:[#allocation212_spill] sm:$0xff] }
 0x651   :  { %v2412_v37 = vperm.slane %v2124_v3, %v6293_v40  ;;  %v7901_v40 = vld [vmem:[#allocation191_spill] sm:$0xff]  ;;  %v2297_v63 = vsel %vm2193_vm9, %v2296_v29, %v2295_v60  ;;  %v2324_v45 = vsel %vm2185_vm7, %v2323_v28, %v2322_v25  ;;  %v2389_v3 = vperm.slane %v6349_v59, %v6285_v62  ;;  %v7908_v59 = vld [vmem:[#allocation204_spill] sm:$0xff] }
 0x652   :  { %v2325_v13 = vperm.slane %v7901_v40, %v6306_v51  ;;  %v2386_v16 = vsel %vm2185_vm7, %v7903_v26, %v2384_v47  ;;  %v7904_v7 = vperm.slane %v5897_v35, %v6309_v8  ;;  %v2273_v18 = vperm.slane %v7905_v14, %v6269_v33  ;;  %v7912_v29 = vld [vmem:[#allocation183_spill] sm:$0xff]  ;;  %v2139_v24 = vpop.permute.xlu2 %2138  ;;  %v7920_v26 = vld [vmem:[#allocation197_spill] sm:$0xff]  ;;  %v2145_v14 = vpop.permute.xlu0 %2144 }
 0x653   :  { %v2413_v15 = vsel %vm2177_vm5, %v2412_v37, %v2411_v36  ;;  %v2387_v20 = vperm.slane %v7906_v48, %v6306_v51  ;;  %v7907_v2 = vperm.slane %v6161_v44, %v6306_v51  ;;  %v2360_v12 = vperm.slane %v7908_v59, %v6262_v34 }
 0x654   :  { %v2270_v61 = vsel %vm2201_vm11, %v7904_v7, %v2268_v10  ;;  %v2326_v53 = vsel %vm2189_vm8, %v2325_v13, %v2324_v45  ;;  %v7909_v35 = vperm.slane %v6434_v54, %v6282_v38  ;;  %v7910_v9 = vperm.slane %v5995_v49, %v6262_v34  ;;  %v7914_v49 = vld [vmem:[#allocation192_spill] sm:$0xff] }
 0x655   :  { %v2357_v56 = vsel %vm2189_vm8, %v7907_v2, %v2355_v11  ;;  %v2358_v44 = vperm.slane %v7911_v0, %v6285_v62  ;;  %v2388_v37 = vsel %vm2189_vm8, %v2387_v20, %v2386_v16  ;;  %v2416_v27 = vperm.slane %v2130_v4, %v6259_v5  ;;  %v7916_v5 = vld [vmem:[#allocation108_spill] sm:$0xff]  ;;  %v7924_v2 = vld [vmem:[#allocation90_spill] sm:$0xff] }
 0x656   :  { %v2415_v30 = vsel %vm2181_vm6, %v7909_v35, %v2413_v15  ;;  %v2299_v6 = vsel %vm2197_vm10, %v7910_v9, %v2297_v63  ;;  %vm2432_vm0 = vcmask 1041409   ;;  %v2302_v38 = vperm.slane %v7912_v29, %v6290_v43  ;;  %v7919_v15 = vld [vmem:[#allocation215_spill] sm:$0xff] }
 0x657   :  { %v7913_v54 = vperm.slane %v6077_v17, %v6285_v62  ;;  %v2331_v57 = vperm.slane %v7914_v49, %v6309_v8  ;;  %v2390_v42 = vsel %vm2193_vm9, %v2389_v3, %v2388_v37  ;;  %v2300_v39 = vperm.slane %v7915_v19, %v6309_v8  ;;  %v7917_v17 = vld [vmem:[#allocation79_spill] sm:$0xff]  ;;  %v7931_v37 = vld [vmem:[#allocation170_spill] sm:$0xff] }
 0x658   :  { %v2133_v46 = vpop.permute.xlu1 %2132  ;;  %v2329_v4 = vperm.slane %v7916_v5, %v6262_v34  ;;  %v2359_v31 = vsel %vm2193_vm9, %v2358_v44, %v2357_v56  ;;  %v2417_v58 = vsel %vm2185_vm7, %v2416_v27, %v2415_v30  ;;  %v2271_v25 = vperm.slane %v7917_v17, %v6290_v43  ;;  %v7922_v3 = vld [vmem:[#allocation207_spill] sm:$0xff] }
 0x659   :  { %v2418_v32 = vperm.slane %v2133_v46, %v6306_v51  ;;  %v2328_v51 = vsel %vm2193_vm9, %v7913_v54, %v2326_v53  ;;  %vm2434_vm1 = vcmask 1042434   ;;  %v2361_v40 = vsel %vm2197_vm10, %v2360_v12, %v2359_v31  ;;  %v7923_v53 = vld [vmem:[#allocation201_spill] sm:$0xff]  ;;  %v7926_v12 = vld [vmem:[#allocation186_spill] sm:$0xff] }
 0x65a   :  { %v2301_v47 = vsel %vm2201_vm11, %v2300_v39, %v2299_v6  ;;  %v2330_v10 = vsel %vm2197_vm10, %v2329_v4, %v2328_v51  ;;  %v7918_v55 = vperm.slane %v7848_v52, %v6262_v34  ;;  %v2395_v1 = vperm.slane %v6406_v22, %v6290_v43  ;;  %v7936_v4 = vld [vmem:[#allocation45_spill] sm:$0xff] }
 0x65b   :  { %v2419_v13 = vsel %vm2189_vm8, %v2418_v32, %v2417_v58  ;;  %v2272_v36 = vsel %vm2205_vm12, %v2271_v25, %v2270_v61  ;;  %v2303_v60 = vsel %vm2205_vm12, %v2302_v38, %v2301_v47  ;;  %v2332_v11 = vsel %vm2201_vm11, %v2331_v57, %v2330_v10  ;;  %v7929_v32 = vld [vmem:[#allocation181_spill] sm:$0xff]  ;;  %v2148_v57 = vpop.permute.xlu2 %2147  ;;  %v7937_v25 = vld [vmem:[#allocation200_spill] sm:$0xff] }
 0x65c   :  { %v2392_v28 = vsel %vm2197_vm10, %v7918_v55, %v2390_v42  ;;  %v2393_v63 = vperm.slane %v7919_v15, %v6309_v8  ;;  %v2274_v45 = vsel %vm2209_vm13, %v2273_v18, %v2272_v36  ;;  %v7921_v16 = vperm.slane %v7920_v26, %v6309_v8  ;;  %v7933_v42 = vld [vmem:[#allocation214_spill] sm:$0xff] }
 0x65d   :  { %v2366_v7 = vperm.slane %v7922_v3, %v6269_v33  ;;  %v2421_v22 = vsel %vm2193_vm9, %v2420_v41, %v2419_v13  ;;  %v2364_v48 = vperm.slane %v7923_v53, %v6290_v43  ;;  %v2422_v20 = vperm.slane %v2139_v24, %v6262_v34  ;;  %v7928_v41 = vld [vmem:[#allocation194_spill] sm:$0xff] }
 0x65e   :  { %v2363_v52 = vsel %vm2201_vm11, %v7921_v16, %v2361_v40  ;;  %v2394_v18 = vsel %vm2201_vm11, %v2393_v63, %v2392_v28  ;;  %v7925_v56 = vperm.slane %v7924_v2, %v6269_v33  ;;  %v7927_v62 = vperm.slane %v7926_v12, %v6290_v43  ;;  %v2451_v63 = vld [vmem:[#allocation3] sm:$0xff] }
 0x65f   :  { %v2337_v35 = vperm.slane %v7928_v41, %v6318_v21  ;;  %v2396_v30 = vsel %vm2205_vm12, %v2395_v1, %v2394_v18  ;;  %v2306_v34 = vperm.slane %v7929_v32, %v6318_v21  ;;  %v2365_v6 = vsel %vm2205_vm12, %v2364_v48, %v2363_v52  ;;  %v7941_v48 = vld [vmem:[#allocation125_spill] sm:$0xff] }
 0x660   :  { %v2142_v61 = vpop.permute.xlu1 %2141  ;;  %v2305_v59 = vsel %vm2209_vm13, %v7925_v56, %v2303_v60  ;;  %v2334_v50 = vsel %vm2205_vm12, %v7927_v62, %v2332_v11  ;;  %v2423_v0 = vsel %vm2197_vm10, %v2422_v20, %v2421_v22  ;;  %v2426_v44 = vperm.slane %v2145_v14, %v6290_v43  ;;  %v7935_v43 = vld [vmem:[#allocation115_spill] sm:$0xff]  ;;  %v7939_v22 = vld [vmem:[#allocation120_spill] sm:$0xff]  ;;  %v7943_v12 = vld [vmem:[#allocation101_spill] sm:$0xff] }
 0x661   :  { %v2424_v46 = vperm.slane %v2142_v61, %v6309_v8  ;;  %v7930_v8 = vld [vmem:[#allocation190_spill] sm:$0xff]  ;;  %v7932_v27 = vperm.slane %v7931_v37, %v6318_v21  ;;  %v2367_v38 = vsel %vm2209_vm13, %v2366_v7, %v2365_v6  ;;  %v2307_v51 = vsel %vm2213_vm14, %v2306_v34, %v2305_v59  ;;  %v7940_v14 = vld [vmem:[#allocation131_spill] sm:$0xff]  ;;  %v7946_v37 = vld [vmem:[#allocation104_spill] sm:$0xff] }
 0x662   :  { %v2335_v9 = vperm.slane %v7930_v8, %v6269_v33  ;;  %v7934_v24 = vperm.slane %v7933_v42, %v6269_v33  ;;  %vm2436_vm2 = vcmask 1043459   ;;  %v2433_v39 = vsel %vm2432_vm0, %v6635_v23, %v7935_v43  ;;  %v7942_v56 = vld [vmem:[#allocation107_spill] sm:$0xff] }
 0x663   :  { %v2276_v29 = vsel %vm2213_vm14, %v7932_v27, %v2274_v45  ;;  %v2425_v54 = vsel %vm2201_vm11, %v2424_v46, %v2423_v0  ;;  %v2399_v31 = vperm.slane %v7936_v4, %v6318_v21  ;;  %vm2438_vm3 = vcmask 1044484   ;;  %v7945_v0 = vld [vmem:[#allocation126_spill] sm:$0xff]  ;;  %v7950_v4 = vld [vmem:[#allocation23_spill] sm:$0xff] }
 0x664   :  { %v2336_v49 = vsel %vm2209_vm13, %v2335_v9, %v2334_v50  ;;  %v2398_v19 = vsel %vm2209_vm13, %v7934_v24, %v2396_v30  ;;  %v2435_v58 = vsel %vm2434_vm1, %v2276_v29, %v2433_v39  ;;  %v2427_v17 = vsel %vm2205_vm12, %v2426_v44, %v2425_v54  ;;  %v7944_v50 = vld [vmem:[#allocation18_spill] sm:$0xff]  ;;  %v7947_v29 = vld [vmem:[#allocation133_spill] sm:$0xff] }
 0x665   :  { %v2338_v5 = vsel %vm2213_vm14, %v2337_v35, %v2336_v49  ;;  %v7938_v40 = vperm.slane %v7937_v25, %v6318_v21  ;;  %vm2440_vm4 = vcmask 1045509   ;;  %v2428_v47 = vperm.slane %v2148_v57, %v6269_v33  ;;  %v7949_v39 = vld [vmem:[#allocation122_spill] sm:$0xff] }
 0x666   :  { %v2400_v23 = vsel %vm2213_vm14, %v2399_v31, %v2398_v19  ;;  %v2437_v55 = vsel %vm2436_vm2, %v2307_v51, %v2435_v58  ;;  %vm2442_vm5 = vcmask 1046534   ;;  %vm2444_vm6 = vcmask 1047559   ;;  %v7948_v19 = vld [vmem:[#allocation129_spill] sm:$0xff] }
 0x667   :  { %v2369_v13 = vsel %vm2213_vm14, %v7938_v40, %v2367_v38  ;;  %v2439_v1 = vsel %vm2438_vm3, %v2338_v5, %v2437_v55  ;;  %v2429_v36 = vsel %vm2209_vm13, %v2428_v47, %v2427_v17  ;;  %v7952_v55 = vld [vmem:[#allocation135_spill] sm:$0xff] }
 0x668   :  { %v2151_v10 = vpop.permute.xlu1 %2150  ;;  %v2441_v60 = vsel %vm2440_vm4, %v2369_v13, %v2439_v1  ;;  %v7953_v1 = vld [vmem:[#allocation128_spill] sm:$0xff] }
 0x669   :  { %v2430_v28 = vperm.slane %v2151_v10, %v6318_v21  ;;  %v2443_v15 = vsel %vm2442_vm5, %v2400_v23, %v2441_v60  ;;  %v7951_v10 = vld [vmem:[#allocation35_spill] sm:$0xff] }
 0x66b   :  { %v2431_v11 = vsel %vm2213_vm14, %v2430_v28, %v2429_v36 }
 0x66c   :  { %v6776_v33 = vsel %vm2444_vm6, %v2431_v11, %v2443_v15 }
 0x66d   :  { %2452 = vmax.xlane.f32.xlu0 %v6776_v33 }
 0x6e0   :  { %v2453_v45 = vpop.xlane.xlu0 %2452 }
 0x6e1   :  { %v2454_v26 = vmax.f32 %v2451_v63, %v2453_v45 }
 0x6e3   :  { %v2859_v21 = vsub.f32 %v2451_v63, %v2454_v26  ;;  %3824 = vst.msk [vmem:[#allocation3] sm:$0xff] %vm65_vm15, %v2454_v26  ;;  %2457 = vperm.xlu2 %4024, %v2454_v26  }
 0x6e5   :  { %v2860_v16 = vmul.f32 1.442695, %v2859_v21  ;;  %v7954_v21 = vld [vmem:[#allocation37_spill] sm:$0xff] }
 0x6e7   :  { %4026 = vpow2.f32 %v2860_v16 }
 0x6ed   :  { %v4027_v52 = vpop.eup %4026 }
 0x6ee   :  { %2865 = vperm.xlu1 %4025, %v4027_v52   ;;  %v7955_v52 = vld [vmem:[#allocation136_spill] sm:$0xff] }
 0x73d   :  { %v6780_v3 = vpop.permute.xlu2 %2457 }
 0x73e   :  { %v6783_v7 = vperm.slane %v6780_v3, 0  ;;  %v6798_v35 = vperm.slane %v6780_v3, 1 }
 0x740   :  { %v2485_v61 = vsub.f32 %v7939_v22, %v6783_v7  ;;  %v2475_v53 = vsub.f32 %v7940_v14, %v6783_v7  ;;  %v2476_v18 = vsub.f32 %v7941_v48, %v6783_v7  ;;  %v2490_v59 = vsub.f32 %v7942_v56, %v6783_v7  ;;  %v7957_v56 = vld [vmem:[#allocation39_spill] sm:$0xff] }
 0x741   :  { %v2477_v62 = vsub.f32 %v7943_v12, %v6783_v7  ;;  %v2478_v41 = vsub.f32 %v7944_v50, %v6783_v7  ;;  %v2493_v44 = vsub.f32 %v7945_v0, %v6798_v35  ;;  %v2479_v27 = vsub.f32 %v7946_v37, %v6783_v7  ;;  %v7958_v12 = vld [vmem:[#allocation19_spill] sm:$0xff]  ;;  %v7959_v50 = vld [vmem:[#allocation138_spill] sm:$0xff] }
 0x742   :  { %v2623_v20 = vmul.f32 1.442695, %v2485_v61  ;;  %v2603_v46 = vmul.f32 1.442695, %v2475_v53  ;;  %v2605_v2 = vmul.f32 1.442695, %v2476_v18  ;;  %v2480_v38 = vsub.f32 %v7947_v29, %v6783_v7 }
 0x743   :  { %v2633_v30 = vmul.f32 1.442695, %v2490_v59  ;;  %v2607_v32 = vmul.f32 1.442695, %v2477_v62  ;;  %v2609_v8 = vmul.f32 1.442695, %v2478_v41  ;;  %v2496_v43 = vsub.f32 %v7948_v19, %v6798_v35 }
 0x744   :  { %4028 = vpow2.f32 %v2623_v20  ;;  %v2639_v54 = vmul.f32 1.442695, %v2493_v44  ;;  %v2611_v51 = vmul.f32 1.442695, %v2479_v27  ;;  %v2613_v57 = vmul.f32 1.442695, %v2480_v38 }
 0x745   :  { %4030 = vpow2.f32 %v2603_v46  ;;  %v2481_v5 = vsub.f32 %v7949_v39, %v6783_v7  ;;  %v2482_v31 = vsub.f32 %v7950_v4, %v6783_v7  ;;  %v2645_v58 = vmul.f32 1.442695, %v2496_v43  ;;  %v7956_v61 = vld [vmem:[#allocation124_spill] sm:$0xff]  ;;  %v7961_v27 = vld [vmem:[#allocation31_spill] sm:$0xff]  ;;  %v7963_v19 = vld [vmem:[#allocation141_spill] sm:$0xff] }
 0x746   :  { %4032 = vpow2.f32 %v2605_v2  ;;  %v2499_v23 = vsub.f32 %v7951_v10, %v6798_v35  ;;  %v2483_v28 = vsub.f32 %v7952_v55, %v6783_v7  ;;  %v2484_v36 = vsub.f32 %v7953_v1, %v6783_v7  ;;  %v7960_v44 = vld [vmem:[#allocation28_spill] sm:$0xff]  ;;  %v7965_v4 = vld [vmem:[#allocation142_spill] sm:$0xff]  ;;  %v7967_v55 = vld [vmem:[#allocation33_spill] sm:$0xff] }
 0x747   :  { %4034 = vpow2.f32 %v2633_v30  ;;  %v2615_v17 = vmul.f32 1.442695, %v2481_v5  ;;  %v2617_v40 = vmul.f32 1.442695, %v2482_v31  ;;  %v2502_v16 = vsub.f32 %v7954_v21, %v6798_v35  ;;  %v7962_v29 = vld [vmem:[#allocation140_spill] sm:$0xff]  ;;  %v7966_v10 = vld [vmem:[#allocation30_spill] sm:$0xff] }
 0x748   :  { %4036 = vpow2.f32 %v2607_v32  ;;  %v2651_v60 = vmul.f32 1.442695, %v2499_v23  ;;  %v2619_v11 = vmul.f32 1.442695, %v2483_v28  ;;  %v2621_v63 = vmul.f32 1.442695, %v2484_v36 }
 0x749   :  { %4038 = vpow2.f32 %v2609_v8  ;;  %v2486_v22 = vsub.f32 %v7955_v52, %v6783_v7  ;;  %v2487_v14 = vsub.f32 %v7956_v61, %v6783_v7  ;;  %v2657_v53 = vmul.f32 1.442695, %v2502_v16  ;;  %v7964_v39 = vld [vmem:[#allocation20_spill] sm:$0xff]  ;;  %v7969_v21 = vld [vmem:[#allocation47_spill] sm:$0xff]  ;;  %v7970_v52 = vld [vmem:[#allocation21_spill] sm:$0xff] }
 0x74a   :  { %v4029_v34 = vpop.eup %4028  ;;  %4040 = vpow2.f32 %v2639_v54  ;;  %v2505_v59 = vsub.f32 %v7957_v56, %v6798_v35  ;;  %v2488_v62 = vsub.f32 %v7958_v12, %v6783_v7  ;;  %v2489_v41 = vsub.f32 %v7959_v50, %v6783_v7  ;;  %v7968_v1 = vld [vmem:[#allocation144_spill] sm:$0xff]  ;;  %v7971_v61 = vld [vmem:[#allocation145_spill] sm:$0xff]  ;;  %v7974_v50 = vld [vmem:[#allocation147_spill] sm:$0xff] }
 0x74b   :  { %v4031_v9 = vpop.eup %4030  ;;  %2921 = vperm.xlu0 %4023, %v4029_v34   ;;  %4042 = vpow2.f32 %v2611_v51  ;;  %v2625_v48 = vmul.f32 1.442695, %v2486_v22  ;;  %v2627_v20 = vmul.f32 1.442695, %v2487_v14  ;;  %v6831_v30 = vperm.slane %v6780_v3, 2  ;;  %v7972_v56 = vld [vmem:[#allocation49_spill] sm:$0xff] }
 0x74c   :  { %v4033_v6 = vpop.eup %4032  ;;  %2871 = vperm.xlu2 %4024, %v4031_v9   ;;  %4044 = vpow2.f32 %v2613_v57  ;;  %v2663_v32 = vmul.f32 1.442695, %v2505_v59  ;;  %v2629_v34 = vmul.f32 1.442695, %v2488_v62  ;;  %v2631_v9 = vmul.f32 1.442695, %v2489_v41 }
 0x74d   :  { %2876 = vperm.xlu1 %4025, %v4033_v6   ;;  %v4035_v49 = vpop.eup %4034  ;;  %4046 = vpow2.f32 %v2645_v58  ;;  %v2508_v37 = vsub.f32 %v7960_v44, %v6831_v30  ;;  %v2491_v7 = vsub.f32 %v7961_v27, %v6798_v35  ;;  %v2492_v38 = vsub.f32 %v7962_v29, %v6798_v35  ;;  %v7973_v12 = vld [vmem:[#allocation109_spill] sm:$0xff] }
 0x74e   :  { %v4037_v42 = vpop.eup %4036  ;;  %4048 = vpow2.f32 %v2615_v17  ;;  %v2511_v43 = vsub.f32 %v7963_v19, %v6831_v30  ;;  %v2494_v5 = vsub.f32 %v7964_v39, %v6798_v35  ;;  %v2495_v31 = vsub.f32 %v7965_v4, %v6798_v35 }
 0x74f   :  { %v4039_v24 = vpop.eup %4038  ;;  %4050 = vpow2.f32 %v2617_v40  ;;  %v2669_v54 = vmul.f32 1.442695, %v2508_v37  ;;  %v2635_v51 = vmul.f32 1.442695, %v2491_v7  ;;  %v2637_v57 = vmul.f32 1.442695, %v2492_v38 }
 0x750   :  { %v4041_v25 = vpop.eup %4040  ;;  %4052 = vpow2.f32 %v2651_v60  ;;  %v2675_v58 = vmul.f32 1.442695, %v2511_v43  ;;  %v2641_v17 = vmul.f32 1.442695, %v2494_v5  ;;  %v2643_v40 = vmul.f32 1.442695, %v2495_v31 }
 0x751   :  { %v4043_v13 = vpop.eup %4042  ;;  %4054 = vpow2.f32 %v2619_v11  ;;  %v2514_v23 = vsub.f32 %v7966_v10, %v6831_v30  ;;  %v2497_v28 = vsub.f32 %v7967_v55, %v6798_v35  ;;  %v2498_v36 = vsub.f32 %v7968_v1, %v6798_v35  ;;  %v7975_v37 = vld [vmem:[#allocation38_spill] sm:$0xff]  ;;  %v7976_v7 = vld [vmem:[#allocation24_spill] sm:$0xff]  ;;  %v7978_v43 = vld [vmem:[#allocation55_spill] sm:$0xff] }
 0x752   :  { %v4045_v47 = vpop.eup %4044  ;;  %4056 = vpow2.f32 %v2621_v63  ;;  %v2517_v16 = vsub.f32 %v7969_v21, %v6831_v30  ;;  %v2500_v22 = vsub.f32 %v7970_v52, %v6798_v35  ;;  %v2501_v14 = vsub.f32 %v7971_v61, %v6798_v35  ;;  %v7977_v38 = vld [vmem:[#allocation148_spill] sm:$0xff]  ;;  %v7980_v31 = vld [vmem:[#allocation150_spill] sm:$0xff] }
 0x753   :  { %2946 = vperm.xlu0 %4023, %v4035_v49   ;;  %v4047_v15 = vpop.eup %4046  ;;  %4058 = vpow2.f32 %v2657_v53  ;;  %v2681_v60 = vmul.f32 1.442695, %v2514_v23  ;;  %v2647_v11 = vmul.f32 1.442695, %v2497_v28  ;;  %v2649_v63 = vmul.f32 1.442695, %v2498_v36 }
 0x754   :  { %2881 = vperm.xlu2 %4024, %v4037_v42   ;;  %v4049_v45 = vpop.eup %4048  ;;  %4060 = vpow2.f32 %v2625_v48  ;;  %v2687_v53 = vmul.f32 1.442695, %v2517_v16  ;;  %v2653_v48 = vmul.f32 1.442695, %v2500_v22  ;;  %v2520_v59 = vsub.f32 %v7972_v56, %v6831_v30  ;;  %v7981_v23 = vld [vmem:[#allocation44_spill] sm:$0xff]  ;;  %v7982_v28 = vld [vmem:[#allocation43_spill] sm:$0xff] }
 0x755   :  { %2886 = vperm.xlu1 %4025, %v4039_v24   ;;  %v4051_v26 = vpop.eup %4050  ;;  %4062 = vpow2.f32 %v2627_v20  ;;  %v2655_v20 = vmul.f32 1.442695, %v2501_v14  ;;  %v2503_v62 = vsub.f32 %v7973_v12, %v6798_v35  ;;  %v2504_v41 = vsub.f32 %v7974_v50, %v6798_v35  ;;  %v7984_v52 = vld [vmem:[#allocation46_spill] sm:$0xff]  ;;  %v7985_v61 = vld [vmem:[#allocation112_spill] sm:$0xff]  ;;  %v7987_v50 = vld [vmem:[#allocation63_spill] sm:$0xff] }
 0x756   :  { %v4053_v18 = vpop.eup %4052  ;;  %4064 = vpow2.f32 %v2663_v32  ;;  %v6864_v32 = vperm.slane %v6780_v3, 3  ;;  %v2506_v29 = vsub.f32 %v7976_v7, %v6798_v35  ;;  %v7979_v35 = vld [vmem:[#allocation26_spill] sm:$0xff]  ;;  %v2512_v1 = vsub.f32 %v7982_v28, %v6831_v30 }
 0x757   :  { %v4055_v46 = vpop.eup %4054  ;;  %4066 = vpow2.f32 %v2629_v34  ;;  %v2693_v34 = vmul.f32 1.442695, %v2520_v59  ;;  %v2509_v5 = vsub.f32 %v7979_v35, %v6831_v30  ;;  %v2515_v14 = vsub.f32 %v7985_v61, %v6831_v30 }
 0x758   :  { %v4057_v2 = vpop.eup %4056  ;;  %4068 = vpow2.f32 %v2631_v9  ;;  %v2523_v27 = vsub.f32 %v7975_v37, %v6864_v32  ;;  %v2526_v39 = vsub.f32 %v7978_v43, %v6864_v32  ;;  %v2529_v55 = vsub.f32 %v7981_v23, %v6864_v32  ;;  %v4291_v23 = vld [vmem:[#allocation8 + $0x18] sm:$0xff] }
 0x759   :  { %v4059_v8 = vpop.eup %4058  ;;  %4070 = vpow2.f32 %v2669_v54  ;;  %v2507_v54 = vsub.f32 %v7977_v38, %v6831_v30  ;;  %v2532_v22 = vsub.f32 %v7984_v52, %v6864_v32 }
 0x75a   :  { %v4061_v6 = vpop.eup %4060  ;;  %4072 = vpow2.f32 %v2635_v51  ;;  %v2699_v51 = vmul.f32 1.442695, %v2523_v27  ;;  %v4288_v27 = vld [vmem:[#allocation8] sm:$0xff] }
 0x75b   :  { %2961 = vperm.xlu0 %4023, %v4041_v25   ;;  %v4063_v0 = vpop.eup %4062  ;;  %4074 = vpow2.f32 %v2637_v57 }
 0x75c   :  { %2891 = vperm.xlu2 %4024, %v4043_v13   ;;  %v4065_v49 = vpop.eup %4064  ;;  %4076 = vpow2.f32 %v2675_v58  ;;  %v2510_v58 = vsub.f32 %v7980_v31, %v6831_v30 }
 0x75d   :  { %2896 = vperm.xlu1 %4025, %v4045_v47   ;;  %v4067_v42 = vpop.eup %4066  ;;  %4078 = vpow2.f32 %v2641_v17  ;;  %v2705_v17 = vmul.f32 1.442695, %v2526_v39 }
 0x75e   :  { %v4069_v24 = vpop.eup %4068  ;;  %4080 = vpow2.f32 %v2643_v40 }
 0x75f   :  { %v4071_v25 = vpop.eup %4070  ;;  %4082 = vpow2.f32 %v2681_v60  ;;  %v7983_v60 = vld [vmem:[#allocation151_spill] sm:$0xff] }
 0x760   :  { %v4073_v13 = vpop.eup %4072  ;;  %4084 = vpow2.f32 %v2647_v11  ;;  %v2513_v11 = vsub.f32 %v7983_v60, %v6831_v30  ;;  %v4292_v60 = vld [vmem:[#allocation8 + $0x20] sm:$0xff] }
 0x761   :  { %v4075_v47 = vpop.eup %4074  ;;  %4086 = vpow2.f32 %v2649_v63  ;;  %v2677_v63 = vmul.f32 1.442695, %v2512_v1 }
 0x762   :  { %4088 = vpow2.f32 %v2687_v53 }
 0x763   :  { %2976 = vperm.xlu0 %4023, %v4047_v15   ;;  %v4077_v15 = vpop.eup %4076  ;;  %4090 = vpow2.f32 %v2653_v48  ;;  %v7986_v48 = vld [vmem:[#allocation152_spill] sm:$0xff] }
 0x764   :  { %2901 = vperm.xlu2 %4024, %v4049_v45   ;;  %v4079_v45 = vpop.eup %4078  ;;  %4092 = vpow2.f32 %v2655_v20  ;;  %v6890_v20 = vpop.permute.xlu1 %2865 }
 0x765   :  { %2906 = vperm.xlu1 %4025, %v4051_v26   ;;  %v4081_v26 = vpop.eup %4080  ;;  %4094 = vpow2.f32 %v2693_v34 }
 0x76b   :  { %2991 = vperm.xlu0 %4023, %v4053_v18   ;;  %v4083_v18 = vpop.eup %4082 }
 0x76c   :  { %2911 = vperm.xlu2 %4024, %v4055_v46   ;;  %v4085_v46 = vpop.eup %4084 }
 0x76d   :  { %2916 = vperm.xlu1 %4025, %v4057_v2   ;;  %v4087_v2 = vpop.eup %4086 }
 0x76e   :  { %v4089_v9 = vpop.eup %4088 }
 0x773   :  { %3006 = vperm.xlu0 %4023, %v4059_v8   ;;  %v2659_v8 = vmul.f32 1.442695, %v2503_v62 }
 0x774   :  { %2926 = vperm.xlu2 %4024, %v4061_v6   ;;  %v2661_v6 = vmul.f32 1.442695, %v2504_v41  ;;  %v2535_v41 = vsub.f32 %v7987_v50, %v6864_v32 }
 0x775   :  { %2931 = vperm.xlu1 %4025, %v4063_v0   ;;  %v4091_v0 = vpop.eup %4090  ;;  %4096 = vpow2.f32 %v2659_v8  ;;  %v7988_v8 = vld [vmem:[#allocation32_spill] sm:$0xff] }
 0x776   :  { %v4093_v44 = vpop.eup %4092  ;;  %4098 = vpow2.f32 %v2661_v6 }
 0x777   :  { %v4095_v57 = vpop.eup %4094  ;;  %4100 = vpow2.f32 %v2699_v51 }
 0x77b   :  { %3021 = vperm.xlu0 %4023, %v4065_v49   ;;  %v2665_v49 = vmul.f32 1.442695, %v2506_v29  ;;  %v4289_v29 = vld [vmem:[#allocation8 + $0x8] sm:$0xff] }
 0x77c   :  { %2936 = vperm.xlu2 %4024, %v4067_v42   ;;  %v2667_v42 = vmul.f32 1.442695, %v2507_v54  ;;  %v2723_v54 = vmul.f32 1.442695, %v2535_v41 }
 0x77d   :  { %2941 = vperm.xlu1 %4025, %v4069_v24   ;;  %v4097_v24 = vpop.eup %4096  ;;  %4102 = vpow2.f32 %v2665_v49 }
 0x77e   :  { %v4099_v19 = vpop.eup %4098  ;;  %4104 = vpow2.f32 %v2667_v42 }
 0x77f   :  { %v4101_v40 = vpop.eup %4100  ;;  %4106 = vpow2.f32 %v2705_v17 }
 0x783   :  { %3036 = vperm.xlu0 %4023, %v4071_v25   ;;  %v2671_v25 = vmul.f32 1.442695, %v2509_v5  ;;  %v7990_v5 = vld [vmem:[#allocation65_spill] sm:$0xff] }
 0x784   :  { %2951 = vperm.xlu2 %4024, %v4073_v13   ;;  %v2673_v13 = vmul.f32 1.442695, %v2510_v58  ;;  %v2538_v31 = vsub.f32 %v7990_v5, %v6864_v32  ;;  %v7991_v58 = vld [vmem:[#allocation146_spill] sm:$0xff] }
 0x785   :  { %2956 = vperm.xlu1 %4025, %v4075_v47   ;;  %v4103_v47 = vpop.eup %4102  ;;  %4108 = vpow2.f32 %v2671_v25  ;;  %v2521_v17 = vsub.f32 %v7991_v58, %v6831_v30 }
 0x786   :  { %v4105_v10 = vpop.eup %4104  ;;  %4110 = vpow2.f32 %v2673_v13  ;;  %v2729_v28 = vmul.f32 1.442695, %v2538_v31 }
 0x787   :  { %v2695_v1 = vmul.f32 1.442695, %v2521_v17 }
 0x78b   :  { %3051 = vperm.xlu0 %4023, %v4077_v15   ;;  %v2711_v15 = vmul.f32 1.442695, %v2529_v55 }
 0x78c   :  { %2966 = vperm.xlu2 %4024, %v4079_v45   ;;  %v4107_v45 = vpop.eup %4106 }
 0x78d   :  { %2971 = vperm.xlu1 %4025, %v4081_v26   ;;  %v2679_v26 = vmul.f32 1.442695, %v2513_v11  ;;  %v4109_v21 = vpop.eup %4108  ;;  %4112 = vpow2.f32 %v2711_v15 }
 0x78e   :  { %v4111_v16 = vpop.eup %4110  ;;  %4114 = vpow2.f32 %v2677_v63 }
 0x78f   :  { %4116 = vpow2.f32 %v2679_v26 }
 0x793   :  { %3066 = vperm.xlu0 %4023, %v4083_v18   ;;  %v2516_v18 = vsub.f32 %v7986_v48, %v6831_v30  ;;  %v4113_v56 = vpop.eup %4112 }
 0x794   :  { %2981 = vperm.xlu2 %4024, %v4085_v46   ;;  %v2717_v46 = vmul.f32 1.442695, %v2532_v22  ;;  %v4115_v12 = vpop.eup %4114  ;;  %v7994_v22 = vld [vmem:[#allocation36_spill] sm:$0xff] }
 0x795   :  { %2986 = vperm.xlu1 %4025, %v4087_v2   ;;  %v2683_v2 = vmul.f32 1.442695, %v2515_v14  ;;  %v2685_v59 = vmul.f32 1.442695, %v2516_v18  ;;  %v4117_v62 = vpop.eup %4116  ;;  %v2524_v61 = vsub.f32 %v7994_v22, %v6864_v32 }
 0x796   :  { %4118 = vpow2.f32 %v2717_v46  ;;  %v4293_v46 = vld [vmem:[#allocation8 + $0x28] sm:$0xff] }
 0x797   :  { %4120 = vpow2.f32 %v2683_v2 }
 0x798   :  { %4122 = vpow2.f32 %v2685_v59  ;;  %v2701_v59 = vmul.f32 1.442695, %v2524_v61 }
 0x799   :  { %4124 = vpow2.f32 %v2723_v54 }
 0x79b   :  { %3081 = vperm.xlu0 %4023, %v4089_v9   ;;  %v2518_v9 = vsub.f32 %v7988_v8, %v6831_v30 }
 0x79c   :  { %2996 = vperm.xlu2 %4024, %v4091_v0   ;;  %v7989_v0 = vld [vmem:[#allocation153_spill] sm:$0xff]  ;;  %v4119_v49 = vpop.eup %4118 }
 0x79d   :  { %3001 = vperm.xlu1 %4025, %v4093_v44   ;;  %v2519_v44 = vsub.f32 %v7989_v0, %v6831_v30  ;;  %v2689_v51 = vmul.f32 1.442695, %v2518_v9  ;;  %v4121_v43 = vpop.eup %4120 }
 0x79e   :  { %v4123_v39 = vpop.eup %4122 }
 0x79f   :  { %4126 = vpow2.f32 %v2689_v51 }
 0x7a3   :  { %3096 = vperm.xlu0 %4023, %v4095_v57   ;;  %v4290_v57 = vld [vmem:[#allocation8 + $0x10] sm:$0xff] }
 0x7a4   :  { %3011 = vperm.xlu2 %4024, %v4097_v24  }
 0x7a5   :  { %3016 = vperm.xlu1 %4025, %v4099_v19   ;;  %v2691_v19 = vmul.f32 1.442695, %v2519_v44 }
 0x7a6   :  { %v2872_v4 = vpop.permute.xlu2 %2871 }
 0x7a7   :  { %v3509_v7 = vmul.f32 %v4288_v27, %v2872_v4  ;;  %4128 = vpow2.f32 %v2691_v19 }
 0x7a8   :  { %4130 = vpow2.f32 %v2729_v28 }
 0x7a9   :  { %4132 = vpow2.f32 %v2695_v1 }
 0x7ab   :  { %3111 = vperm.xlu0 %4023, %v4101_v40   ;;  %v7992_v40 = vld [vmem:[#allocation154_spill] sm:$0xff] }
 0x7ac   :  { %3026 = vperm.xlu2 %4024, %v4103_v47   ;;  %v2522_v13 = vsub.f32 %v7992_v40, %v6831_v30  ;;  %v7993_v30 = vld [vmem:[#allocation113_spill] sm:$0xff] }
 0x7ad   :  { %3031 = vperm.xlu1 %4025, %v4105_v10   ;;  %v6909_v10 = vperm.slane %v6780_v3, 4 }
 0x7ae   :  { %v2882_v36 = vpop.permute.xlu2 %2881  ;;  %v2697_v63 = vmul.f32 1.442695, %v2522_v13  ;;  %v7999_v13 = vld [vmem:[#allocation60_spill] sm:$0xff] }
 0x7af   :  { %v3511_v42 = vmul.f32 %v4290_v57, %v2882_v36  ;;  %v4125_v36 = vpop.eup %4124  ;;  %v4295_v57 = vld [vmem:[#allocation8 + $0x38] sm:$0xff] }
 0x7b0   :  { %4134 = vpow2.f32 %v2697_v63 }
 0x7b3   :  { %3126 = vperm.xlu0 %4023, %v4107_v45   ;;  %v4127_v45 = vpop.eup %4126 }
 0x7b4   :  { %3041 = vperm.xlu2 %4024, %v4109_v21   ;;  %v4129_v26 = vpop.eup %4128 }
 0x7b5   :  { %3046 = vperm.xlu1 %4025, %v4111_v16   ;;  %v2541_v16 = vsub.f32 %v7993_v30, %v6909_v10 }
 0x7b6   :  { %v2892_v53 = vpop.permute.xlu2 %2891 }
 0x7b7   :  { %v3513_v11 = vmul.f32 %v4292_v60, %v2892_v53  ;;  %v7995_v53 = vld [vmem:[#allocation155_spill] sm:$0xff] }
 0x7b8   :  { %v2525_v48 = vsub.f32 %v7995_v53, %v6864_v32 }
 0x7ba   :  { %v2703_v8 = vmul.f32 1.442695, %v2525_v48  ;;  %v4299_v48 = vld [vmem:[#allocation8 + $0x58] sm:$0xff] }
 0x7bb   :  { %3141 = vperm.xlu0 %4023, %v4113_v56   ;;  %v2735_v56 = vmul.f32 1.442695, %v2541_v16 }
 0x7bc   :  { %3056 = vperm.xlu2 %4024, %v4115_v12   ;;  %v4131_v12 = vpop.eup %4130 }
 0x7bd   :  { %3061 = vperm.xlu1 %4025, %v4117_v62   ;;  %v6894_v34 = vpop.permute.xlu0 %2921  ;;  %v4294_v62 = vld [vmem:[#allocation8 + $0x30] sm:$0xff]  ;;  %v4133_v9 = vpop.eup %4132  ;;  %4136 = vpow2.f32 %v2735_v56 }
 0x7be   :  { %v2902_v6 = vpop.permute.xlu2 %2901  ;;  %v4135_v0 = vpop.eup %4134  ;;  %4138 = vpow2.f32 %v2701_v59 }
 0x7bf   :  { %v2877_v37 = vpop.permute.xlu1 %2876  ;;  %v3515_v50 = vmul.f32 %v4294_v62, %v2902_v6  ;;  %4140 = vpow2.f32 %v2703_v8  ;;  %v7998_v6 = vld [vmem:[#allocation156_spill] sm:$0xff] }
 0x7c0   :  { %v3510_v38 = vmul.f32 %v4289_v29, %v2877_v37  ;;  %v7996_v37 = vld [vmem:[#allocation71_spill] sm:$0xff]  ;;  %v7997_v29 = vld [vmem:[#allocation149_spill] sm:$0xff]  ;;  %v2528_v51 = vsub.f32 %v7998_v6, %v6864_v32 }
 0x7c1   :  { %v2544_v27 = vsub.f32 %v7996_v37, %v6909_v10 }
 0x7c2   :  { %v3637_v24 = vadd.f32 %v3510_v38, %v3509_v7  ;;  %v2527_v38 = vsub.f32 %v7997_v29, %v6864_v32  ;;  %v2709_v31 = vmul.f32 1.442695, %v2528_v51  ;;  %v4301_v29 = vld [vmem:[#allocation8 + $0x68] sm:$0xff] }
 0x7c3   :  { %3156 = vperm.xlu0 %4023, %v4119_v49  }
 0x7c4   :  { %3071 = vperm.xlu2 %4024, %v4121_v43   ;;  %v3638_v35 = vadd.f32 %v3637_v24, %v3511_v42  ;;  %v2741_v24 = vmul.f32 1.442695, %v2544_v27  ;;  %v2707_v19 = vmul.f32 1.442695, %v2527_v38  ;;  %v4137_v43 = vpop.eup %4136 }
 0x7c5   :  { %3076 = vperm.xlu1 %4025, %v4123_v39   ;;  %v6902_v4 = vpop.permute.xlu0 %2946  ;;  %v4296_v39 = vld [vmem:[#allocation8 + $0x40] sm:$0xff]  ;;  %v4139_v58 = vpop.eup %4138 }
 0x7c6   :  { %v2912_v25 = vpop.permute.xlu2 %2911  ;;  %v4141_v17 = vpop.eup %4140  ;;  %4142 = vpow2.f32 %v2741_v24  ;;  %v8005_v24 = vld [vmem:[#allocation64_spill] sm:$0xff] }
 0x7c7   :  { %v2887_v47 = vpop.permute.xlu1 %2886  ;;  %4144 = vpow2.f32 %v2707_v19  ;;  %v2553_v19 = vsub.f32 %v8005_v24, %v6909_v10  ;;  %v4308_v24 = vld [vmem:[#allocation8 + $0xa0] sm:$0xff] }
 0x7c8   :  { %v3512_v55 = vmul.f32 %v4291_v23, %v2887_v47  ;;  %v2547_v47 = vsub.f32 %v7999_v13, %v6909_v10  ;;  %4146 = vpow2.f32 %v2709_v31 }
 0x7ca   :  { %v3639_v15 = vadd.f32 %v3638_v35, %v3512_v55  ;;  %v3517_v35 = vmul.f32 %v4296_v39, %v2912_v25  ;;  %v8000_v55 = vld [vmem:[#allocation42_spill] sm:$0xff]  ;;  %v8001_v25 = vld [vmem:[#allocation157_spill] sm:$0xff]  ;;  %v2747_v63 = vmul.f32 1.442695, %v2547_v47  ;;  %v2759_v47 = vmul.f32 1.442695, %v2553_v19 }
 0x7cb   :  { %3171 = vperm.xlu0 %4023, %v4125_v36   ;;  %v2530_v28 = vsub.f32 %v8000_v55, %v6864_v32  ;;  %v2531_v36 = vsub.f32 %v8001_v25, %v6864_v32  ;;  %v8006_v39 = vld [vmem:[#allocation61_spill] sm:$0xff]  ;;  %v4303_v25 = vld [vmem:[#allocation8 + $0x78] sm:$0xff] }
 0x7cc   :  { %3086 = vperm.xlu2 %4024, %v4127_v45   ;;  %v3640_v21 = vadd.f32 %v3639_v15, %v3513_v11  ;;  %v4297_v11 = vld [vmem:[#allocation8 + $0x48] sm:$0xff]  ;;  %4148 = vpow2.f32 %v2747_v63 }
 0x7cd   :  { %3091 = vperm.xlu1 %4025, %v4129_v26   ;;  %v6913_v52 = vpop.permute.xlu0 %2961  ;;  %v2713_v45 = vmul.f32 1.442695, %v2530_v28  ;;  %v4143_v26 = vpop.eup %4142  ;;  %v2715_v22 = vmul.f32 1.442695, %v2531_v36  ;;  %v3524_v36 = vmul.f32 %v4303_v25, %v6902_v4 }
 0x7ce   :  { %v6917_v14 = vpop.permute.xlu2 %2926  ;;  %v4145_v61 = vpop.eup %4144 }
 0x7cf   :  { %v2897_v18 = vpop.permute.xlu1 %2896  ;;  %v4147_v53 = vpop.eup %4146  ;;  %4150 = vpow2.f32 %v2713_v45 }
 0x7d0   :  { %v3514_v2 = vmul.f32 %v4293_v46, %v2897_v18  ;;  %v3520_v18 = vmul.f32 %v4299_v48, %v6917_v14  ;;  %4152 = vpow2.f32 %v2715_v22  ;;  %v8010_v22 = vld [vmem:[#allocation160_spill] sm:$0xff]  ;;  %v4304_v48 = vld [vmem:[#allocation8 + $0x80] sm:$0xff] }
 0x7d2   :  { %v3641_v41 = vadd.f32 %v3640_v21, %v3514_v2  ;;  %v4298_v21 = vld [vmem:[#allocation8 + $0x50] sm:$0xff]  ;;  %v8002_v2 = vld [vmem:[#allocation62_spill] sm:$0xff]  ;;  %v4149_v27 = vpop.eup %4148 }
 0x7d3   :  { %3186 = vperm.xlu0 %4023, %v4131_v12   ;;  %v3519_v30 = vmul.f32 %v4298_v21, %v6894_v34  ;;  %v2550_v56 = vsub.f32 %v8002_v2, %v6909_v10  ;;  %v8003_v34 = vld [vmem:[#allocation106_spill] sm:$0xff] }
 0x7d4   :  { %3101 = vperm.xlu2 %4024, %v4133_v9   ;;  %v3642_v44 = vadd.f32 %v3641_v41, %v3515_v50  ;;  %v2533_v12 = vsub.f32 %v8003_v34, %v6864_v32  ;;  %v8004_v41 = vld [vmem:[#allocation158_spill] sm:$0xff]  ;;  %v4300_v9 = vld [vmem:[#allocation8 + $0x60] sm:$0xff] }
 0x7d5   :  { %3106 = vperm.xlu1 %4025, %v4135_v0   ;;  %v6923_v7 = vpop.permute.xlu0 %2976  ;;  %v2534_v14 = vsub.f32 %v8004_v41, %v6864_v32 }
 0x7d6   :  { %v2937_v54 = vpop.permute.xlu2 %2936  ;;  %v2719_v37 = vmul.f32 1.442695, %v2533_v12 }
 0x7d7   :  { %v2907_v49 = vpop.permute.xlu1 %2906  ;;  %v3522_v38 = vmul.f32 %v4301_v29, %v2937_v54  ;;  %v2721_v51 = vmul.f32 1.442695, %v2534_v14  ;;  %v8007_v54 = vld [vmem:[#allocation159_spill] sm:$0xff] }
 0x7d8   :  { %v3516_v42 = vmul.f32 %v4295_v57, %v2907_v49  ;;  %v4151_v49 = vpop.eup %4150  ;;  %v2537_v31 = vsub.f32 %v8007_v54, %v6864_v32 }
 0x7d9   :  { %v4153_v57 = vpop.eup %4152 }
 0x7da   :  { %v3643_v5 = vadd.f32 %v3642_v44, %v3516_v42  ;;  %v2753_v44 = vmul.f32 1.442695, %v2550_v56 }
 0x7db   :  { %3201 = vperm.xlu0 %4023, %v4137_v43  }
 0x7dc   :  { %3116 = vperm.xlu2 %4024, %v4139_v58   ;;  %v3644_v40 = vadd.f32 %v3643_v5, %v3517_v35  ;;  %4154 = vpow2.f32 %v2753_v44  ;;  %v2536_v35 = vsub.f32 %v8006_v39, %v6864_v32  ;;  %v8008_v32 = vld [vmem:[#allocation66_spill] sm:$0xff] }
 0x7dd   :  { %3121 = vperm.xlu1 %4025, %v4141_v17   ;;  %v6931_v23 = vpop.permute.xlu0 %2991  ;;  %4156 = vpow2.f32 %v2719_v37  ;;  %v6962_v17 = vperm.slane %v6780_v3, 5  ;;  %v4307_v44 = vld [vmem:[#allocation8 + $0x98] sm:$0xff] }
 0x7de   :  { %v6935_v1 = vpop.permute.xlu2 %2951  ;;  %4158 = vpow2.f32 %v2721_v51  ;;  %v2725_v55 = vmul.f32 1.442695, %v2536_v35 }
 0x7df   :  { %v2917_v60 = vpop.permute.xlu1 %2916  ;;  %4160 = vpow2.f32 %v2759_v47 }
 0x7e0   :  { %v3518_v15 = vmul.f32 %v4297_v11, %v2917_v60  ;;  %v2727_v11 = vmul.f32 1.442695, %v2537_v31  ;;  %4162 = vpow2.f32 %v2725_v55  ;;  %v4309_v31 = vld [vmem:[#allocation8 + $0xa8] sm:$0xff] }
 0x7e2   :  { %v3645_v16 = vadd.f32 %v3644_v40, %v3518_v15  ;;  %v4302_v40 = vld [vmem:[#allocation8 + $0x70] sm:$0xff]  ;;  %v4155_v28 = vpop.eup %4154  ;;  %4164 = vpow2.f32 %v2727_v11 }
 0x7e3   :  { %3216 = vperm.xlu0 %4023, %v4143_v26   ;;  %v4157_v15 = vpop.eup %4156  ;;  %v2556_v26 = vsub.f32 %v8008_v32, %v6962_v17 }
 0x7e4   :  { %v3646_v46 = vadd.f32 %v3645_v16, %v3519_v30  ;;  %3131 = vperm.xlu2 %4024, %v4145_v61   ;;  %v4159_v63 = vpop.eup %4158  ;;  %v8009_v30 = vld [vmem:[#allocation110_spill] sm:$0xff]  ;;  %v2540_v61 = vsub.f32 %v8010_v22, %v6909_v10 }
 0x7e5   :  { %3136 = vperm.xlu1 %4025, %v4147_v53   ;;  %v6943_v59 = vpop.permute.xlu0 %3006  ;;  %v2539_v16 = vsub.f32 %v8009_v30, %v6909_v10  ;;  %v2765_v56 = vmul.f32 1.442695, %v2556_v26  ;;  %v4161_v12 = vpop.eup %4160  ;;  %v8016_v30 = vld [vmem:[#allocation162_spill] sm:$0xff] }
 0x7e6   :  { %v6947_v62 = vpop.permute.xlu2 %2966  ;;  %v3647_v50 = vadd.f32 %v3646_v46, %v3520_v18  ;;  %v3525_v18 = vmul.f32 %v4304_v48, %v6935_v1  ;;  %v4305_v46 = vld [vmem:[#allocation8 + $0x88] sm:$0xff]  ;;  %v4311_v22 = vld [vmem:[#allocation8 + $0xb8] sm:$0xff] }
 0x7e7   :  { %v2932_v8 = vpop.permute.xlu1 %2931  ;;  %v2731_v34 = vmul.f32 1.442695, %v2539_v16  ;;  %v3528_v37 = vmul.f32 %v4307_v44, %v6947_v62  ;;  %4166 = vpow2.f32 %v2765_v56  ;;  %v8011_v1 = vld [vmem:[#allocation68_spill] sm:$0xff] }
 0x7e8   :  { %v3521_v0 = vmul.f32 %v4300_v9, %v2932_v8  ;;  %v2733_v8 = vmul.f32 1.442695, %v2540_v61  ;;  %v4163_v9 = vpop.eup %4162  ;;  %v2559_v29 = vsub.f32 %v8011_v1, %v6962_v17 }
 0x7e9   :  { %4168 = vpow2.f32 %v2731_v34 }
 0x7ea   :  { %v3648_v6 = vadd.f32 %v3647_v50, %v3521_v0  ;;  %v4306_v50 = vld [vmem:[#allocation8 + $0x90] sm:$0xff]  ;;  %v4165_v0 = vpop.eup %4164  ;;  %4170 = vpow2.f32 %v2733_v8  ;;  %v2771_v39 = vmul.f32 1.442695, %v2559_v29  ;;  %v8019_v29 = vld [vmem:[#allocation163_spill] sm:$0xff] }
 0x7eb   :  { %3231 = vperm.xlu0 %4023, %v4149_v27   ;;  %v3527_v41 = vmul.f32 %v4306_v50, %v6913_v52  ;;  %v8012_v52 = vld [vmem:[#allocation52_spill] sm:$0xff] }
 0x7ec   :  { %3146 = vperm.xlu2 %4024, %v4151_v49   ;;  %v3649_v42 = vadd.f32 %v3648_v6, %v3522_v38  ;;  %v2542_v6 = vsub.f32 %v8012_v52, %v6909_v10  ;;  %4172 = vpow2.f32 %v2771_v39 }
 0x7ed   :  { %3151 = vperm.xlu1 %4025, %v4153_v57   ;;  %v6953_v43 = vpop.permute.xlu0 %3021  ;;  %v8013_v57 = vld [vmem:[#allocation161_spill] sm:$0xff]  ;;  %v4167_v54 = vpop.eup %4166 }
 0x7ee   :  { %v6957_v5 = vpop.permute.xlu2 %2981  ;;  %v2543_v62 = vsub.f32 %v8013_v57, %v6909_v10  ;;  %v2737_v35 = vmul.f32 1.442695, %v2542_v6  ;;  %v4314_v6 = vld [vmem:[#allocation8 + $0xd0] sm:$0xff] }
 0x7ef   :  { %v2942_v58 = vpop.permute.xlu1 %2941  ;;  %v4169_v47 = vpop.eup %4168 }
 0x7f0   :  { %v3523_v13 = vmul.f32 %v4302_v40, %v2942_v58  ;;  %v3530_v58 = vmul.f32 %v4309_v31, %v6923_v7  ;;  %v4171_v55 = vpop.eup %4170  ;;  %4174 = vpow2.f32 %v2737_v35  ;;  %v8015_v7 = vld [vmem:[#allocation69_spill] sm:$0xff] }
 0x7f2   :  { %v3650_v60 = vadd.f32 %v3649_v42, %v3523_v13  ;;  %v2739_v13 = vmul.f32 1.442695, %v2543_v62 }
 0x7f3   :  { %3246 = vperm.xlu0 %4023, %v4155_v28   ;;  %v4310_v28 = vld [vmem:[#allocation8 + $0xb0] sm:$0xff] }
 0x7f4   :  { %v6965_v45 = vadd.f32 %v3650_v60, %v3524_v36  ;;  %3161 = vperm.xlu2 %4024, %v4157_v15   ;;  %v3531_v25 = vmul.f32 %v4310_v28, %v6957_v5  ;;  %v8014_v60 = vld [vmem:[#allocation70_spill] sm:$0xff]  ;;  %4176 = vpow2.f32 %v2739_v13  ;;  %v2546_v5 = vsub.f32 %v8016_v30, %v6909_v10  ;;  %v4317_v30 = vld [vmem:[#allocation8 + $0xe8] sm:$0xff] }
 0x7f5   :  { %3166 = vperm.xlu1 %4025, %v4159_v63   ;;  %v6969_v21 = vpop.permute.xlu0 %3036  ;;  %v2562_v11 = vsub.f32 %v8014_v60, %v6962_v17  ;;  %v2545_v63 = vsub.f32 %v8015_v7, %v6909_v10 }
 0x7f6   :  { %v6973_v4 = vpop.permute.xlu2 %2996  ;;  %v2745_v34 = vmul.f32 1.442695, %v2546_v5 }
 0x7f7   :  { %v2957_v53 = vpop.permute.xlu1 %2956  ;;  %v2743_v48 = vmul.f32 1.442695, %v2545_v63 }
 0x7f8   :  { %v3526_v2 = vmul.f32 %v4305_v46, %v2957_v53  ;;  %v2777_v53 = vmul.f32 1.442695, %v2562_v11  ;;  %v4312_v46 = vld [vmem:[#allocation8 + $0xc0] sm:$0xff] }
 0x7fa   :  { %v3658_v14 = vadd.f32 %v3526_v2, %v3525_v18  ;;  %v4173_v18 = vpop.eup %4172  ;;  %v3533_v2 = vmul.f32 %v4312_v46, %v6931_v23  ;;  %4178 = vpow2.f32 %v2777_v53  ;;  %v8018_v23 = vld [vmem:[#allocation58_spill] sm:$0xff]  ;;  %v4318_v53 = vld [vmem:[#allocation8 + $0xf0] sm:$0xff] }
 0x7fb   :  { %3261 = vperm.xlu0 %4023, %v4161_v12   ;;  %v4175_v12 = vpop.eup %4174  ;;  %4180 = vpow2.f32 %v2743_v48  ;;  %v3539_v48 = vmul.f32 %v4318_v53, %v6953_v43  ;;  %v8024_v43 = vld [vmem:[#allocation77_spill] sm:$0xff] }
 0x7fc   :  { %v3659_v27 = vadd.f32 %v3658_v14, %v3527_v41  ;;  %3176 = vperm.xlu2 %4024, %v4163_v9   ;;  %v4177_v50 = vpop.eup %4176  ;;  %v4313_v41 = vld [vmem:[#allocation8 + $0xc8] sm:$0xff]  ;;  %4182 = vpow2.f32 %v2745_v34 }
 0x7fd   :  { %3181 = vperm.xlu1 %4025, %v4165_v0   ;;  %v6982_v38 = vpop.permute.xlu0 %3051  ;;  %v3534_v14 = vmul.f32 %v4313_v41, %v6973_v4  ;;  %v8017_v9 = vld [vmem:[#allocation72_spill] sm:$0xff]  ;;  %v2549_v4 = vsub.f32 %v8019_v29, %v6909_v10 }
 0x7fe   :  { %v6986_v51 = vpop.permute.xlu2 %3011  ;;  %v3660_v49 = vadd.f32 %v3659_v27, %v3528_v37  ;;  %v2565_v0 = vsub.f32 %v8017_v9, %v6962_v17  ;;  %v2548_v37 = vsub.f32 %v8018_v23, %v6909_v10  ;;  %v2554_v9 = vsub.f32 %v8024_v43, %v6909_v10  ;;  %v4325_v43 = vld [vmem:[#allocation8 + $0x128] sm:$0xff] }
 0x7ff   :  { %v2972_v42 = vpop.permute.xlu1 %2971  ;;  %v2751_v35 = vmul.f32 1.442695, %v2549_v4  ;;  %v4320_v4 = vld [vmem:[#allocation8 + $0x108] sm:$0xff] }
 0x800   :  { %v3529_v19 = vmul.f32 %v4308_v24, %v2972_v42  ;;  %v2783_v57 = vmul.f32 1.442695, %v2565_v0  ;;  %v2749_v62 = vmul.f32 1.442695, %v2548_v37  ;;  %v4179_v42 = vpop.eup %4178  ;;  %v4315_v24 = vld [vmem:[#allocation8 + $0xd8] sm:$0xff] }
 0x802   :  { %v3661_v40 = vadd.f32 %v3660_v49, %v3529_v19  ;;  %v3536_v19 = vmul.f32 %v4315_v24, %v6943_v59  ;;  %4184 = vpow2.f32 %v2783_v57  ;;  %v8021_v59 = vld [vmem:[#allocation75_spill] sm:$0xff] }
 0x803   :  { %3276 = vperm.xlu0 %4023, %v4167_v54   ;;  %v4181_v54 = vpop.eup %4180  ;;  %4186 = vpow2.f32 %v2749_v62 }
 0x804   :  { %v3662_v36 = vadd.f32 %v3661_v40, %v3530_v58  ;;  %3191 = vperm.xlu2 %4024, %v4169_v47   ;;  %v4183_v31 = vpop.eup %4182  ;;  %v4316_v58 = vld [vmem:[#allocation8 + $0xe0] sm:$0xff]  ;;  %v8020_v47 = vld [vmem:[#allocation74_spill] sm:$0xff]  ;;  %4188 = vpow2.f32 %v2751_v35 }
 0x805   :  { %3196 = vperm.xlu1 %4025, %v4171_v55   ;;  %v6994_v15 = vpop.permute.xlu0 %3066  ;;  %v3537_v40 = vmul.f32 %v4316_v58, %v6986_v51  ;;  %v2568_v55 = vsub.f32 %v8020_v47, %v6962_v17  ;;  %v8022_v51 = vld [vmem:[#allocation164_spill] sm:$0xff] }
 0x806   :  { %v6998_v32 = vpop.permute.xlu2 %3026  ;;  %v3663_v26 = vadd.f32 %v3662_v36, %v3531_v25  ;;  %v2551_v25 = vsub.f32 %v8021_v59, %v6909_v10  ;;  %v3652_v36 = vrot.slane %v6965_v45, 4  ;;  %v2552_v7 = vsub.f32 %v8022_v51, %v6909_v10  ;;  %v8027_v59 = vld [vmem:[#allocation121_spill] sm:$0xff] }
 0x807   :  { %v2987_v16 = vpop.permute.xlu1 %2986 }
 0x808   :  { %v3532_v61 = vmul.f32 %v4311_v22, %v2987_v16  ;;  %v2789_v16 = vmul.f32 1.442695, %v2568_v55  ;;  %v2755_v22 = vmul.f32 1.442695, %v2551_v25  ;;  %v2557_v25 = vsub.f32 %v8027_v59, %v6962_v17 }
 0x80a   :  { %v3664_v56 = vadd.f32 %v3663_v26, %v3532_v61  ;;  %v7028_v26 = vperm.slane %v6780_v3, 6  ;;  %v4185_v61 = vpop.eup %4184  ;;  %4190 = vpow2.f32 %v2789_v16  ;;  %v2767_v53 = vmul.f32 1.442695, %v2557_v25 }
 0x80b   :  { %3291 = vperm.xlu0 %4023, %v4173_v18   ;;  %v3653_v18 = vadd.f32 %v3652_v36, %v6965_v45  ;;  %4192 = vpow2.f32 %v2755_v22  ;;  %v8025_v45 = vld [vmem:[#allocation165_spill] sm:$0xff]  ;;  %v8028_v36 = vld [vmem:[#allocation166_spill] sm:$0xff] }
 0x80c   :  { %v3665_v8 = vadd.f32 %v3664_v56, %v3533_v2  ;;  %3206 = vperm.xlu2 %4024, %v4175_v12   ;;  %v2757_v2 = vmul.f32 1.442695, %v2552_v7  ;;  %v4187_v56 = vpop.eup %4186  ;;  %v4319_v12 = vld [vmem:[#allocation8 + $0xf8] sm:$0xff]  ;;  %v2555_v0 = vsub.f32 %v8025_v45, %v6962_v17 }
 0x80d   :  { %3211 = vperm.xlu1 %4025, %v4177_v50   ;;  %v7006_v44 = vpop.permute.xlu0 %3081  ;;  %v4189_v34 = vpop.eup %4188  ;;  %v3540_v50 = vmul.f32 %v4319_v12, %v6998_v32  ;;  %v3654_v23 = vrot.slane %v3653_v18, 2 }
 0x80e   :  { %v7010_v27 = vpop.permute.xlu2 %3041  ;;  %v3666_v1 = vadd.f32 %v3665_v8, %v3534_v14  ;;  %v8023_v14 = vld [vmem:[#allocation76_spill] sm:$0xff]  ;;  %4194 = vpow2.f32 %v2757_v2  ;;  %v2763_v10 = vmul.f32 1.442695, %v2555_v0  ;;  %v4324_v2 = vld [vmem:[#allocation8 + $0x120] sm:$0xff] }
 0x80f   :  { %v3002_v52 = vpop.permute.xlu1 %3001  ;;  %v2571_v8 = vsub.f32 %v8023_v14, %v7028_v26 }
 0x810   :  { %v3535_v49 = vmul.f32 %v4314_v6, %v3002_v52  ;;  %v3542_v52 = vmul.f32 %v4320_v4, %v6969_v21  ;;  %v4191_v24 = vpop.eup %4190  ;;  %v8026_v21 = vld [vmem:[#allocation78_spill] sm:$0xff]  ;;  %v8031_v4 = vld [vmem:[#allocation167_spill] sm:$0xff] }
 0x811   :  { %v2795_v62 = vmul.f32 1.442695, %v2571_v8  ;;  %v4193_v58 = vpop.eup %4192  ;;  %v2574_v55 = vsub.f32 %v8026_v21, %v7028_v26 }
 0x812   :  { %v3667_v39 = vadd.f32 %v3666_v1, %v3535_v49  ;;  %v4321_v49 = vld [vmem:[#allocation8 + $0x100] sm:$0xff] }
 0x813   :  { %3306 = vperm.xlu0 %4023, %v4179_v42   ;;  %v2761_v42 = vmul.f32 1.442695, %v2554_v9  ;;  %4196 = vpow2.f32 %v2795_v62  ;;  %v2801_v22 = vmul.f32 1.442695, %v2574_v55 }
 0x814   :  { %v3668_v13 = vadd.f32 %v3667_v39, %v3536_v19  ;;  %3221 = vperm.xlu2 %4024, %v4181_v54   ;;  %v3655_v19 = vadd.f32 %v3654_v23, %v3653_v18  ;;  %v4322_v39 = vld [vmem:[#allocation8 + $0x110] sm:$0xff] }
 0x815   :  { %3226 = vperm.xlu1 %4025, %v4183_v31   ;;  %v7018_v28 = vpop.permute.xlu0 %3096  ;;  %v3543_v35 = vmul.f32 %v4322_v39, %v7010_v27  ;;  %4198 = vpow2.f32 %v2761_v42  ;;  %v2558_v27 = vsub.f32 %v8028_v36, %v6962_v17  ;;  %v8034_v36 = vld [vmem:[#allocation168_spill] sm:$0xff] }
 0x816   :  { %v7023_v60 = vpop.permute.xlu2 %3056  ;;  %v3669_v11 = vadd.f32 %v3668_v13, %v3537_v40  ;;  %v4195_v40 = vpop.eup %4194  ;;  %4200 = vpow2.f32 %v2763_v10  ;;  %v4327_v10 = vld [vmem:[#allocation8 + $0x138] sm:$0xff] }
 0x817   :  { %v3017_v63 = vpop.permute.xlu1 %3016  ;;  %v3546_v9 = vmul.f32 %v4325_v43, %v7023_v60  ;;  %4202 = vpow2.f32 %v2801_v22  ;;  %v4326_v60 = vld [vmem:[#allocation8 + $0x130] sm:$0xff] }
 0x818   :  { %v3538_v5 = vmul.f32 %v4317_v30, %v3017_v63  ;;  %4204 = vpow2.f32 %v2767_v53 }
 0x819   :  { %v4197_v18 = vpop.eup %4196 }
 0x81a   :  { %v3670_v46 = vadd.f32 %v3669_v11, %v3538_v5  ;;  %v3656_v11 = vrot.slane %v3655_v19, 1  ;;  %v4323_v5 = vld [vmem:[#allocation8 + $0x118] sm:$0xff] }
 0x81b   :  { %3321 = vperm.xlu0 %4023, %v4185_v61  }
 0x81c   :  { %v3671_v41 = vadd.f32 %v3670_v46, %v3539_v48  ;;  %3236 = vperm.xlu2 %4024, %v4187_v56   ;;  %v2769_v48 = vmul.f32 1.442695, %v2558_v27  ;;  %v3657_v46 = vadd.f32 %v3656_v11, %v3655_v19  ;;  %v3545_v56 = vmul.f32 %v4324_v2, %v6982_v38  ;;  %v8030_v38 = vld [vmem:[#allocation81_spill] sm:$0xff]  ;;  %v4329_v11 = vld [vmem:[#allocation8 + $0x180] sm:$0xff] }
 0x81d   :  { %3241 = vperm.xlu1 %4025, %v4189_v34   ;;  %v7041_v32 = vpop.permute.xlu0 %3111  ;;  %v2560_v23 = vsub.f32 %v8030_v38, %v6962_v17  ;;  %v2564_v27 = vsub.f32 %v8034_v36, %v6962_v17  ;;  %v7106_v36 = vperm.slane %v6780_v3, 7  ;;  %v8042_v3 = vld [vmem:[#allocation132_spill] sm:$0xff] }
 0x81e   :  { %v3672_v37 = vadd.f32 %v3671_v41, %v3540_v50  ;;  %v7039_v1 = vpop.permute.xlu2 %3071  ;;  %v4199_v50 = vpop.eup %4198  ;;  %v8029_v41 = vld [vmem:[#allocation80_spill] sm:$0xff]  ;;  %4206 = vpow2.f32 %v2769_v48 }
 0x81f   :  { %v3032_v29 = vpop.permute.xlu1 %3031  ;;  %v2577_v14 = vsub.f32 %v8029_v41, %v7028_v26  ;;  %v4201_v8 = vpop.eup %4200  ;;  %v2773_v62 = vmul.f32 1.442695, %v2560_v23  ;;  %v4333_v41 = vld [vmem:[#allocation8 + $0x158] sm:$0xff] }
 0x820   :  { %v3673_v6 = vrot.slane %v3672_v37, 4  ;;  %v3541_v57 = vmul.f32 %v4321_v49, %v3032_v29  ;;  %v4203_v42 = vpop.eup %4202 }
 0x822   :  { %v3674_v54 = vadd.f32 %v3673_v6, %v3672_v37  ;;  %v3679_v31 = vadd.f32 %v3542_v52, %v3541_v57  ;;  %v2561_v52 = vsub.f32 %v8031_v4, %v6962_v17  ;;  %v2807_v57 = vmul.f32 1.442695, %v2577_v14 }
 0x823   :  { %3336 = vperm.xlu0 %4023, %v4191_v24   ;;  %v3548_v24 = vmul.f32 %v4327_v10, %v6994_v15  ;;  %v8033_v15 = vld [vmem:[#allocation84_spill] sm:$0xff] }
 0x824   :  { %v3675_v13 = vrot.slane %v3674_v54, 2  ;;  %3251 = vperm.xlu2 %4024, %v4193_v58   ;;  %v3680_v47 = vadd.f32 %v3679_v31, %v3543_v35  ;;  %v2775_v39 = vmul.f32 1.442695, %v2561_v52  ;;  %v4205_v35 = vpop.eup %4204  ;;  %v4328_v58 = vld [vmem:[#allocation8 + $0x140] sm:$0xff]  ;;  %4208 = vpow2.f32 %v2807_v57 }
 0x825   :  { %3256 = vperm.xlu1 %4025, %v4195_v40   ;;  %v7053_v61 = vpop.permute.xlu0 %3126  ;;  %v4207_v31 = vpop.eup %4206  ;;  %v3549_v40 = vmul.f32 %v4328_v58, %v7039_v1  ;;  %4210 = vpow2.f32 %v2773_v62  ;;  %v2563_v55 = vsub.f32 %v8033_v15, %v6962_v17  ;;  %v3557_v1 = vmul.f32 %v4329_v11, %v7041_v32  ;;  %v4334_v52 = vld [vmem:[#allocation8 + $0x160] sm:$0xff]  ;;  %v4335_v62 = vld [vmem:[#allocation8 + $0x168] sm:$0xff] }
 0x826   :  { %v3676_v51 = vadd.f32 %v3675_v13, %v3674_v54  ;;  %v7051_v7 = vpop.permute.xlu2 %3086  ;;  %4212 = vpow2.f32 %v2775_v39 }
 0x827   :  { %v3047_v63 = vpop.permute.xlu1 %3046  ;;  %v2779_v48 = vmul.f32 1.442695, %v2563_v55  ;;  %v3552_v32 = vmul.f32 %v4333_v41, %v7051_v7  ;;  %v8040_v55 = vld [vmem:[#allocation116_spill] sm:$0xff] }
 0x828   :  { %v3677_v30 = vrot.slane %v3676_v51, 1  ;;  %v3544_v16 = vmul.f32 %v4323_v5, %v3047_v63  ;;  %v4331_v5 = vld [vmem:[#allocation8 + $0x148] sm:$0xff] }
 0x82a   :  { %v3678_v34 = vadd.f32 %v3677_v30, %v3676_v51  ;;  %v3681_v12 = vadd.f32 %v3680_v47, %v3544_v16  ;;  %v8032_v47 = vld [vmem:[#allocation82_spill] sm:$0xff]  ;;  %v4330_v51 = vld [vmem:[#allocation8 + $0x188] sm:$0xff] }
 0x82b   :  { %3351 = vperm.xlu0 %4023, %v4197_v18   ;;  %v2580_v21 = vsub.f32 %v8032_v47, %v7028_v26  ;;  %v4209_v18 = vpop.eup %4208  ;;  %v8039_v47 = vld [vmem:[#allocation169_spill] sm:$0xff] }
 0x82c   :  { %v3682_v45 = vadd.f32 %v3681_v12, %v3545_v56  ;;  %3266 = vperm.xlu2 %4024, %v4199_v50   ;;  %v7060_v0 = vsel %vm2432_vm0, %v3678_v34, %v3657_v46  ;;  %v4332_v46 = vld [vmem:[#allocation8 + $0x150] sm:$0xff]  ;;  %v2781_v34 = vmul.f32 1.442695, %v2564_v27  ;;  %v4211_v12 = vpop.eup %4210  ;;  %v4337_v27 = vld [vmem:[#allocation8 + $0x178] sm:$0xff] }
 0x82d   :  { %3271 = vperm.xlu1 %4025, %v4201_v8   ;;  %v7069_v54 = vpop.permute.xlu0 %3141  ;;  %v2813_v22 = vmul.f32 1.442695, %v2580_v21  ;;  %v3551_v2 = vmul.f32 %v4332_v46, %v7006_v44  ;;  %v4213_v50 = vpop.eup %4212  ;;  %v8035_v8 = vld [vmem:[#allocation85_spill] sm:$0xff]  ;;  %v8036_v44 = vld [vmem:[#allocation87_spill] sm:$0xff]  ;;  %v2569_v21 = vsub.f32 %v8039_v47, %v6962_v17  ;;  %v2572_v46 = vsub.f32 %v8042_v3, %v7028_v26  ;;  %v8049_v3 = vld [vmem:[#allocation92_spill] sm:$0xff] }
 0x82e   :  { %v7064_v37 = vpop.permute.xlu2 %3101  ;;  %v3683_v29 = vadd.f32 %v3682_v45, %v3546_v9  ;;  %v2583_v43 = vsub.f32 %v8035_v8, %v7028_v26  ;;  %v2566_v45 = vsub.f32 %v8036_v44, %v6962_v17 }
 0x82f   :  { %v3062_v6 = vpop.permute.xlu1 %3061  ;;  %4214 = vpow2.f32 %v2813_v22  ;;  %v2797_v44 = vmul.f32 1.442695, %v2572_v46  ;;  %v2579_v46 = vsub.f32 %v8049_v3, %v7028_v26  ;;  %v4351_v3 = vld [vmem:[#allocation8 + $0x1f8] sm:$0xff] }
 0x830   :  { %v3547_v49 = vmul.f32 %v4326_v60, %v3062_v6  ;;  %4216 = vpow2.f32 %v2779_v48  ;;  %v2819_v60 = vmul.f32 1.442695, %v2583_v43 }
 0x831   :  { %4218 = vpow2.f32 %v2781_v34  ;;  %v8043_v34 = vld [vmem:[#allocation86_spill] sm:$0xff] }
 0x832   :  { %v3684_v19 = vadd.f32 %v3683_v29, %v3547_v49  ;;  %v8037_v29 = vld [vmem:[#allocation83_spill] sm:$0xff]  ;;  %v2785_v49 = vmul.f32 1.442695, %v2566_v45  ;;  %4220 = vpow2.f32 %v2819_v60  ;;  %v8044_v60 = vld [vmem:[#allocation29_spill] sm:$0xff] }
 0x833   :  { %3366 = vperm.xlu0 %4023, %v4203_v42   ;;  %v2567_v7 = vsub.f32 %v8037_v29, %v6962_v17  ;;  %v3554_v42 = vmul.f32 %v4335_v62, %v7018_v28  ;;  %v4340_v62 = vld [vmem:[#allocation8 + $0x1a0] sm:$0xff] }
 0x834   :  { %v3685_v13 = vadd.f32 %v3684_v19, %v3548_v24  ;;  %3281 = vperm.xlu2 %4024, %v4205_v35   ;;  %v4336_v35 = vld [vmem:[#allocation8 + $0x170] sm:$0xff]  ;;  %4222 = vpow2.f32 %v2785_v49  ;;  %v2591_v49 = vsub.f32 %v8044_v60, %v7106_v36 }
 0x835   :  { %3286 = vperm.xlu1 %4025, %v4207_v31   ;;  %v7085_v9 = vpop.permute.xlu0 %3156  ;;  %v4215_v57 = vpop.eup %4214  ;;  %v2787_v24 = vmul.f32 1.442695, %v2567_v7  ;;  %v3555_v31 = vmul.f32 %v4336_v35, %v7064_v37 }
 0x836   :  { %v3117_v59 = vpop.permute.xlu2 %3116  ;;  %v3686_v25 = vadd.f32 %v3685_v13, %v3549_v40  ;;  %v4217_v19 = vpop.eup %4216  ;;  %v8038_v40 = vld [vmem:[#allocation88_spill] sm:$0xff] }
 0x837   :  { %v3558_v63 = vmul.f32 %v4330_v51, %v3117_v59  ;;  %v3077_v30 = vpop.permute.xlu1 %3076  ;;  %v4219_v39 = vpop.eup %4218  ;;  %v2586_v13 = vsub.f32 %v8038_v40, %v7028_v26  ;;  %4224 = vpow2.f32 %v2787_v24  ;;  %v2570_v59 = vsub.f32 %v8040_v55, %v6962_v17  ;;  %v8041_v17 = vld [vmem:[#allocation25_spill] sm:$0xff] }
 0x838   :  { %v3550_v16 = vmul.f32 %v4331_v5, %v3077_v30  ;;  %v2791_v51 = vmul.f32 1.442695, %v2569_v21  ;;  %v2835_v21 = vmul.f32 1.442695, %v2591_v49 }
 0x839   :  { %v7079_v53 = vadd.f32 %v3558_v63, %v3557_v1  ;;  %v2825_v1 = vmul.f32 1.442695, %v2586_v13  ;;  %v4221_v63 = vpop.eup %4220  ;;  %v2793_v5 = vmul.f32 1.442695, %v2570_v59  ;;  %v4341_v13 = vld [vmem:[#allocation8 + $0x1a8] sm:$0xff]  ;;  %v4342_v59 = vld [vmem:[#allocation8 + $0x1b0] sm:$0xff] }
 0x83a   :  { %v3687_v56 = vadd.f32 %v3686_v25, %v3550_v16  ;;  %v4223_v16 = vpop.eup %4222 }
 0x83b   :  { %3381 = vperm.xlu0 %4023, %v4209_v18   ;;  %4226 = vpow2.f32 %v2825_v1  ;;  %v2588_v18 = vsub.f32 %v8041_v17, %v7106_v36 }
 0x83c   :  { %v3688_v14 = vadd.f32 %v3687_v56, %v3551_v2  ;;  %3296 = vperm.xlu2 %4024, %v4211_v12   ;;  %4228 = vpow2.f32 %v2791_v51  ;;  %v2573_v12 = vsub.f32 %v8043_v34, %v7028_v26 }
 0x83d   :  { %3301 = vperm.xlu1 %4025, %v4213_v50   ;;  %v7103_v25 = vpop.permute.xlu0 %3171  ;;  %v4225_v22 = vpop.eup %4224  ;;  %4230 = vpow2.f32 %v2793_v5  ;;  %v2829_v8 = vmul.f32 1.442695, %v2588_v18 }
 0x83e   :  { %v7089_v38 = vpop.permute.xlu2 %3131  ;;  %v3689_v23 = vadd.f32 %v3688_v14, %v3552_v32  ;;  %v4338_v32 = vld [vmem:[#allocation8 + $0x190] sm:$0xff] }
 0x83f   :  { %v3092_v4 = vpop.permute.xlu1 %3091  ;;  %4232 = vpow2.f32 %v2829_v8 }
 0x840   :  { %v3553_v6 = vmul.f32 %v4334_v52, %v3092_v4  ;;  %v2799_v52 = vmul.f32 1.442695, %v2573_v12  ;;  %4234 = vpow2.f32 %v2797_v44  ;;  %v2811_v44 = vmul.f32 1.442695, %v2579_v46 }
 0x841   :  { %v4227_v45 = vpop.eup %4226 }
 0x842   :  { %v3690_v10 = vadd.f32 %v3689_v23, %v3553_v6  ;;  %v4339_v23 = vld [vmem:[#allocation8 + $0x198] sm:$0xff]  ;;  %v4229_v6 = vpop.eup %4228  ;;  %4236 = vpow2.f32 %v2799_v52 }
 0x843   :  { %3396 = vperm.xlu0 %4023, %v4215_v57   ;;  %v3560_v29 = vmul.f32 %v4339_v23, %v7053_v61  ;;  %v4231_v57 = vpop.eup %4230  ;;  %v8045_v61 = vld [vmem:[#allocation96_spill] sm:$0xff]  ;;  %4238 = vpow2.f32 %v2835_v21  ;;  %v8050_v52 = vld [vmem:[#allocation22_spill] sm:$0xff] }
 0x844   :  { %v3691_v58 = vadd.f32 %v3690_v10, %v3554_v42  ;;  %3311 = vperm.xlu2 %4024, %v4217_v19   ;;  %v3561_v42 = vmul.f32 %v4340_v62, %v7089_v38  ;;  %v2575_v19 = vsub.f32 %v8045_v61, %v7028_v26 }
 0x845   :  { %3316 = vperm.xlu1 %4025, %v4219_v39   ;;  %v7116_v43 = vpop.permute.xlu0 %3186  ;;  %v4233_v55 = vpop.eup %4232 }
 0x846   :  { %v7099_v28 = vpop.permute.xlu2 %3146  ;;  %v3692_v15 = vadd.f32 %v3691_v58, %v3555_v31  ;;  %v8046_v31 = vld [vmem:[#allocation89_spill] sm:$0xff]  ;;  %v4235_v1 = vpop.eup %4234  ;;  %v3572_v46 = vmul.f32 %v4351_v3, %v7116_v43 }
 0x847   :  { %v3107_v37 = vpop.permute.xlu1 %3106  ;;  %v2576_v58 = vsub.f32 %v8046_v31, %v7028_v26  ;;  %v4348_v31 = vld [vmem:[#allocation8 + $0x1e0] sm:$0xff] }
 0x848   :  { %v3556_v11 = vmul.f32 %v4337_v27, %v3107_v37  ;;  %v3563_v37 = vmul.f32 %v4342_v59, %v7069_v54  ;;  %v8048_v54 = vld [vmem:[#allocation99_spill] sm:$0xff] }
 0x84a   :  { %v3693_v30 = vadd.f32 %v3692_v15, %v3556_v11  ;;  %v2803_v15 = vmul.f32 1.442695, %v2575_v19  ;;  %v2805_v11 = vmul.f32 1.442695, %v2576_v58  ;;  %v3569_v58 = vmul.f32 %v4348_v31, %v7103_v25 }
 0x84b   :  { %3411 = vperm.xlu0 %4023, %v4221_v63   ;;  %v4237_v63 = vpop.eup %4236 }
 0x84c   :  { %v3694_v48 = vrot.slane %v3693_v30, 4  ;;  %3326 = vperm.xlu2 %4024, %v4223_v16   ;;  %v8047_v16 = vld [vmem:[#allocation130_spill] sm:$0xff]  ;;  %4240 = vpow2.f32 %v2803_v15  ;;  %v4349_v15 = vld [vmem:[#allocation8 + $0x1e8] sm:$0xff] }
 0x84d   :  { %3331 = vperm.xlu1 %4025, %v4225_v22   ;;  %v7134_v51 = vpop.permute.xlu0 %3201  ;;  %v2594_v22 = vsub.f32 %v8047_v16, %v7106_v36  ;;  %4242 = vpow2.f32 %v2805_v11  ;;  %v8054_v11 = vld [vmem:[#allocation105_spill] sm:$0xff] }
 0x84e   :  { %v3695_v2 = vadd.f32 %v3694_v48, %v3693_v30  ;;  %v7112_v56 = vpop.permute.xlu2 %3161  ;;  %v4343_v30 = vld [vmem:[#allocation8 + $0x1b8] sm:$0xff]  ;;  %v2578_v48 = vsub.f32 %v8048_v54, %v7028_v26  ;;  %v4350_v16 = vld [vmem:[#allocation8 + $0x1f0] sm:$0xff] }
 0x84f   :  { %v3122_v50 = vpop.permute.xlu1 %3121  ;;  %v3564_v5 = vmul.f32 %v4343_v30, %v7099_v28  ;;  %v4344_v28 = vld [vmem:[#allocation8 + $0x1c0] sm:$0xff]  ;;  %v2841_v12 = vmul.f32 1.442695, %v2594_v22  ;;  %v8055_v30 = vld [vmem:[#allocation98_spill] sm:$0xff] }
 0x850   :  { %v3696_v41 = vrot.slane %v3695_v2, 2  ;;  %v3559_v14 = vmul.f32 %v4338_v32, %v3122_v50  ;;  %v2809_v50 = vmul.f32 1.442695, %v2578_v48  ;;  %v4345_v32 = vld [vmem:[#allocation8 + $0x1c8] sm:$0xff] }
 0x851   :  { %4244 = vpow2.f32 %v2841_v12 }
 0x852   :  { %v3697_v7 = vadd.f32 %v3696_v41, %v3695_v2  ;;  %v3701_v4 = vadd.f32 %v7079_v53, %v3559_v14  ;;  %v4239_v41 = vpop.eup %4238  ;;  %v3566_v14 = vmul.f32 %v4345_v32, %v7085_v9  ;;  %4246 = vpow2.f32 %v2809_v50  ;;  %v8051_v9 = vld [vmem:[#allocation102_spill] sm:$0xff] }
 0x853   :  { %3426 = vperm.xlu0 %4023, %v4227_v45   ;;  %v4241_v45 = vpop.eup %4240  ;;  %v2581_v49 = vsub.f32 %v8051_v9, %v7028_v26  ;;  %4248 = vpow2.f32 %v2811_v44  ;;  %v4352_v44 = vld [vmem:[#allocation8 + $0x200] sm:$0xff] }
 0x854   :  { %v3698_v10 = vrot.slane %v3697_v7, 1  ;;  %v3702_v24 = vadd.f32 %v3701_v4, %v3560_v29  ;;  %3341 = vperm.xlu2 %4024, %v4229_v6   ;;  %v4243_v23 = vpop.eup %4242  ;;  %v4346_v29 = vld [vmem:[#allocation8 + $0x1d0] sm:$0xff]  ;;  %v2597_v6 = vsub.f32 %v8050_v52, %v7106_v36 }
 0x855   :  { %3346 = vperm.xlu1 %4025, %v4231_v57   ;;  %v7149_v60 = vpop.permute.xlu0 %3216 }
 0x856   :  { %v3699_v53 = vadd.f32 %v3698_v10, %v3697_v7  ;;  %v7125_v39 = vpop.permute.xlu2 %3176  ;;  %v3703_v35 = vadd.f32 %v3702_v24, %v3561_v42  ;;  %v3567_v7 = vmul.f32 %v4346_v29, %v7112_v56  ;;  %v8052_v42 = vld [vmem:[#allocation95_spill] sm:$0xff]  ;;  %v4347_v24 = vld [vmem:[#allocation8 + $0x1d8] sm:$0xff]  ;;  %v2847_v19 = vmul.f32 1.442695, %v2597_v6  ;;  %v4354_v6 = vld [vmem:[#allocation8 + $0x210] sm:$0xff] }
 0x857   :  { %v3137_v40 = vpop.permute.xlu1 %3136  ;;  %v2582_v56 = vsub.f32 %v8052_v42, %v7028_v26  ;;  %v3575_v9 = vmul.f32 %v4354_v6, %v7134_v51  ;;  %v8058_v51 = vld [vmem:[#allocation111_spill] sm:$0xff]  ;;  %v4362_v6 = vld [vmem:[#allocation8 + $0x250] sm:$0xff] }
 0x858   :  { %v7131_v38 = vsel %vm2434_vm1, %v3699_v53, %v7060_v0  ;;  %v3562_v47 = vmul.f32 %v4341_v13, %v3137_v40  ;;  %v2815_v53 = vmul.f32 1.442695, %v2581_v49  ;;  %4250 = vpow2.f32 %v2847_v19  ;;  %v8057_v19 = vld [vmem:[#allocation91_spill] sm:$0xff] }
 0x859   :  { %v2817_v13 = vmul.f32 1.442695, %v2582_v56 }
 0x85a   :  { %v3704_v27 = vadd.f32 %v3703_v35, %v3562_v47  ;;  %v4245_v35 = vpop.eup %4244  ;;  %4252 = vpow2.f32 %v2815_v53  ;;  %v2589_v53 = vsub.f32 %v8057_v19, %v7106_v36 }
 0x85b   :  { %3436 = vperm.xlu0 %4023, %v4233_v55   ;;  %v4247_v47 = vpop.eup %4246  ;;  %v3570_v55 = vmul.f32 %v4349_v15, %v7125_v39  ;;  %4254 = vpow2.f32 %v2817_v13 }
 0x85c   :  { %v3705_v0 = vadd.f32 %v3704_v27, %v3563_v37  ;;  %3356 = vperm.xlu2 %4024, %v4235_v1   ;;  %v4249_v21 = vpop.eup %4248  ;;  %v8053_v37 = vld [vmem:[#allocation41_spill] sm:$0xff]  ;;  %v2584_v1 = vsub.f32 %v8054_v11, %v7028_v26 }
 0x85d   :  { %3361 = vperm.xlu1 %4025, %v4237_v63   ;;  %v2600_v27 = vsub.f32 %v8053_v37, %v7106_v36 }
 0x85e   :  { %v7141_v17 = vpop.permute.xlu2 %3191  ;;  %v3706_v18 = vadd.f32 %v3705_v0, %v3564_v5  ;;  %v2585_v5 = vsub.f32 %v8055_v30, %v7028_v26  ;;  %v7167_v0 = vpop.permute.xlu0 %3231  ;;  %v2821_v48 = vmul.f32 1.442695, %v2584_v1  ;;  %v8056_v26 = vld [vmem:[#allocation143_spill] sm:$0xff]  ;;  %v4358_v30 = vld [vmem:[#allocation8 + $0x230] sm:$0xff] }
 0x85f   :  { %v3152_v2 = vpop.permute.xlu1 %3151  ;;  %v2853_v54 = vmul.f32 1.442695, %v2600_v27  ;;  %v3573_v43 = vmul.f32 %v4352_v44, %v7141_v17 }
 0x860   :  { %v3565_v34 = vmul.f32 %v4344_v28, %v3152_v2  ;;  %v2823_v28 = vmul.f32 1.442695, %v2585_v5 }
 0x861   :  { %4256 = vpow2.f32 %v2853_v54 }
 0x862   :  { %v3707_v8 = vadd.f32 %v3706_v18, %v3565_v34  ;;  %v4251_v18 = vpop.eup %4250  ;;  %4258 = vpow2.f32 %v2821_v48 }
 0x863   :  { %3451 = vperm.xlu0 %4023, %v4239_v41   ;;  %v4253_v34 = vpop.eup %4252  ;;  %v2587_v41 = vsub.f32 %v8056_v26, %v7106_v36  ;;  %4260 = vpow2.f32 %v2823_v28 }
 0x864   :  { %v3708_v4 = vadd.f32 %v3707_v8, %v3566_v14  ;;  %3371 = vperm.xlu2 %4024, %v4241_v45   ;;  %v4255_v12 = vpop.eup %4254 }
 0x865   :  { %3376 = vperm.xlu1 %4025, %v4243_v23   ;;  %v4353_v23 = vld [vmem:[#allocation8 + $0x208] sm:$0xff] }
 0x866   :  { %v7153_v57 = vpop.permute.xlu2 %3206  ;;  %v3709_v62 = vadd.f32 %v3708_v4, %v3567_v7  ;;  %v7175_v7 = vpop.permute.xlu0 %3246  ;;  %v2827_v4 = vmul.f32 1.442695, %v2587_v41 }
 0x867   :  { %v3167_v10 = vpop.permute.xlu1 %3166  ;;  %v4257_v52 = vpop.eup %4256 }
 0x868   :  { %v3568_v61 = vmul.f32 %v4347_v24, %v3167_v10  ;;  %v4259_v42 = vpop.eup %4258  ;;  %v4355_v10 = vld [vmem:[#allocation8 + $0x218] sm:$0xff]  ;;  %4262 = vpow2.f32 %v2827_v4  ;;  %v8062_v4 = vld [vmem:[#allocation117_spill] sm:$0xff] }
 0x869   :  { %v4261_v56 = vpop.eup %4260  ;;  %v3576_v24 = vmul.f32 %v4355_v10, %v7153_v57  ;;  %v4357_v57 = vld [vmem:[#allocation8 + $0x228] sm:$0xff] }
 0x86a   :  { %v3710_v40 = vadd.f32 %v3709_v62, %v3568_v61 }
 0x86b   :  { %3466 = vperm.xlu0 %4023, %v4245_v35  }
 0x86c   :  { %v3711_v59 = vadd.f32 %v3710_v40, %v3569_v58  ;;  %3386 = vperm.xlu2 %4024, %v4247_v47   ;;  %v2590_v40 = vsub.f32 %v8058_v51, %v7106_v36 }
 0x86d   :  { %3391 = vperm.xlu1 %4025, %v4249_v21   ;;  %v4356_v21 = vld [vmem:[#allocation8 + $0x220] sm:$0xff] }
 0x86e   :  { %v7163_v25 = vpop.permute.xlu2 %3221  ;;  %v3712_v63 = vadd.f32 %v3711_v59, %v3570_v55  ;;  %v2831_v55 = vmul.f32 1.442695, %v2589_v53  ;;  %v3578_v59 = vmul.f32 %v4357_v57, %v7149_v60  ;;  %v2833_v11 = vmul.f32 1.442695, %v2590_v40  ;;  %v4263_v1 = vpop.eup %4262  ;;  %v8064_v40 = vld [vmem:[#allocation119_spill] sm:$0xff]  ;;  %v4366_v57 = vld [vmem:[#allocation8 + $0x270] sm:$0xff] }
 0x86f   :  { %v3182_v39 = vpop.permute.xlu1 %3181  ;;  %v3579_v5 = vmul.f32 %v4358_v30, %v7163_v25 }
 0x870   :  { %v3571_v22 = vmul.f32 %v4350_v16, %v3182_v39  ;;  %v3829_v16 = vld [vmem:[#allocation3] sm:$0xff]  ;;  %4264 = vpow2.f32 %v2831_v55 }
 0x871   :  { %4266 = vpow2.f32 %v2833_v11 }
 0x872   :  { %v3713_v2 = vadd.f32 %v3712_v63, %v3571_v22  ;;  %v3262_v63 = vpop.permute.xlu0 %3261  ;;  %v8059_v22 = vld [vmem:[#allocation94_spill] sm:$0xff] }
 0x873   :  { %3481 = vperm.xlu0 %4023, %v4251_v18   ;;  %v2592_v54 = vsub.f32 %v8059_v22, %v7106_v36  ;;  %v8065_v22 = vld [vmem:[#allocation103_spill] sm:$0xff] }
 0x874   :  { %v3714_v50 = vadd.f32 %v3713_v2, %v3572_v46  ;;  %3401 = vperm.xlu2 %4024, %v4253_v34   ;;  %v4359_v46 = vld [vmem:[#allocation8 + $0x238] sm:$0xff]  ;;  %v4360_v34 = vld [vmem:[#allocation8 + $0x240] sm:$0xff] }
 0x875   :  { %3406 = vperm.xlu1 %4025, %v4255_v12   ;;  %v2837_v28 = vmul.f32 1.442695, %v2592_v54  ;;  %v3581_v25 = vmul.f32 %v4360_v34, %v7167_v0  ;;  %v2596_v0 = vsub.f32 %v8062_v4, %v7106_v36  ;;  %v2601_v54 = vsub.f32 %v8065_v22, %v7106_v36 }
 0x876   :  { %v3715_v32 = vrot.slane %v3714_v50, 4  ;;  %v7172_v14 = vpop.permute.xlu2 %3236  ;;  %v4265_v26 = vpop.eup %4264 }
 0x877   :  { %v3197_v8 = vpop.permute.xlu1 %3196  ;;  %v4267_v41 = vpop.eup %4266  ;;  %4268 = vpow2.f32 %v2837_v28  ;;  %v2845_v10 = vmul.f32 1.442695, %v2596_v0 }
 0x878   :  { %v3716_v45 = vadd.f32 %v3715_v32, %v3714_v50  ;;  %v3574_v29 = vmul.f32 %v4353_v23, %v3197_v8  ;;  %v4361_v32 = vld [vmem:[#allocation8 + $0x248] sm:$0xff] }
 0x879   :  { %v3582_v8 = vmul.f32 %v4361_v32, %v7172_v14 }
 0x87a   :  { %v3717_v49 = vrot.slane %v3716_v45, 2  ;;  %v3721_v62 = vadd.f32 %v3574_v29, %v3573_v43  ;;  %v3277_v43 = vpop.permute.xlu0 %3276 }
 0x87b   :  { %3496 = vperm.xlu0 %4023, %v4257_v52  }
 0x87c   :  { %v3718_v61 = vadd.f32 %v3717_v49, %v3716_v45  ;;  %v3722_v17 = vadd.f32 %v3721_v62, %v3575_v9  ;;  %3416 = vperm.xlu2 %4024, %v4259_v42   ;;  %v8061_v45 = vld [vmem:[#allocation97_spill] sm:$0xff]  ;;  %v4363_v42 = vld [vmem:[#allocation8 + $0x258] sm:$0xff] }
 0x87d   :  { %3421 = vperm.xlu1 %4025, %v4261_v56   ;;  %v2595_v23 = vsub.f32 %v8061_v45, %v7106_v36  ;;  %v3584_v14 = vmul.f32 %v4363_v42, %v7175_v7  ;;  %v4371_v45 = vld [vmem:[#allocation8 + $0x298] sm:$0xff] }
 0x87e   :  { %v3719_v35 = vrot.slane %v3718_v61, 1  ;;  %v3252_v31 = vpop.permute.xlu2 %3251  ;;  %v3723_v58 = vadd.f32 %v3722_v17, %v3576_v24  ;;  %v4269_v24 = vpop.eup %4268  ;;  %v4364_v17 = vld [vmem:[#allocation8 + $0x260] sm:$0xff] }
 0x87f   :  { %v3212_v13 = vpop.permute.xlu1 %3211  ;;  %v2843_v62 = vmul.f32 1.442695, %v2595_v23  ;;  %v3585_v19 = vmul.f32 %v4364_v17, %v3252_v31 }
 0x880   :  { %v3720_v47 = vadd.f32 %v3719_v35, %v3718_v61  ;;  %v3577_v15 = vmul.f32 %v4356_v21, %v3212_v13  ;;  %v8063_v35 = vld [vmem:[#allocation100_spill] sm:$0xff]  ;;  %v2599_v13 = vsub.f32 %v8064_v40, %v7106_v36 }
 0x881   :  { %v4365_v21 = vld [vmem:[#allocation8 + $0x268] sm:$0xff] }
 0x882   :  { %v7186_v37 = vsel %vm2436_vm2, %v3720_v47, %v7131_v38  ;;  %v3724_v27 = vadd.f32 %v3723_v58, %v3577_v15  ;;  %v8060_v38 = vld [vmem:[#allocation114_spill] sm:$0xff]  ;;  %v2598_v58 = vsub.f32 %v8063_v35, %v7106_v36  ;;  %v3292_v47 = vpop.permute.xlu0 %3291 }
 0x883   :  { %v2593_v48 = vsub.f32 %v8060_v38, %v7106_v36  ;;  %v8066_v38 = vld [vmem:[#allocation123_spill] sm:$0xff] }
 0x884   :  { %v3725_v39 = vadd.f32 %v3724_v27, %v3578_v59  ;;  %3431 = vperm.xlu2 %4024, %v4263_v1   ;;  %v2849_v55 = vmul.f32 1.442695, %v2598_v58  ;;  %v3587_v59 = vmul.f32 %v4366_v57, %v3262_v63  ;;  %v2851_v27 = vmul.f32 1.442695, %v2599_v13 }
 0x885   :  { %3832 = vperm.xlu1 %4025, %v3829_v16   ;;  %v2839_v50 = vmul.f32 1.442695, %v2593_v48  ;;  %v2602_v63 = vsub.f32 %v8066_v38, %v7106_v36 }
 0x886   :  { %v3726_v60 = vadd.f32 %v3725_v39, %v3579_v5  ;;  %v3267_v18 = vpop.permute.xlu2 %3266  ;;  %v4367_v5 = vld [vmem:[#allocation8 + $0x278] sm:$0xff] }
 0x887   :  { %v3227_v3 = vpop.permute.xlu1 %3226  ;;  %4270 = vpow2.f32 %v2839_v50  ;;  %v3588_v39 = vmul.f32 %v4367_v5, %v3267_v18  ;;  %v2855_v18 = vmul.f32 1.442695, %v2601_v54  ;;  %v4380_v5 = vld [vmem:[#allocation8 + $0x2e0] sm:$0xff] }
 0x888   :  { %v3580_v2 = vmul.f32 %v4359_v46, %v3227_v3  ;;  %4272 = vpow2.f32 %v2843_v62  ;;  %v4368_v3 = vld [vmem:[#allocation8 + $0x288] sm:$0xff] }
 0x889   :  { %4274 = vpow2.f32 %v2845_v10  ;;  %v3590_v46 = vmul.f32 %v4368_v3, %v3277_v43  ;;  %v4372_v43 = vld [vmem:[#allocation8 + $0x2a0] sm:$0xff]  ;;  %v4374_v10 = vld [vmem:[#allocation8 + $0x2b0] sm:$0xff] }
 0x88a   :  { %v3727_v12 = vadd.f32 %v3726_v60, %v3580_v2  ;;  %4276 = vpow2.f32 %v2849_v55  ;;  %v4369_v2 = vld [vmem:[#allocation8 + $0x280] sm:$0xff]  ;;  %v3307_v34 = vpop.permute.xlu0 %3306 }
 0x88b   :  { %4278 = vpow2.f32 %v2851_v27 }
 0x88c   :  { %v3728_v44 = vadd.f32 %v3727_v12, %v3581_v25  ;;  %3441 = vperm.xlu2 %4024, %v4265_v26   ;;  %v4370_v25 = vld [vmem:[#allocation8 + $0x290] sm:$0xff]  ;;  %v2857_v26 = vmul.f32 1.442695, %v2602_v63  ;;  %4280 = vpow2.f32 %v2855_v18 }
 0x88d   :  { %3446 = vperm.xlu1 %4025, %v4267_v41   ;;  %v4271_v61 = vpop.eup %4270  ;;  %v4382_v63 = vld [vmem:[#allocation8 + $0x2f0] sm:$0xff] }
 0x88e   :  { %v3729_v29 = vadd.f32 %v3728_v44, %v3582_v8  ;;  %v3282_v49 = vpop.permute.xlu2 %3281  ;;  %v4273_v11 = vpop.eup %4272  ;;  %4282 = vpow2.f32 %v2857_v26 }
 0x88f   :  { %v3242_v52 = vpop.permute.xlu1 %3241  ;;  %v4275_v30 = vpop.eup %4274  ;;  %v3591_v12 = vmul.f32 %v4370_v25, %v3282_v49 }
 0x890   :  { %v3583_v9 = vmul.f32 %v4362_v6, %v3242_v52  ;;  %v4277_v41 = vpop.eup %4276 }
 0x891   :  { %v4279_v32 = vpop.eup %4278 }
 0x892   :  { %v3730_v56 = vadd.f32 %v3729_v29, %v3583_v9  ;;  %v3593_v29 = vmul.f32 %v4372_v43, %v3292_v47  ;;  %v4281_v0 = vpop.eup %4280  ;;  %v3322_v52 = vpop.permute.xlu0 %3321  ;;  %v4373_v9 = vld [vmem:[#allocation8 + $0x2a8] sm:$0xff] }
 0x893   :  { %v4377_v47 = vld [vmem:[#allocation8 + $0x2c8] sm:$0xff] }
 0x894   :  { %v3731_v53 = vadd.f32 %v3730_v56, %v3584_v14  ;;  %3456 = vperm.xlu2 %4024, %v4269_v24   ;;  %v4283_v6 = vpop.eup %4282 }
 0x895   :  { %3461 = vperm.xlu1 %4025, %v4271_v61   ;;  %v4375_v61 = vld [vmem:[#allocation8 + $0x2b8] sm:$0xff] }
 0x896   :  { %v3732_v51 = vadd.f32 %v3731_v53, %v3585_v19  ;;  %v3297_v1 = vpop.permute.xlu2 %3296  ;;  %v3596_v17 = vmul.f32 %v4375_v61, %v3307_v34  ;;  %v4376_v53 = vld [vmem:[#allocation8 + $0x2c0] sm:$0xff] }
 0x897   :  { %v3257_v7 = vpop.permute.xlu1 %3256  ;;  %v3594_v49 = vmul.f32 %v4373_v9, %v3297_v1 }
 0x898   :  { %v3586_v15 = vmul.f32 %v4365_v21, %v3257_v7 }
 0x89a   :  { %v3733_v31 = vadd.f32 %v3732_v51, %v3586_v15  ;;  %v3337_v51 = vpop.permute.xlu0 %3336  ;;  %v4378_v15 = vld [vmem:[#allocation8 + $0x2d0] sm:$0xff] }
 0x89b   :  { %v3599_v55 = vmul.f32 %v4378_v15, %v3322_v52  ;;  %v4388_v52 = vld [vmem:[#allocation8 + $0x320] sm:$0xff] }
 0x89c   :  { %v3734_v16 = vadd.f32 %v3733_v31, %v3587_v59  ;;  %3471 = vperm.xlu2 %4024, %v4273_v11   ;;  %v4379_v59 = vld [vmem:[#allocation8 + $0x2d8] sm:$0xff] }
 0x89d   :  { %3476 = vperm.xlu1 %4025, %v4275_v30  }
 0x89e   :  { %v7206_v60 = vadd.f32 %v3734_v16, %v3588_v39  ;;  %v3312_v44 = vpop.permute.xlu2 %3311  ;;  %v4381_v16 = vld [vmem:[#allocation8 + $0x2e8] sm:$0xff] }
 0x89f   :  { %v3272_v48 = vpop.permute.xlu1 %3271  ;;  %v3597_v35 = vmul.f32 %v4376_v53, %v3312_v44  ;;  %v3602_v22 = vmul.f32 %v4381_v16, %v3337_v51  ;;  %v4392_v51 = vld [vmem:[#allocation8 + $0x340] sm:$0xff] }
 0x8a0   :  { %v3589_v28 = vmul.f32 %v4369_v2, %v3272_v48 }
 0x8a2   :  { %v3742_v50 = vadd.f32 %v3590_v46, %v3589_v28  ;;  %v3352_v1 = vpop.permute.xlu0 %3351  ;;  %v4383_v28 = vld [vmem:[#allocation8 + $0x2f8] sm:$0xff] }
 0x8a4   :  { %3486 = vperm.xlu2 %4024, %v4277_v41   ;;  %v3743_v8 = vadd.f32 %v3742_v50, %v3591_v12  ;;  %v4384_v12 = vld [vmem:[#allocation8 + $0x308] sm:$0xff]  ;;  %v4385_v41 = vld [vmem:[#allocation8 + $0x300] sm:$0xff] }
 0x8a5   :  { %3491 = vperm.xlu1 %4025, %v4279_v32   ;;  %v3605_v32 = vmul.f32 %v4385_v41, %v3352_v1 }
 0x8a6   :  { %v3327_v14 = vpop.permute.xlu2 %3326 }
 0x8a7   :  { %v3287_v36 = vpop.permute.xlu1 %3286  ;;  %v3600_v31 = vmul.f32 %v4379_v59, %v3327_v14 }
 0x8a8   :  { %v3592_v23 = vmul.f32 %v4371_v45, %v3287_v36  ;;  %v4386_v36 = vld [vmem:[#allocation8 + $0x310] sm:$0xff] }
 0x8aa   :  { %v3744_v4 = vadd.f32 %v3743_v8, %v3592_v23  ;;  %v3367_v18 = vpop.permute.xlu0 %3366  ;;  %v4387_v23 = vld [vmem:[#allocation8 + $0x318] sm:$0xff] }
 0x8ab   :  { %v3608_v43 = vmul.f32 %v4387_v23, %v3367_v18 }
 0x8ac   :  { %v3745_v62 = vadd.f32 %v3744_v4, %v3593_v29  ;;  %3501 = vperm.xlu2 %4024, %v4281_v0  }
 0x8ad   :  { %3506 = vperm.xlu1 %4025, %v4283_v6  }
 0x8ae   :  { %v3746_v42 = vadd.f32 %v3745_v62, %v3594_v49  ;;  %v3342_v21 = vpop.permute.xlu2 %3341 }
 0x8af   :  { %v3302_v56 = vpop.permute.xlu1 %3301  ;;  %v3603_v48 = vmul.f32 %v4382_v63, %v3342_v21 }
 0x8b0   :  { %v3595_v24 = vmul.f32 %v4374_v10, %v3302_v56  ;;  %v4390_v56 = vld [vmem:[#allocation8 + $0x330] sm:$0xff] }
 0x8b2   :  { %v3747_v19 = vadd.f32 %v3746_v42, %v3595_v24  ;;  %v3382_v4 = vpop.permute.xlu0 %3381  ;;  %v4389_v42 = vld [vmem:[#allocation8 + $0x328] sm:$0xff] }
 0x8b3   :  { %v3611_v10 = vmul.f32 %v4390_v56, %v3382_v4  ;;  %v4401_v56 = vld [vmem:[#allocation8 + $0x390] sm:$0xff] }
 0x8b4   :  { %v3748_v58 = vadd.f32 %v3747_v19, %v3596_v17  ;;  %v4391_v19 = vld [vmem:[#allocation8 + $0x338] sm:$0xff] }
 0x8b6   :  { %v3749_v40 = vadd.f32 %v3748_v58, %v3597_v35  ;;  %v3357_v38 = vpop.permute.xlu2 %3356 }
 0x8b7   :  { %v3317_v13 = vpop.permute.xlu1 %3316  ;;  %v3606_v50 = vmul.f32 %v4384_v12, %v3357_v38 }
 0x8b8   :  { %v3598_v7 = vmul.f32 %v4377_v47, %v3317_v13  ;;  %v4393_v47 = vld [vmem:[#allocation8 + $0x348] sm:$0xff] }
 0x8b9   :  { %v3763_v44 = vadd.f32 %v3606_v50, %v3605_v32 }
 0x8ba   :  { %v3750_v57 = vadd.f32 %v3749_v40, %v3598_v7  ;;  %v3397_v17 = vpop.permute.xlu0 %3396 }
 0x8bb   :  { %v3614_v7 = vmul.f32 %v4393_v47, %v3397_v17 }
 0x8bc   :  { %v3751_v27 = vadd.f32 %v3750_v57, %v3599_v55  ;;  %v4394_v55 = vld [vmem:[#allocation8 + $0x350] sm:$0xff] }
 0x8be   :  { %v3752_v11 = vadd.f32 %v3751_v27, %v3600_v31  ;;  %v3372_v26 = vpop.permute.xlu2 %3371 }
 0x8bf   :  { %v3332_v30 = vpop.permute.xlu1 %3331  ;;  %v3609_v6 = vmul.f32 %v4388_v52, %v3372_v26 }
 0x8c0   :  { %v3601_v39 = vmul.f32 %v4380_v5, %v3332_v30  ;;  %v4396_v30 = vld [vmem:[#allocation8 + $0x360] sm:$0xff] }
 0x8c2   :  { %v3753_v54 = vadd.f32 %v3752_v11, %v3601_v39  ;;  %v3412_v59 = vpop.permute.xlu0 %3411  ;;  %v4395_v11 = vld [vmem:[#allocation8 + $0x358] sm:$0xff] }
 0x8c3   :  { %v3617_v5 = vmul.f32 %v4396_v30, %v3412_v59  ;;  %v4407_v30 = vld [vmem:[#allocation8 + $0x3b8] sm:$0xff] }
 0x8c4   :  { %v3754_v3 = vadd.f32 %v3753_v54, %v3602_v22  ;;  %v4397_v54 = vld [vmem:[#allocation8 + $0x368] sm:$0xff] }
 0x8c6   :  { %v3755_v46 = vadd.f32 %v3754_v3, %v3603_v48  ;;  %v3387_v9 = vpop.permute.xlu2 %3386  ;;  %v4398_v3 = vld [vmem:[#allocation8 + $0x370] sm:$0xff] }
 0x8c7   :  { %v3347_v2 = vpop.permute.xlu1 %3346  ;;  %v3612_v53 = vmul.f32 %v4391_v19, %v3387_v9 }
 0x8c8   :  { %v3604_v34 = vmul.f32 %v4383_v28, %v3347_v2  ;;  %v3736_v2 = vrot.slane %v7206_v60, 4 }
 0x8ca   :  { %v7210_v25 = vadd.f32 %v3755_v46, %v3604_v34  ;;  %v3737_v34 = vadd.f32 %v3736_v2, %v7206_v60 }
 0x8cc   :  { %v3738_v50 = vrot.slane %v3737_v34, 2 }
 0x8ce   :  { %v3402_v13 = vpop.permute.xlu2 %3401  ;;  %v3739_v41 = vadd.f32 %v3738_v50, %v3737_v34 }
 0x8cf   :  { %v3362_v8 = vpop.permute.xlu1 %3361  ;;  %v3615_v57 = vmul.f32 %v4394_v55, %v3402_v13 }
 0x8d0   :  { %v3607_v45 = vmul.f32 %v4386_v36, %v3362_v8  ;;  %v3740_v32 = vrot.slane %v3739_v41, 1 }
 0x8d2   :  { %v3764_v29 = vadd.f32 %v3763_v44, %v3607_v45  ;;  %v3741_v44 = vadd.f32 %v3740_v32, %v3739_v41  ;;  %v3757_v45 = vrot.slane %v7210_v25, 4 }
 0x8d4   :  { %v3765_v0 = vadd.f32 %v3764_v29, %v3608_v43  ;;  %v3816_v36 = vsel %vm2438_vm3, %v3741_v44, %v7186_v37  ;;  %v3758_v60 = vadd.f32 %v3757_v45, %v7210_v25  ;;  %v4402_v25 = vld [vmem:[#allocation8 + $0x398] sm:$0xff] }
 0x8d6   :  { %v3766_v62 = vadd.f32 %v3765_v0, %v3609_v6  ;;  %v3417_v16 = vpop.permute.xlu2 %3416  ;;  %v3759_v23 = vrot.slane %v3758_v60, 2 }
 0x8d7   :  { %v3377_v49 = vpop.permute.xlu1 %3376  ;;  %v3618_v38 = vmul.f32 %v4397_v54, %v3417_v16 }
 0x8d8   :  { %v3610_v14 = vmul.f32 %v4389_v42, %v3377_v49  ;;  %v3760_v43 = vadd.f32 %v3759_v23, %v3758_v60  ;;  %v4399_v49 = vld [vmem:[#allocation8 + $0x380] sm:$0xff] }
 0x8d9   :  { %v4412_v60 = vld [vmem:[#allocation8 + $0x3e0] sm:$0xff] }
 0x8da   :  { %v3767_v24 = vadd.f32 %v3766_v62, %v3610_v14  ;;  %v3761_v4 = vrot.slane %v3760_v43, 1  ;;  %v4400_v14 = vld [vmem:[#allocation8 + $0x388] sm:$0xff] }
 0x8dc   :  { %v3768_v61 = vadd.f32 %v3767_v24, %v3611_v10  ;;  %v3762_v0 = vadd.f32 %v3761_v4, %v3760_v43 }
 0x8de   :  { %v3769_v58 = vadd.f32 %v3768_v61, %v3612_v53  ;;  %v3432_v29 = vpop.permute.xlu2 %3431  ;;  %v7223_v6 = vsel %vm2440_vm4, %v3762_v0, %v3816_v36  ;;  %v4411_v36 = vld [vmem:[#allocation8 + $0x3d8] sm:$0xff]  ;;  %v4413_v0 = vld [vmem:[#allocation8 + $0x3e8] sm:$0xff] }
 0x8df   :  { %v3392_v35 = vpop.permute.xlu1 %3391  ;;  %v3621_v62 = vmul.f32 %v4399_v49, %v3432_v29 }
 0x8e0   :  { %v3613_v40 = vmul.f32 %v4392_v51, %v3392_v35  ;;  %v4403_v35 = vld [vmem:[#allocation8 + $0x378] sm:$0xff]  ;;  %v4404_v51 = vld [vmem:[#allocation8 + $0x3a0] sm:$0xff] }
 0x8e2   :  { %v3770_v21 = vadd.f32 %v3769_v58, %v3613_v40 }
 0x8e4   :  { %v3771_v15 = vadd.f32 %v3770_v21, %v3614_v7 }
 0x8e6   :  { %v3772_v27 = vadd.f32 %v3771_v15, %v3615_v57  ;;  %v3442_v9 = vpop.permute.xlu2 %3441  ;;  %v4405_v15 = vld [vmem:[#allocation8 + $0x3a8] sm:$0xff]  ;;  %v4406_v57 = vld [vmem:[#allocation8 + $0x3b0] sm:$0xff] }
 0x8e7   :  { %v3407_v31 = vpop.permute.xlu1 %3406  ;;  %v3623_v10 = vmul.f32 %v4401_v56, %v3442_v9  ;;  %v4415_v56 = vld [vmem:[#allocation8 + $0x3f8] sm:$0xff] }
 0x8e8   :  { %v3616_v1 = vmul.f32 %v4395_v11, %v3407_v31 }
 0x8ea   :  { %v3773_v39 = vadd.f32 %v3772_v27, %v3616_v1 }
 0x8ec   :  { %v3774_v22 = vadd.f32 %v3773_v39, %v3617_v5 }
 0x8ee   :  { %v3775_v48 = vadd.f32 %v3774_v22, %v3618_v38  ;;  %v3457_v13 = vpop.permute.xlu2 %3456 }
 0x8ef   :  { %v3422_v63 = vpop.permute.xlu1 %3421  ;;  %v3626_v55 = vmul.f32 %v4405_v15, %v3457_v13 }
 0x8f0   :  { %v3619_v46 = vmul.f32 %v4398_v3, %v3422_v63  ;;  %v4408_v63 = vld [vmem:[#allocation8 + $0x3c0] sm:$0xff]  ;;  %v4409_v3 = vld [vmem:[#allocation8 + $0x3c8] sm:$0xff] }
 0x8f2   :  { %v3776_v28 = vadd.f32 %v3775_v48, %v3619_v46 }
 0x8f6   :  { %v3472_v16 = vpop.permute.xlu2 %3471 }
 0x8f7   :  { %v3833_v18 = vpop.permute.xlu1 %3832  ;;  %v3629_v48 = vmul.f32 %v4408_v63, %v3472_v16 }
 0x8f8   :  { %v3835_v12 = vsub.f32 %v6776_v33, %v3833_v18  ;;  %v3427_v33 = vpop.permute.xlu0 %3426 }
 0x8f9   :  { %v3620_v58 = vmul.f32 %v4403_v35, %v3427_v33 }
 0x8fa   :  { %v3836_v26 = vmul.f32 1.442695, %v3835_v12  ;;  %v4410_v12 = vld [vmem:[#allocation8 + $0x3d0] sm:$0xff] }
 0x8fb   :  { %v3777_v7 = vadd.f32 %v3776_v28, %v3620_v58 }
 0x8fc   :  { %4284 = vpow2.f32 %v3836_v26 }
 0x8fd   :  { %v3778_v31 = vrot.slane %v3777_v7, 4 }
 0x8fe   :  { %v3487_v26 = vpop.permute.xlu2 %3486 }
 0x8ff   :  { %v3447_v42 = vpop.permute.xlu1 %3446  ;;  %v3779_v39 = vadd.f32 %v3778_v31, %v3777_v7  ;;  %v3632_v45 = vmul.f32 %v4411_v36, %v3487_v26 }
 0x900   :  { %v3437_v52 = vpop.permute.xlu0 %3436  ;;  %v3624_v61 = vmul.f32 %v4402_v25, %v3447_v42 }
 0x901   :  { %v3622_v37 = vmul.f32 %v4400_v14, %v3437_v52  ;;  %v3780_v38 = vrot.slane %v3779_v39, 2  ;;  %v4414_v14 = vld [vmem:[#allocation8 + $0x3f0] sm:$0xff] }
 0x902   :  { %v7215_v8 = vpop.eup %4284 }
 0x903   :  { %3838 = vadd.xlane.f32.xlu0 %v7215_v8  ;;  %v3784_v24 = vadd.f32 %v3622_v37, %v3621_v62  ;;  %v3781_v34 = vadd.f32 %v3780_v38, %v3779_v39 }
 0x905   :  { %v3785_v17 = vadd.f32 %v3784_v24, %v3623_v10  ;;  %v3782_v32 = vrot.slane %v3781_v34, 1 }
 0x906   :  { %v3502_v49 = vpop.permute.xlu2 %3501 }
 0x907   :  { %v3786_v53 = vadd.f32 %v3785_v17, %v3624_v61  ;;  %v3462_v47 = vpop.permute.xlu1 %3461  ;;  %v3783_v43 = vadd.f32 %v3782_v32, %v3781_v34  ;;  %v3635_v37 = vmul.f32 %v4414_v14, %v3502_v49 }
 0x908   :  { %v3452_v19 = vpop.permute.xlu0 %3451  ;;  %v3627_v59 = vmul.f32 %v4406_v57, %v3462_v47 }
 0x909   :  { %v3625_v40 = vmul.f32 %v4404_v51, %v3452_v19  ;;  %v3818_v9 = vsel %vm2442_vm5, %v3783_v43, %v7223_v6 }
 0x90b   :  { %v3787_v21 = vadd.f32 %v3786_v53, %v3625_v40 }
 0x90d   :  { %v3788_v27 = vadd.f32 %v3787_v21, %v3626_v55  ;;  %v2868_v55 = vmul.f32 0.0, %v6890_v20 }
 0x90f   :  { %v3789_v1 = vadd.f32 %v3788_v27, %v3627_v59  ;;  %v3477_v22 = vpop.permute.xlu1 %3476 }
 0x910   :  { %v3467_v11 = vpop.permute.xlu0 %3466  ;;  %v3630_v46 = vmul.f32 %v4409_v3, %v3477_v22 }
 0x911   :  { %v3628_v5 = vmul.f32 %v4407_v30, %v3467_v11 }
 0x913   :  { %v3790_v54 = vadd.f32 %v3789_v1, %v3628_v5 }
 0x915   :  { %v3791_v2 = vadd.f32 %v3790_v54, %v3629_v48 }
 0x917   :  { %v3792_v18 = vadd.f32 %v3791_v2, %v3630_v46  ;;  %v3492_v41 = vpop.permute.xlu1 %3491 }
 0x918   :  { %v3482_v28 = vpop.permute.xlu0 %3481  ;;  %v3633_v23 = vmul.f32 %v4412_v60, %v3492_v41 }
 0x919   :  { %v3631_v50 = vmul.f32 %v4410_v12, %v3482_v28 }
 0x91b   :  { %v3793_v44 = vadd.f32 %v3792_v18, %v3631_v50 }
 0x91d   :  { %v3794_v33 = vadd.f32 %v3793_v44, %v3632_v45 }
 0x91f   :  { %v3795_v4 = vadd.f32 %v3794_v33, %v3633_v23  ;;  %v3507_v62 = vpop.permute.xlu1 %3506 }
 0x920   :  { %v3497_v29 = vpop.permute.xlu0 %3496  ;;  %v3636_v10 = vmul.f32 %v4415_v56, %v3507_v62 }
 0x921   :  { %v3634_v52 = vmul.f32 %v4413_v0, %v3497_v29 }
 0x923   :  { %v3796_v42 = vadd.f32 %v3795_v4, %v3634_v52 }
 0x925   :  { %v3797_v24 = vadd.f32 %v3796_v42, %v3635_v37 }
 0x927   :  { %v3798_v25 = vadd.f32 %v3797_v24, %v3636_v10 }
 0x929   :  { %v3799_v61 = vrot.slane %v3798_v25, 4 }
 0x92b   :  { %v3800_v17 = vadd.f32 %v3799_v61, %v3798_v25 }
 0x92d   :  { %v3801_v19 = vrot.slane %v3800_v17, 2 }
 0x92f   :  { %v3802_v35 = vadd.f32 %v3801_v19, %v3800_v17 }
 0x931   :  { %v3803_v58 = vrot.slane %v3802_v35, 1 }
 0x933   :  { %v3804_v13 = vadd.f32 %v3803_v58, %v3802_v35 }
 0x935   :  { %v3819_v15 = vsel %vm2444_vm6, %v3804_v13, %v3818_v9 }
 0x936   :  { %v3821_v31 = vadd.f32 %v3819_v15, %v2868_v55 }
 0x976   :  { %v3839_v53 = vpop.xlane.xlu0 %3838 }
 0x977   :  { %4286 = vrcp.f32 %v3839_v53  ;;  %v3851_v47 = vand.u32 2147483648, %v3839_v53  ;;  %v3849_v21 = vand.u32 2147483647, %v3839_v53  ;;  %vm3845_vm8 = vweird.f32 %v3839_v53 }
 0x979   :  { %v3852_v59 = vor.u32 1.1754944e-38, %v3851_v47  ;;  %vm3850_vm10 = vcmp.eq.f32.partialorder %v3849_v21, 8.507059e+37 }
 0x97d   :  { %v4287_v51 = vpop.eup %4286 }
 0x97e   :  { %v3841_v40 = vmul.f32 %v4287_v51, %v3839_v53  ;;  %vm3846_vm7 = vweird.f32 %v4287_v51 }
 0x97f   :  { %vm3847_vm9 = vmor %vm3845_vm8, %vm3846_vm7 }
 0x980   :  { %v3842_v6 = vsub.f32 1.0, %v3841_v40 }
 0x982   :  { %v3843_v7 = vmul.f32 %v4287_v51, %v3842_v6 }
 0x984   :  { %v3844_v57 = vadd.f32 %v4287_v51, %v3843_v7 }
 0x986   :  { %v3848_v27 = vsel %vm3847_vm9, %v4287_v51, %v3844_v57 }
 0x987   :  { %v3853_v20 = vsel %vm3850_vm10, %v3852_v59, %v3848_v27 }
 0x988   :  { %v3858_v11 = vmul.f32 %v3853_v20, %v3821_v31  ;;  %v3855_v1 = vmul.f32 %v7215_v8, %v3853_v20 }
 0x98a   :  { %3859 = vst [vmem:[#allocation11] sm:$0xff] %v3858_v11 }
 0x98b   :  { %3870 = dma.vmem_to_hbm [thread:$0]  %s3866_s2, 128, %s3868_s7, [#allocation7]   ;;  %3856 = vst [vmem:[#allocation12] sm:$0xff] %v3855_v1 }
 0x98c   :  { %3881 = dma.vmem_to_hbm [thread:$0]  %s3877_s9, 128, %s3879_s12, [#allocation13]  }
 0x98d   :  { %4540 = dma.done.wait [#allocation7], 128  }
 0x98e   :  { %4541 = vsyncadd [#allocation7], 4294967168 }
 0x98f   :  { %4542 = dma.done.wait [#allocation13], 128  }
 0x990   :  { %4543 = vsyncadd [#allocation13], 4294967168 }
 0x991   :  { %3890 = vsyncpa [#allocation6], 1 }
 0x992   :  { %3891 = vsyncpa [#allocation9], 1 }
 0x993   :  { %3892 = vsyncpa [#allocation7], 1 }
 0x994   :  { %3893 = vsyncpa [#allocation13], 1 }

</bundles_post_ra>
